<compile_context>
chip_gen: v6e
topology: v6e:2x2x1
jax: 0.10.0
libtpu: 0.0.40
codegen_flags: <defaults>
</compile_context>

<pallas_src>
import math

import jax
import jax.numpy as jnp
from jax import lax
from jax.experimental import pallas as pl
from jax.experimental.pallas import tpu as pltpu

D_MODEL = 32
N_HEADS = 4
D_HEAD = D_MODEL // N_HEADS
D_FF = 64
N_LAYERS = 2
EPS = 1e-6
NEG_INF = -1e9


# ----------------------------- in-kernel helpers -----------------------------

def _layernorm(x, g, b):
    # nn.LayerNorm semantics: biased variance, eps inside the sqrt.
    mu = jnp.mean(x, axis=-1, keepdims=True)
    var = jnp.mean((x - mu) ** 2, axis=-1, keepdims=True)
    return g * (x - mu) * lax.rsqrt(var + EPS) + b


def _mha(q, k, v, mask, wo, bo):
    """Multi-head attention. q is already scaled (1/sqrt(d_head) folded into W_q).
    mask broadcasts against (Sq, Sk) scores; fully-masked rows give a uniform
    distribution (matches masked_fill + softmax semantics).
    Heads are accumulated through the matching rows of W_o (no concat)."""
    out = bo                                                   # (1, D) broadcasts
    for h in range(N_HEADS):
        sl = slice(h * D_HEAD, (h + 1) * D_HEAD)
        qh, kh, vh = q[:, sl], k[:, sl], v[:, sl]
        s = lax.dot_general(qh, kh, (((1,), (1,)), ((), ())),
                            preferred_element_type=jnp.float32)  # (Sq, Sk)
        s = jnp.where(mask > 0.5, s, NEG_INF)
        s = s - jnp.max(s, axis=-1, keepdims=True)
        e = jnp.exp(s)
        p = e * pl.reciprocal(jnp.sum(e, axis=-1, keepdims=True), approx=True)
        ctx = jnp.dot(p, vh, preferred_element_type=jnp.float32)        # (Sq, Dh)
        out = out + jnp.dot(ctx, wo[sl, :],
                            preferred_element_type=jnp.float32)         # (Sq, D)
    return out


def _self_attn_block(x, mask, wqkv, bqkv, wo, bo, ln):
    """x + MHA(LN(x), LN(x), LN(x), mask) — single LN reused for q/k/v."""
    g, beta = ln[0:1, :], ln[1:2, :]
    y = _layernorm(x, g, beta)
    qkv = jnp.dot(y, wqkv, preferred_element_type=jnp.float32) + bqkv   # (S, 3D)
    q = qkv[:, :D_MODEL]
    k = qkv[:, D_MODEL:2 * D_MODEL]
    v = qkv[:, 2 * D_MODEL:]
    return x + _mha(q, k, v, mask, wo, bo)


def _cross_attn_block(x, mem, mask, wq, bq, wkv, bkv, wo, bo, ln):
    """x + MHA(LN(x), mem, mem, mask) — memory is already final-normed, not re-LN'd."""
    g, beta = ln[0:1, :], ln[1:2, :]
    y = _layernorm(x, g, beta)
    q = jnp.dot(y, wq, preferred_element_type=jnp.float32) + bq
    kv = jnp.dot(mem, wkv, preferred_element_type=jnp.float32) + bkv    # (Sk, 2D)
    k = kv[:, :D_MODEL]
    v = kv[:, D_MODEL:]
    return x + _mha(q, k, v, mask, wo, bo)


def _ffn_block(x, w1, b1, w2, b2, ln):
    g, beta = ln[0:1, :], ln[1:2, :]
    y = _layernorm(x, g, beta)
    h = jnp.maximum(jnp.dot(y, w1, preferred_element_type=jnp.float32) + b1, 0.0)
    return x + jnp.dot(h, w2, preferred_element_type=jnp.float32) + b2


# --------------------------------- fused kernel -------------------------------

def encdec_kernel(
    x_ref, y_ref, srcm_ref, tgtm_ref,
    # encoder (stacked over N_LAYERS)
    e_wqkv, e_bqkv, e_wo, e_bo, e_ln1,
    e_w1, e_b1, e_w2, e_b2, e_ln2, e_norm,
    # decoder (stacked over N_LAYERS)
    d_wqkv, d_bqkv, d_wo, d_bo, d_ln1,
    d_cwq, d_cbq, d_cwkv, d_cbkv, d_cwo, d_cbo, d_ln2,
    d_w1, d_b1, d_w2, d_b2, d_ln3, d_norm,
    o_ref,
):
    x = x_ref[0]            # (S_src, D)  src embeddings (+PE)
    y = y_ref[0]            # (S_tgt, D)  tgt embeddings (+PE)
    src_m = srcm_ref[0]     # (1, S_src)  broadcasts over query rows in-kernel
    tgt_m = tgtm_ref[0]     # (S_tgt, S_tgt)

    # ------------------------------- encoder -------------------------------
    for l in range(N_LAYERS):
        x = _self_attn_block(x, src_m,
                             e_wqkv[l], e_bqkv[l], e_wo[l], e_bo[l], e_ln1[l])
        x = _ffn_block(x, e_w1[l], e_b1[l], e_w2[l], e_b2[l], e_ln2[l])
    en = e_norm[...]
    mem = _layernorm(x, en[0:1, :], en[1:2, :])                 # encoder memory

    # ------------------------------- decoder -------------------------------
    for l in range(N_LAYERS):
        y = _self_attn_block(y, tgt_m,
                             d_wqkv[l], d_bqkv[l], d_wo[l], d_bo[l], d_ln1[l])
        y = _cross_attn_block(y, mem, src_m,
                              d_cwq[l], d_cbq[l], d_cwkv[l], d_cbkv[l],
                              d_cwo[l], d_cbo[l], d_ln2[l])
        y = _ffn_block(y, d_w1[l], d_b1[l], d_w2[l], d_b2[l], d_ln3[l])
    dn = d_norm[...]
    o_ref[0] = _layernorm(y, dn[0:1, :], dn[1:2, :])


# ------------------------------ params / glue --------------------------------

def _positional_encoding(seq_len, d_model):
    pos = jnp.arange(seq_len, dtype=jnp.float32)[:, None]
    i = jnp.arange(0, d_model, 2, dtype=jnp.float32)[None, :]
    div = jnp.exp(-i * (math.log(10000.0) / d_model))
    pe = jnp.zeros((seq_len, d_model), jnp.float32)
    pe = pe.at[:, 0::2].set(jnp.sin(pos * div))
    pe = pe.at[:, 1::2].set(jnp.cos(pos * div))
    return pe


def _ln_params(prefix=()):
    """Row 0 = gamma (ones), row 1 = beta (zeros)."""
    g = jnp.ones(prefix + (1, D_MODEL), jnp.float32)
    b = jnp.zeros(prefix + (1, D_MODEL), jnp.float32)
    return jnp.concatenate([g, b], axis=-2)


def init_params(key, action_vocab, mental_vocab):
    ks = iter(jax.random.split(key, 16))
    std = 0.02

    def dense(shape):
        return std * jax.random.normal(next(ks), shape, jnp.float32)

    params = {
        "action_emb": dense((action_vocab, D_MODEL)),
        "mental_emb": dense((mental_vocab, D_MODEL)),
        "enc": {
            "wqkv": dense((N_LAYERS, D_MODEL, 3 * D_MODEL)),
            "bqkv": jnp.zeros((N_LAYERS, 1, 3 * D_MODEL), jnp.float32),
            "wo": dense((N_LAYERS, D_MODEL, D_MODEL)),
            "bo": jnp.zeros((N_LAYERS, 1, D_MODEL), jnp.float32),
            "ln1": _ln_params((N_LAYERS,)),
            "w1": dense((N_LAYERS, D_MODEL, D_FF)),
            "b1": jnp.zeros((N_LAYERS, 1, D_FF), jnp.float32),
            "w2": dense((N_LAYERS, D_FF, D_MODEL)),
            "b2": jnp.zeros((N_LAYERS, 1, D_MODEL), jnp.float32),
            "ln2": _ln_params((N_LAYERS,)),
            "norm": _ln_params(()),
        },
        "dec": {
            "wqkv": dense((N_LAYERS, D_MODEL, 3 * D_MODEL)),
            "bqkv": jnp.zeros((N_LAYERS, 1, 3 * D_MODEL), jnp.float32),
            "wo": dense((N_LAYERS, D_MODEL, D_MODEL)),
            "bo": jnp.zeros((N_LAYERS, 1, D_MODEL), jnp.float32),
            "ln1": _ln_params((N_LAYERS,)),
            "cwq": dense((N_LAYERS, D_MODEL, D_MODEL)),
            "cbq": jnp.zeros((N_LAYERS, 1, D_MODEL), jnp.float32),
            "cwkv": dense((N_LAYERS, D_MODEL, 2 * D_MODEL)),
            "cbkv": jnp.zeros((N_LAYERS, 1, 2 * D_MODEL), jnp.float32),
            "cwo": dense((N_LAYERS, D_MODEL, D_MODEL)),
            "cbo": jnp.zeros((N_LAYERS, 1, D_MODEL), jnp.float32),
            "ln2": _ln_params((N_LAYERS,)),
            "w1": dense((N_LAYERS, D_MODEL, D_FF)),
            "b1": jnp.zeros((N_LAYERS, 1, D_FF), jnp.float32),
            "w2": dense((N_LAYERS, D_FF, D_MODEL)),
            "b2": jnp.zeros((N_LAYERS, 1, D_MODEL), jnp.float32),
            "ln3": _ln_params((N_LAYERS,)),
            "norm": _ln_params(()),
        },
    }

    # Fold the 1/sqrt(d_head) attention scale into the query projections once at
    # parameter-prep time (removes all per-score multiplies in the kernel).
    s = 1.0 / math.sqrt(D_HEAD)
    e, d = params["enc"], params["dec"]
    e["wqkv"] = e["wqkv"].at[..., :D_MODEL].multiply(s)
    e["bqkv"] = e["bqkv"].at[..., :D_MODEL].multiply(s)
    d["wqkv"] = d["wqkv"].at[..., :D_MODEL].multiply(s)
    d["bqkv"] = d["bqkv"].at[..., :D_MODEL].multiply(s)
    d["cwq"] = d["cwq"] * s
    d["cbq"] = d["cbq"] * s
    return params


def encoder_decoder_forward(params, src, tgt, src_mask, tgt_mask):
    """src: (B, S_src) int32; tgt: (B, S_tgt) int32.
    src_mask: (B, 1, S_src) {0,1}; tgt_mask: (B, S_tgt, S_tgt) {0,1}.
    Returns decoder hidden states (B, S_tgt, D_MODEL) float32."""
    B, S_src = src.shape
    _, S_tgt = tgt.shape

    # Embedding lookup + positional encoding (gather; JAX glue).
    x = jnp.take(params["action_emb"], src, axis=0) * math.sqrt(D_MODEL)
    x = x + _positional_encoding(S_src, D_MODEL)[None]
    y = jnp.take(params["mental_emb"], tgt, axis=0) * math.sqrt(D_MODEL)
    y = y + _positional_encoding(S_tgt, D_MODEL)[None]

    src_mask = src_mask.astype(jnp.float32).reshape(B, 1, S_src)
    tgt_mask = tgt_mask.astype(jnp.float32).reshape(B, S_tgt, S_tgt)

    e, d = params["enc"], params["dec"]
    weights = [
        e["wqkv"], e["bqkv"], e["wo"], e["bo"], e["ln1"],
        e["w1"], e["b1"], e["w2"], e["b2"], e["ln2"], e["norm"],
        d["wqkv"], d["bqkv"], d["wo"], d["bo"], d["ln1"],
        d["cwq"], d["cbq"], d["cwkv"], d["cbkv"], d["cwo"], d["cbo"], d["ln2"],
        d["w1"], d["b1"], d["w2"], d["b2"], d["ln3"], d["norm"],
    ]

    def batch_spec(shape):
        return pl.BlockSpec((1,) + shape[1:],
                            lambda b: (b,) + (0,) * (len(shape) - 1))

    def rep_spec(shape):
        return pl.BlockSpec(shape, lambda b: (0,) * len(shape))

    in_specs = [batch_spec(x.shape), batch_spec(y.shape),
                batch_spec(src_mask.shape), batch_spec(tgt_mask.shape)]
    in_specs += [rep_spec(w.shape) for w in weights]

    return pl.pallas_call(
        encdec_kernel,
        out_shape=jax.ShapeDtypeStruct((B, S_tgt, D_MODEL), jnp.float32),
        grid=(B,),
        in_specs=in_specs,
        out_specs=pl.BlockSpec((1, S_tgt, D_MODEL), lambda b: (b, 0, 0)),
        compiler_params=pltpu.CompilerParams(
            dimension_semantics=("parallel",)),   # 2 TCs on v7x split the batch
    )(x, y, src_mask, tgt_mask, *weights)


# ----------------------------------- main ------------------------------------

if __name__ == "__main__":
    B, S_SRC, S_TGT = 2, 8, 8
    ACTION_VOCAB, MENTAL_VOCAB = 11, 7

    key = jax.random.PRNGKey(0)
    k_params, k_src, k_tgt = jax.random.split(key, 3)
    params = init_params(k_params, ACTION_VOCAB, MENTAL_VOCAB)

    src = jax.random.randint(k_src, (B, S_SRC), 0, ACTION_VOCAB, jnp.int32)
    tgt = jax.random.randint(k_tgt, (B, S_TGT), 0, MENTAL_VOCAB, jnp.int32)
    src_mask = jnp.ones((B, 1, S_SRC), jnp.float32)
    tgt_mask = jnp.tril(jnp.ones((S_TGT, S_TGT), jnp.float32))[None]
    tgt_mask = jnp.broadcast_to(tgt_mask, (B, S_TGT, S_TGT))

    fwd = jax.jit(encoder_decoder_forward)
    out = fwd(params, src, tgt, src_mask, tgt_mask)
    out = jax.block_until_ready(out)
    assert out.shape == (B, S_TGT, D_MODEL) and out.dtype == jnp.float32
    assert bool(jnp.all(jnp.isfinite(out)))
    # TODO(synk): generator / mental_sampler / rule_based_decoder are unused in
    # EncoderDecoder.forward and therefore not implemented.
    print("KERNEL_OK")
</pallas_src>

<mosaic_0001>
module attributes {stable_mosaic.version = 11 : i64} {
  func.func @encdec_kernel(%arg0: i32, %arg1: memref<1x8x32xf32, #tpu.memory_space<vmem>>, %arg2: memref<1x8x32xf32, #tpu.memory_space<vmem>>, %arg3: memref<1x1x8xf32, #tpu.memory_space<vmem>>, %arg4: memref<1x8x8xf32, #tpu.memory_space<vmem>>, %arg5: memref<2x32x96xf32, #tpu.memory_space<vmem>>, %arg6: memref<2x1x96xf32, #tpu.memory_space<vmem>>, %arg7: memref<2x32x32xf32, #tpu.memory_space<vmem>>, %arg8: memref<2x1x32xf32, #tpu.memory_space<vmem>>, %arg9: memref<2x2x32xf32, #tpu.memory_space<vmem>>, %arg10: memref<2x32x64xf32, #tpu.memory_space<vmem>>, %arg11: memref<2x1x64xf32, #tpu.memory_space<vmem>>, %arg12: memref<2x64x32xf32, #tpu.memory_space<vmem>>, %arg13: memref<2x1x32xf32, #tpu.memory_space<vmem>>, %arg14: memref<2x2x32xf32, #tpu.memory_space<vmem>>, %arg15: memref<2x32xf32, #tpu.memory_space<vmem>>, %arg16: memref<2x32x96xf32, #tpu.memory_space<vmem>>, %arg17: memref<2x1x96xf32, #tpu.memory_space<vmem>>, %arg18: memref<2x32x32xf32, #tpu.memory_space<vmem>>, %arg19: memref<2x1x32xf32, #tpu.memory_space<vmem>>, %arg20: memref<2x2x32xf32, #tpu.memory_space<vmem>>, %arg21: memref<2x32x32xf32, #tpu.memory_space<vmem>>, %arg22: memref<2x1x32xf32, #tpu.memory_space<vmem>>, %arg23: memref<2x32x64xf32, #tpu.memory_space<vmem>>, %arg24: memref<2x1x64xf32, #tpu.memory_space<vmem>>, %arg25: memref<2x32x32xf32, #tpu.memory_space<vmem>>, %arg26: memref<2x1x32xf32, #tpu.memory_space<vmem>>, %arg27: memref<2x2x32xf32, #tpu.memory_space<vmem>>, %arg28: memref<2x32x64xf32, #tpu.memory_space<vmem>>, %arg29: memref<2x1x64xf32, #tpu.memory_space<vmem>>, %arg30: memref<2x64x32xf32, #tpu.memory_space<vmem>>, %arg31: memref<2x1x32xf32, #tpu.memory_space<vmem>>, %arg32: memref<2x2x32xf32, #tpu.memory_space<vmem>>, %arg33: memref<2x32xf32, #tpu.memory_space<vmem>>, %arg34: memref<1x8x32xf32, #tpu.memory_space<vmem>>) attributes {dimension_semantics = [#tpu.dimension_semantics<parallel>], iteration_bounds = array<i64: 2>, scalar_prefetch = 0 : i64, scratch_operands = 0 : i64, tpu.core_type = #tpu.core_type<tc>, window_params = [{transform_indices = @transform_0, window_bounds = array<i64: 1, 8, 32>}, {transform_indices = @transform_1, window_bounds = array<i64: 1, 8, 32>}, {transform_indices = @transform_2, window_bounds = array<i64: 1, 1, 8>}, {transform_indices = @transform_3, window_bounds = array<i64: 1, 8, 8>}, {pipeline_mode = #tpu.pipeline_mode<synchronous>, transform_indices = @transform_4, window_bounds = array<i64: 2, 32, 96>}, {pipeline_mode = #tpu.pipeline_mode<synchronous>, transform_indices = @transform_5, window_bounds = array<i64: 2, 1, 96>}, {pipeline_mode = #tpu.pipeline_mode<synchronous>, transform_indices = @transform_6, window_bounds = array<i64: 2, 32, 32>}, {pipeline_mode = #tpu.pipeline_mode<synchronous>, transform_indices = @transform_7, window_bounds = array<i64: 2, 1, 32>}, {pipeline_mode = #tpu.pipeline_mode<synchronous>, transform_indices = @transform_8, window_bounds = array<i64: 2, 2, 32>}, {pipeline_mode = #tpu.pipeline_mode<synchronous>, transform_indices = @transform_9, window_bounds = array<i64: 2, 32, 64>}, {pipeline_mode = #tpu.pipeline_mode<synchronous>, transform_indices = @transform_10, window_bounds = array<i64: 2, 1, 64>}, {pipeline_mode = #tpu.pipeline_mode<synchronous>, transform_indices = @transform_11, window_bounds = array<i64: 2, 64, 32>}, {pipeline_mode = #tpu.pipeline_mode<synchronous>, transform_indices = @transform_12, window_bounds = array<i64: 2, 1, 32>}, {pipeline_mode = #tpu.pipeline_mode<synchronous>, transform_indices = @transform_13, window_bounds = array<i64: 2, 2, 32>}, {pipeline_mode = #tpu.pipeline_mode<synchronous>, transform_indices = @transform_14, window_bounds = array<i64: 2, 32>}, {pipeline_mode = #tpu.pipeline_mode<synchronous>, transform_indices = @transform_15, window_bounds = array<i64: 2, 32, 96>}, {pipeline_mode = #tpu.pipeline_mode<synchronous>, transform_indices = @transform_16, window_bounds = array<i64: 2, 1, 96>}, {pipeline_mode = #tpu.pipeline_mode<synchronous>, transform_indices = @transform_17, window_bounds = array<i64: 2, 32, 32>}, {pipeline_mode = #tpu.pipeline_mode<synchronous>, transform_indices = @transform_18, window_bounds = array<i64: 2, 1, 32>}, {pipeline_mode = #tpu.pipeline_mode<synchronous>, transform_indices = @transform_19, window_bounds = array<i64: 2, 2, 32>}, {pipeline_mode = #tpu.pipeline_mode<synchronous>, transform_indices = @transform_20, window_bounds = array<i64: 2, 32, 32>}, {pipeline_mode = #tpu.pipeline_mode<synchronous>, transform_indices = @transform_21, window_bounds = array<i64: 2, 1, 32>}, {pipeline_mode = #tpu.pipeline_mode<synchronous>, transform_indices = @transform_22, window_bounds = array<i64: 2, 32, 64>}, {pipeline_mode = #tpu.pipeline_mode<synchronous>, transform_indices = @transform_23, window_bounds = array<i64: 2, 1, 64>}, {pipeline_mode = #tpu.pipeline_mode<synchronous>, transform_indices = @transform_24, window_bounds = array<i64: 2, 32, 32>}, {pipeline_mode = #tpu.pipeline_mode<synchronous>, transform_indices = @transform_25, window_bounds = array<i64: 2, 1, 32>}, {pipeline_mode = #tpu.pipeline_mode<synchronous>, transform_indices = @transform_26, window_bounds = array<i64: 2, 2, 32>}, {pipeline_mode = #tpu.pipeline_mode<synchronous>, transform_indices = @transform_27, window_bounds = array<i64: 2, 32, 64>}, {pipeline_mode = #tpu.pipeline_mode<synchronous>, transform_indices = @transform_28, window_bounds = array<i64: 2, 1, 64>}, {pipeline_mode = #tpu.pipeline_mode<synchronous>, transform_indices = @transform_29, window_bounds = array<i64: 2, 64, 32>}, {pipeline_mode = #tpu.pipeline_mode<synchronous>, transform_indices = @transform_30, window_bounds = array<i64: 2, 1, 32>}, {pipeline_mode = #tpu.pipeline_mode<synchronous>, transform_indices = @transform_31, window_bounds = array<i64: 2, 2, 32>}, {pipeline_mode = #tpu.pipeline_mode<synchronous>, transform_indices = @transform_32, window_bounds = array<i64: 2, 32>}, {transform_indices = @transform_33, window_bounds = array<i64: 1, 8, 32>}]} {
    %c0 = arith.constant 0 : index
    %c0_0 = arith.constant 0 : index
    %c0_1 = arith.constant 0 : index
    %0 = vector.load %arg1[%c0, %c0_0, %c0_1] : memref<1x8x32xf32, #tpu.memory_space<vmem>>, vector<1x8x32xf32>
    %1 = vector.shape_cast %0 : vector<1x8x32xf32> to vector<8x32xf32>
    %c0_2 = arith.constant 0 : index
    %c0_3 = arith.constant 0 : index
    %c0_4 = arith.constant 0 : index
    %2 = vector.load %arg2[%c0_2, %c0_3, %c0_4] : memref<1x8x32xf32, #tpu.memory_space<vmem>>, vector<1x8x32xf32>
    %3 = vector.shape_cast %2 : vector<1x8x32xf32> to vector<8x32xf32>
    %c0_5 = arith.constant 0 : index
    %c0_6 = arith.constant 0 : index
    %c0_7 = arith.constant 0 : index
    %4 = vector.load %arg3[%c0_5, %c0_6, %c0_7] : memref<1x1x8xf32, #tpu.memory_space<vmem>>, vector<1x1x8xf32>
    %5 = vector.shape_cast %4 : vector<1x1x8xf32> to vector<1x8xf32>
    %c0_8 = arith.constant 0 : index
    %c0_9 = arith.constant 0 : index
    %c0_10 = arith.constant 0 : index
    %6 = vector.load %arg4[%c0_8, %c0_9, %c0_10] : memref<1x8x8xf32, #tpu.memory_space<vmem>>, vector<1x8x8xf32>
    %7 = vector.shape_cast %6 : vector<1x8x8xf32> to vector<8x8xf32>
    %c0_11 = arith.constant 0 : index
    %c0_12 = arith.constant 0 : index
    %c0_13 = arith.constant 0 : index
    %8 = vector.load %arg5[%c0_11, %c0_12, %c0_13] : memref<2x32x96xf32, #tpu.memory_space<vmem>>, vector<1x32x96xf32>
    %9 = vector.shape_cast %8 : vector<1x32x96xf32> to vector<32x96xf32>
    %c0_14 = arith.constant 0 : index
    %c0_15 = arith.constant 0 : index
    %c0_16 = arith.constant 0 : index
    %10 = vector.load %arg6[%c0_14, %c0_15, %c0_16] : memref<2x1x96xf32, #tpu.memory_space<vmem>>, vector<1x1x96xf32>
    %11 = vector.shape_cast %10 : vector<1x1x96xf32> to vector<1x96xf32>
    %c0_17 = arith.constant 0 : index
    %c0_18 = arith.constant 0 : index
    %c0_19 = arith.constant 0 : index
    %12 = vector.load %arg7[%c0_17, %c0_18, %c0_19] : memref<2x32x32xf32, #tpu.memory_space<vmem>>, vector<1x32x32xf32>
    %13 = vector.shape_cast %12 : vector<1x32x32xf32> to vector<32x32xf32>
    %c0_20 = arith.constant 0 : index
    %c0_21 = arith.constant 0 : index
    %c0_22 = arith.constant 0 : index
    %14 = vector.load %arg8[%c0_20, %c0_21, %c0_22] : memref<2x1x32xf32, #tpu.memory_space<vmem>>, vector<1x1x32xf32>
    %15 = vector.shape_cast %14 : vector<1x1x32xf32> to vector<1x32xf32>
    %c0_23 = arith.constant 0 : index
    %c0_24 = arith.constant 0 : index
    %c0_25 = arith.constant 0 : index
    %16 = vector.load %arg9[%c0_23, %c0_24, %c0_25] : memref<2x2x32xf32, #tpu.memory_space<vmem>>, vector<1x2x32xf32>
    %17 = vector.shape_cast %16 : vector<1x2x32xf32> to vector<2x32xf32>
    %18 = vector.extract_strided_slice %17 {offsets = [0, 0], sizes = [1, 32], strides = [1, 1]} : vector<2x32xf32> to vector<1x32xf32>
    %19 = vector.extract_strided_slice %17 {offsets = [1, 0], sizes = [1, 32], strides = [1, 1]} : vector<2x32xf32> to vector<1x32xf32>
    %cst = arith.constant dense<0.000000e+00> : vector<8xf32>
    %20 = vector.multi_reduction <add>, %1, %cst [1] : vector<8x32xf32> to vector<8xf32>
    %21 = vector.shape_cast %20 : vector<8xf32> to vector<8x1xf32>
    %cst_26 = arith.constant 3.200000e+01 : f32
    %22 = vector.broadcast %cst_26 : f32 to vector<8x1xf32>
    %23 = arith.divf %21, %22 : vector<8x1xf32>
    %24 = vector.broadcast %23 : vector<8x1xf32> to vector<8x32xf32>
    %25 = arith.subf %1, %24 : vector<8x32xf32>
    %26 = arith.mulf %25, %25 : vector<8x32xf32>
    %cst_27 = arith.constant dense<0.000000e+00> : vector<8xf32>
    %27 = vector.multi_reduction <add>, %26, %cst_27 [1] : vector<8x32xf32> to vector<8xf32>
    %28 = vector.shape_cast %27 : vector<8xf32> to vector<8x1xf32>
    %cst_28 = arith.constant 3.200000e+01 : f32
    %29 = vector.broadcast %cst_28 : f32 to vector<8x1xf32>
    %30 = arith.divf %28, %29 : vector<8x1xf32>
    %31 = vector.broadcast %23 : vector<8x1xf32> to vector<8x32xf32>
    %32 = arith.subf %1, %31 : vector<8x32xf32>
    %33 = vector.broadcast %18 : vector<1x32xf32> to vector<8x32xf32>
    %34 = arith.mulf %33, %32 : vector<8x32xf32>
    %cst_29 = arith.constant 9.99999997E-7 : f32
    %35 = vector.broadcast %cst_29 : f32 to vector<8x1xf32>
    %36 = arith.addf %30, %35 : vector<8x1xf32>
    %37 = math.rsqrt %36 : vector<8x1xf32>
    %38 = vector.broadcast %37 : vector<8x1xf32> to vector<8x32xf32>
    %39 = arith.mulf %34, %38 : vector<8x32xf32>
    %40 = vector.broadcast %19 : vector<1x32xf32> to vector<8x32xf32>
    %41 = arith.addf %39, %40 : vector<8x32xf32>
    %cst_30 = arith.constant dense<0.000000e+00> : vector<8x96xf32>
    %42 = tpu.matmul %41, %9, %cst_30 {dimension_numbers = #tpu.dot_dimension_numbers<[1], [0], [0], [1], [0, 0, 1, 1], [], []>} : vector<8x32xf32>, vector<32x96xf32>, vector<8x96xf32> -> vector<8x96xf32>
    %43 = vector.broadcast %11 : vector<1x96xf32> to vector<8x96xf32>
    %44 = arith.addf %42, %43 : vector<8x96xf32>
    %45 = vector.extract_strided_slice %44 {offsets = [0, 0], sizes = [8, 32], strides = [1, 1]} : vector<8x96xf32> to vector<8x32xf32>
    %46 = vector.extract_strided_slice %44 {offsets = [0, 32], sizes = [8, 32], strides = [1, 1]} : vector<8x96xf32> to vector<8x32xf32>
    %47 = vector.extract_strided_slice %44 {offsets = [0, 64], sizes = [8, 32], strides = [1, 1]} : vector<8x96xf32> to vector<8x32xf32>
    %48 = vector.extract_strided_slice %45 {offsets = [0, 0], sizes = [8, 8], strides = [1, 1]} : vector<8x32xf32> to vector<8x8xf32>
    %49 = vector.extract_strided_slice %46 {offsets = [0, 0], sizes = [8, 8], strides = [1, 1]} : vector<8x32xf32> to vector<8x8xf32>
    %50 = vector.extract_strided_slice %47 {offsets = [0, 0], sizes = [8, 8], strides = [1, 1]} : vector<8x32xf32> to vector<8x8xf32>
    %cst_31 = arith.constant dense<0.000000e+00> : vector<8x8xf32>
    %51 = tpu.matmul %48, %49, %cst_31 {dimension_numbers = #tpu.dot_dimension_numbers<[1], [1], [0], [0], [0, 0, 1, 0], [], []>} : vector<8x8xf32>, vector<8x8xf32>, vector<8x8xf32> -> vector<8x8xf32>
    %cst_32 = arith.constant 5.000000e-01 : f32
    %52 = vector.broadcast %cst_32 : f32 to vector<1x8xf32>
    %53 = arith.cmpf ogt, %5, %52 : vector<1x8xf32>
    %cst_33 = arith.constant -1.000000e+09 : f32
    %54 = vector.shape_cast %53 : vector<1x8xi1> to vector<1x8xi1>
    %55 = vector.broadcast %54 : vector<1x8xi1> to vector<8x8xi1>
    %56 = vector.broadcast %cst_33 : f32 to vector<8x8xf32>
    %57 = arith.select %55, %51, %56 : vector<8x8xi1>, vector<8x8xf32>
    %cst_34 = arith.constant dense<0xFF800000> : vector<8xf32>
    %58 = vector.multi_reduction <maximumf>, %57, %cst_34 [1] : vector<8x8xf32> to vector<8xf32>
    %59 = vector.shape_cast %58 : vector<8xf32> to vector<8x1xf32>
    %60 = vector.broadcast %59 : vector<8x1xf32> to vector<8x8xf32>
    %61 = arith.subf %57, %60 : vector<8x8xf32>
    %62 = math.exp %61 : vector<8x8xf32>
    %cst_35 = arith.constant dense<0.000000e+00> : vector<8xf32>
    %63 = vector.multi_reduction <add>, %62, %cst_35 [1] : vector<8x8xf32> to vector<8xf32>
    %64 = vector.shape_cast %63 : vector<8xf32> to vector<8x1xf32>
    %65 = tpu.reciprocal %64 {approx = true} : vector<8x1xf32> -> vector<8x1xf32>
    %66 = vector.broadcast %65 : vector<8x1xf32> to vector<8x8xf32>
    %67 = arith.mulf %62, %66 : vector<8x8xf32>
    %cst_36 = arith.constant dense<0.000000e+00> : vector<8x8xf32>
    %68 = tpu.matmul %67, %50, %cst_36 {dimension_numbers = #tpu.dot_dimension_numbers<[1], [0], [0], [1], [0, 0, 1, 1], [], []>} : vector<8x8xf32>, vector<8x8xf32>, vector<8x8xf32> -> vector<8x8xf32>
    %69 = vector.extract_strided_slice %13 {offsets = [0, 0], sizes = [8, 32], strides = [1, 1]} : vector<32x32xf32> to vector<8x32xf32>
    %cst_37 = arith.constant dense<0.000000e+00> : vector<8x32xf32>
    %70 = tpu.matmul %68, %69, %cst_37 {dimension_numbers = #tpu.dot_dimension_numbers<[1], [0], [0], [1], [0, 0, 1, 1], [], []>} : vector<8x8xf32>, vector<8x32xf32>, vector<8x32xf32> -> vector<8x32xf32>
    %71 = vector.broadcast %15 : vector<1x32xf32> to vector<8x32xf32>
    %72 = arith.addf %71, %70 : vector<8x32xf32>
    %73 = vector.extract_strided_slice %45 {offsets = [0, 8], sizes = [8, 8], strides = [1, 1]} : vector<8x32xf32> to vector<8x8xf32>
    %74 = vector.extract_strided_slice %46 {offsets = [0, 8], sizes = [8, 8], strides = [1, 1]} : vector<8x32xf32> to vector<8x8xf32>
    %75 = vector.extract_strided_slice %47 {offsets = [0, 8], sizes = [8, 8], strides = [1, 1]} : vector<8x32xf32> to vector<8x8xf32>
    %cst_38 = arith.constant dense<0.000000e+00> : vector<8x8xf32>
    %76 = tpu.matmul %73, %74, %cst_38 {dimension_numbers = #tpu.dot_dimension_numbers<[1], [1], [0], [0], [0, 0, 1, 0], [], []>} : vector<8x8xf32>, vector<8x8xf32>, vector<8x8xf32> -> vector<8x8xf32>
    %cst_39 = arith.constant 5.000000e-01 : f32
    %77 = vector.broadcast %cst_39 : f32 to vector<1x8xf32>
    %78 = arith.cmpf ogt, %5, %77 : vector<1x8xf32>
    %cst_40 = arith.constant -1.000000e+09 : f32
    %79 = vector.shape_cast %78 : vector<1x8xi1> to vector<1x8xi1>
    %80 = vector.broadcast %79 : vector<1x8xi1> to vector<8x8xi1>
    %81 = vector.broadcast %cst_40 : f32 to vector<8x8xf32>
    %82 = arith.select %80, %76, %81 : vector<8x8xi1>, vector<8x8xf32>
    %cst_41 = arith.constant dense<0xFF800000> : vector<8xf32>
    %83 = vector.multi_reduction <maximumf>, %82, %cst_41 [1] : vector<8x8xf32> to vector<8xf32>
    %84 = vector.shape_cast %83 : vector<8xf32> to vector<8x1xf32>
    %85 = vector.broadcast %84 : vector<8x1xf32> to vector<8x8xf32>
    %86 = arith.subf %82, %85 : vector<8x8xf32>
    %87 = math.exp %86 : vector<8x8xf32>
    %cst_42 = arith.constant dense<0.000000e+00> : vector<8xf32>
    %88 = vector.multi_reduction <add>, %87, %cst_42 [1] : vector<8x8xf32> to vector<8xf32>
    %89 = vector.shape_cast %88 : vector<8xf32> to vector<8x1xf32>
    %90 = tpu.reciprocal %89 {approx = true} : vector<8x1xf32> -> vector<8x1xf32>
    %91 = vector.broadcast %90 : vector<8x1xf32> to vector<8x8xf32>
    %92 = arith.mulf %87, %91 : vector<8x8xf32>
    %cst_43 = arith.constant dense<0.000000e+00> : vector<8x8xf32>
    %93 = tpu.matmul %92, %75, %cst_43 {dimension_numbers = #tpu.dot_dimension_numbers<[1], [0], [0], [1], [0, 0, 1, 1], [], []>} : vector<8x8xf32>, vector<8x8xf32>, vector<8x8xf32> -> vector<8x8xf32>
    %94 = vector.extract_strided_slice %13 {offsets = [8, 0], sizes = [8, 32], strides = [1, 1]} : vector<32x32xf32> to vector<8x32xf32>
    %cst_44 = arith.constant dense<0.000000e+00> : vector<8x32xf32>
    %95 = tpu.matmul %93, %94, %cst_44 {dimension_numbers = #tpu.dot_dimension_numbers<[1], [0], [0], [1], [0, 0, 1, 1], [], []>} : vector<8x8xf32>, vector<8x32xf32>, vector<8x32xf32> -> vector<8x32xf32>
    %96 = arith.addf %72, %95 : vector<8x32xf32>
    %97 = vector.extract_strided_slice %45 {offsets = [0, 16], sizes = [8, 8], strides = [1, 1]} : vector<8x32xf32> to vector<8x8xf32>
    %98 = vector.extract_strided_slice %46 {offsets = [0, 16], sizes = [8, 8], strides = [1, 1]} : vector<8x32xf32> to vector<8x8xf32>
    %99 = vector.extract_strided_slice %47 {offsets = [0, 16], sizes = [8, 8], strides = [1, 1]} : vector<8x32xf32> to vector<8x8xf32>
    %cst_45 = arith.constant dense<0.000000e+00> : vector<8x8xf32>
    %100 = tpu.matmul %97, %98, %cst_45 {dimension_numbers = #tpu.dot_dimension_numbers<[1], [1], [0], [0], [0, 0, 1, 0], [], []>} : vector<8x8xf32>, vector<8x8xf32>, vector<8x8xf32> -> vector<8x8xf32>
    %cst_46 = arith.constant 5.000000e-01 : f32
    %101 = vector.broadcast %cst_46 : f32 to vector<1x8xf32>
    %102 = arith.cmpf ogt, %5, %101 : vector<1x8xf32>
    %cst_47 = arith.constant -1.000000e+09 : f32
    %103 = vector.shape_cast %102 : vector<1x8xi1> to vector<1x8xi1>
    %104 = vector.broadcast %103 : vector<1x8xi1> to vector<8x8xi1>
    %105 = vector.broadcast %cst_47 : f32 to vector<8x8xf32>
    %106 = arith.select %104, %100, %105 : vector<8x8xi1>, vector<8x8xf32>
    %cst_48 = arith.constant dense<0xFF800000> : vector<8xf32>
    %107 = vector.multi_reduction <maximumf>, %106, %cst_48 [1] : vector<8x8xf32> to vector<8xf32>
    %108 = vector.shape_cast %107 : vector<8xf32> to vector<8x1xf32>
    %109 = vector.broadcast %108 : vector<8x1xf32> to vector<8x8xf32>
    %110 = arith.subf %106, %109 : vector<8x8xf32>
    %111 = math.exp %110 : vector<8x8xf32>
    %cst_49 = arith.constant dense<0.000000e+00> : vector<8xf32>
    %112 = vector.multi_reduction <add>, %111, %cst_49 [1] : vector<8x8xf32> to vector<8xf32>
    %113 = vector.shape_cast %112 : vector<8xf32> to vector<8x1xf32>
    %114 = tpu.reciprocal %113 {approx = true} : vector<8x1xf32> -> vector<8x1xf32>
    %115 = vector.broadcast %114 : vector<8x1xf32> to vector<8x8xf32>
    %116 = arith.mulf %111, %115 : vector<8x8xf32>
    %cst_50 = arith.constant dense<0.000000e+00> : vector<8x8xf32>
    %117 = tpu.matmul %116, %99, %cst_50 {dimension_numbers = #tpu.dot_dimension_numbers<[1], [0], [0], [1], [0, 0, 1, 1], [], []>} : vector<8x8xf32>, vector<8x8xf32>, vector<8x8xf32> -> vector<8x8xf32>
    %118 = vector.extract_strided_slice %13 {offsets = [16, 0], sizes = [8, 32], strides = [1, 1]} : vector<32x32xf32> to vector<8x32xf32>
    %cst_51 = arith.constant dense<0.000000e+00> : vector<8x32xf32>
    %119 = tpu.matmul %117, %118, %cst_51 {dimension_numbers = #tpu.dot_dimension_numbers<[1], [0], [0], [1], [0, 0, 1, 1], [], []>} : vector<8x8xf32>, vector<8x32xf32>, vector<8x32xf32> -> vector<8x32xf32>
    %120 = arith.addf %96, %119 : vector<8x32xf32>
    %121 = vector.extract_strided_slice %45 {offsets = [0, 24], sizes = [8, 8], strides = [1, 1]} : vector<8x32xf32> to vector<8x8xf32>
    %122 = vector.extract_strided_slice %46 {offsets = [0, 24], sizes = [8, 8], strides = [1, 1]} : vector<8x32xf32> to vector<8x8xf32>
    %123 = vector.extract_strided_slice %47 {offsets = [0, 24], sizes = [8, 8], strides = [1, 1]} : vector<8x32xf32> to vector<8x8xf32>
    %cst_52 = arith.constant dense<0.000000e+00> : vector<8x8xf32>
    %124 = tpu.matmul %121, %122, %cst_52 {dimension_numbers = #tpu.dot_dimension_numbers<[1], [1], [0], [0], [0, 0, 1, 0], [], []>} : vector<8x8xf32>, vector<8x8xf32>, vector<8x8xf32> -> vector<8x8xf32>
    %cst_53 = arith.constant 5.000000e-01 : f32
    %125 = vector.broadcast %cst_53 : f32 to vector<1x8xf32>
    %126 = arith.cmpf ogt, %5, %125 : vector<1x8xf32>
    %cst_54 = arith.constant -1.000000e+09 : f32
    %127 = vector.shape_cast %126 : vector<1x8xi1> to vector<1x8xi1>
    %128 = vector.broadcast %127 : vector<1x8xi1> to vector<8x8xi1>
    %129 = vector.broadcast %cst_54 : f32 to vector<8x8xf32>
    %130 = arith.select %128, %124, %129 : vector<8x8xi1>, vector<8x8xf32>
    %cst_55 = arith.constant dense<0xFF800000> : vector<8xf32>
    %131 = vector.multi_reduction <maximumf>, %130, %cst_55 [1] : vector<8x8xf32> to vector<8xf32>
    %132 = vector.shape_cast %131 : vector<8xf32> to vector<8x1xf32>
    %133 = vector.broadcast %132 : vector<8x1xf32> to vector<8x8xf32>
    %134 = arith.subf %130, %133 : vector<8x8xf32>
    %135 = math.exp %134 : vector<8x8xf32>
    %cst_56 = arith.constant dense<0.000000e+00> : vector<8xf32>
    %136 = vector.multi_reduction <add>, %135, %cst_56 [1] : vector<8x8xf32> to vector<8xf32>
    %137 = vector.shape_cast %136 : vector<8xf32> to vector<8x1xf32>
    %138 = tpu.reciprocal %137 {approx = true} : vector<8x1xf32> -> vector<8x1xf32>
    %139 = vector.broadcast %138 : vector<8x1xf32> to vector<8x8xf32>
    %140 = arith.mulf %135, %139 : vector<8x8xf32>
    %cst_57 = arith.constant dense<0.000000e+00> : vector<8x8xf32>
    %141 = tpu.matmul %140, %123, %cst_57 {dimension_numbers = #tpu.dot_dimension_numbers<[1], [0], [0], [1], [0, 0, 1, 1], [], []>} : vector<8x8xf32>, vector<8x8xf32>, vector<8x8xf32> -> vector<8x8xf32>
    %142 = vector.extract_strided_slice %13 {offsets = [24, 0], sizes = [8, 32], strides = [1, 1]} : vector<32x32xf32> to vector<8x32xf32>
    %cst_58 = arith.constant dense<0.000000e+00> : vector<8x32xf32>
    %143 = tpu.matmul %141, %142, %cst_58 {dimension_numbers = #tpu.dot_dimension_numbers<[1], [0], [0], [1], [0, 0, 1, 1], [], []>} : vector<8x8xf32>, vector<8x32xf32>, vector<8x32xf32> -> vector<8x32xf32>
    %144 = arith.addf %120, %143 : vector<8x32xf32>
    %145 = arith.addf %1, %144 : vector<8x32xf32>
    %c0_59 = arith.constant 0 : index
    %c0_60 = arith.constant 0 : index
    %c0_61 = arith.constant 0 : index
    %146 = vector.load %arg10[%c0_59, %c0_60, %c0_61] : memref<2x32x64xf32, #tpu.memory_space<vmem>>, vector<1x32x64xf32>
    %147 = vector.shape_cast %146 : vector<1x32x64xf32> to vector<32x64xf32>
    %c0_62 = arith.constant 0 : index
    %c0_63 = arith.constant 0 : index
    %c0_64 = arith.constant 0 : index
    %148 = vector.load %arg11[%c0_62, %c0_63, %c0_64] : memref<2x1x64xf32, #tpu.memory_space<vmem>>, vector<1x1x64xf32>
    %149 = vector.shape_cast %148 : vector<1x1x64xf32> to vector<1x64xf32>
    %c0_65 = arith.constant 0 : index
    %c0_66 = arith.constant 0 : index
    %c0_67 = arith.constant 0 : index
    %150 = vector.load %arg12[%c0_65, %c0_66, %c0_67] : memref<2x64x32xf32, #tpu.memory_space<vmem>>, vector<1x64x32xf32>
    %151 = vector.shape_cast %150 : vector<1x64x32xf32> to vector<64x32xf32>
    %c0_68 = arith.constant 0 : index
    %c0_69 = arith.constant 0 : index
    %c0_70 = arith.constant 0 : index
    %152 = vector.load %arg13[%c0_68, %c0_69, %c0_70] : memref<2x1x32xf32, #tpu.memory_space<vmem>>, vector<1x1x32xf32>
    %153 = vector.shape_cast %152 : vector<1x1x32xf32> to vector<1x32xf32>
    %c0_71 = arith.constant 0 : index
    %c0_72 = arith.constant 0 : index
    %c0_73 = arith.constant 0 : index
    %154 = vector.load %arg14[%c0_71, %c0_72, %c0_73] : memref<2x2x32xf32, #tpu.memory_space<vmem>>, vector<1x2x32xf32>
    %155 = vector.shape_cast %154 : vector<1x2x32xf32> to vector<2x32xf32>
    %156 = vector.extract_strided_slice %155 {offsets = [0, 0], sizes = [1, 32], strides = [1, 1]} : vector<2x32xf32> to vector<1x32xf32>
    %157 = vector.extract_strided_slice %155 {offsets = [1, 0], sizes = [1, 32], strides = [1, 1]} : vector<2x32xf32> to vector<1x32xf32>
    %cst_74 = arith.constant dense<0.000000e+00> : vector<8xf32>
    %158 = vector.multi_reduction <add>, %145, %cst_74 [1] : vector<8x32xf32> to vector<8xf32>
    %159 = vector.shape_cast %158 : vector<8xf32> to vector<8x1xf32>
    %cst_75 = arith.constant 3.200000e+01 : f32
    %160 = vector.broadcast %cst_75 : f32 to vector<8x1xf32>
    %161 = arith.divf %159, %160 : vector<8x1xf32>
    %162 = vector.broadcast %161 : vector<8x1xf32> to vector<8x32xf32>
    %163 = arith.subf %145, %162 : vector<8x32xf32>
    %164 = arith.mulf %163, %163 : vector<8x32xf32>
    %cst_76 = arith.constant dense<0.000000e+00> : vector<8xf32>
    %165 = vector.multi_reduction <add>, %164, %cst_76 [1] : vector<8x32xf32> to vector<8xf32>
    %166 = vector.shape_cast %165 : vector<8xf32> to vector<8x1xf32>
    %cst_77 = arith.constant 3.200000e+01 : f32
    %167 = vector.broadcast %cst_77 : f32 to vector<8x1xf32>
    %168 = arith.divf %166, %167 : vector<8x1xf32>
    %169 = vector.broadcast %161 : vector<8x1xf32> to vector<8x32xf32>
    %170 = arith.subf %145, %169 : vector<8x32xf32>
    %171 = vector.broadcast %156 : vector<1x32xf32> to vector<8x32xf32>
    %172 = arith.mulf %171, %170 : vector<8x32xf32>
    %cst_78 = arith.constant 9.99999997E-7 : f32
    %173 = vector.broadcast %cst_78 : f32 to vector<8x1xf32>
    %174 = arith.addf %168, %173 : vector<8x1xf32>
    %175 = math.rsqrt %174 : vector<8x1xf32>
    %176 = vector.broadcast %175 : vector<8x1xf32> to vector<8x32xf32>
    %177 = arith.mulf %172, %176 : vector<8x32xf32>
    %178 = vector.broadcast %157 : vector<1x32xf32> to vector<8x32xf32>
    %179 = arith.addf %177, %178 : vector<8x32xf32>
    %cst_79 = arith.constant dense<0.000000e+00> : vector<8x64xf32>
    %180 = tpu.matmul %179, %147, %cst_79 {dimension_numbers = #tpu.dot_dimension_numbers<[1], [0], [0], [1], [0, 0, 1, 1], [], []>} : vector<8x32xf32>, vector<32x64xf32>, vector<8x64xf32> -> vector<8x64xf32>
    %181 = vector.broadcast %149 : vector<1x64xf32> to vector<8x64xf32>
    %182 = arith.addf %180, %181 : vector<8x64xf32>
    %cst_80 = arith.constant 0.000000e+00 : f32
    %183 = vector.broadcast %cst_80 : f32 to vector<8x64xf32>
    %184 = arith.maximumf %182, %183 : vector<8x64xf32>
    %cst_81 = arith.constant dense<0.000000e+00> : vector<8x32xf32>
    %185 = tpu.matmul %184, %151, %cst_81 {dimension_numbers = #tpu.dot_dimension_numbers<[1], [0], [0], [1], [0, 0, 1, 1], [], []>} : vector<8x64xf32>, vector<64x32xf32>, vector<8x32xf32> -> vector<8x32xf32>
    %186 = arith.addf %145, %185 : vector<8x32xf32>
    %187 = vector.broadcast %153 : vector<1x32xf32> to vector<8x32xf32>
    %188 = arith.addf %186, %187 : vector<8x32xf32>
    %c1 = arith.constant 1 : index
    %c0_82 = arith.constant 0 : index
    %c0_83 = arith.constant 0 : index
    %189 = vector.load %arg5[%c1, %c0_82, %c0_83] : memref<2x32x96xf32, #tpu.memory_space<vmem>>, vector<1x32x96xf32>
    %190 = vector.shape_cast %189 : vector<1x32x96xf32> to vector<32x96xf32>
    %c1_84 = arith.constant 1 : index
    %c0_85 = arith.constant 0 : index
    %c0_86 = arith.constant 0 : index
    %191 = vector.load %arg6[%c1_84, %c0_85, %c0_86] : memref<2x1x96xf32, #tpu.memory_space<vmem>>, vector<1x1x96xf32>
    %192 = vector.shape_cast %191 : vector<1x1x96xf32> to vector<1x96xf32>
    %c1_87 = arith.constant 1 : index
    %c0_88 = arith.constant 0 : index
    %c0_89 = arith.constant 0 : index
    %193 = vector.load %arg7[%c1_87, %c0_88, %c0_89] : memref<2x32x32xf32, #tpu.memory_space<vmem>>, vector<1x32x32xf32>
    %194 = vector.shape_cast %193 : vector<1x32x32xf32> to vector<32x32xf32>
    %c1_90 = arith.constant 1 : index
    %c0_91 = arith.constant 0 : index
    %c0_92 = arith.constant 0 : index
    %195 = vector.load %arg8[%c1_90, %c0_91, %c0_92] : memref<2x1x32xf32, #tpu.memory_space<vmem>>, vector<1x1x32xf32>
    %196 = vector.shape_cast %195 : vector<1x1x32xf32> to vector<1x32xf32>
    %c1_93 = arith.constant 1 : index
    %c0_94 = arith.constant 0 : index
    %c0_95 = arith.constant 0 : index
    %197 = vector.load %arg9[%c1_93, %c0_94, %c0_95] : memref<2x2x32xf32, #tpu.memory_space<vmem>>, vector<1x2x32xf32>
    %198 = vector.shape_cast %197 : vector<1x2x32xf32> to vector<2x32xf32>
    %199 = vector.extract_strided_slice %198 {offsets = [0, 0], sizes = [1, 32], strides = [1, 1]} : vector<2x32xf32> to vector<1x32xf32>
    %200 = vector.extract_strided_slice %198 {offsets = [1, 0], sizes = [1, 32], strides = [1, 1]} : vector<2x32xf32> to vector<1x32xf32>
    %cst_96 = arith.constant dense<0.000000e+00> : vector<8xf32>
    %201 = vector.multi_reduction <add>, %188, %cst_96 [1] : vector<8x32xf32> to vector<8xf32>
    %202 = vector.shape_cast %201 : vector<8xf32> to vector<8x1xf32>
    %cst_97 = arith.constant 3.200000e+01 : f32
    %203 = vector.broadcast %cst_97 : f32 to vector<8x1xf32>
    %204 = arith.divf %202, %203 : vector<8x1xf32>
    %205 = vector.broadcast %204 : vector<8x1xf32> to vector<8x32xf32>
    %206 = arith.subf %188, %205 : vector<8x32xf32>
    %207 = arith.mulf %206, %206 : vector<8x32xf32>
    %cst_98 = arith.constant dense<0.000000e+00> : vector<8xf32>
    %208 = vector.multi_reduction <add>, %207, %cst_98 [1] : vector<8x32xf32> to vector<8xf32>
    %209 = vector.shape_cast %208 : vector<8xf32> to vector<8x1xf32>
    %cst_99 = arith.constant 3.200000e+01 : f32
    %210 = vector.broadcast %cst_99 : f32 to vector<8x1xf32>
    %211 = arith.divf %209, %210 : vector<8x1xf32>
    %212 = vector.broadcast %204 : vector<8x1xf32> to vector<8x32xf32>
    %213 = arith.subf %188, %212 : vector<8x32xf32>
    %214 = vector.broadcast %199 : vector<1x32xf32> to vector<8x32xf32>
    %215 = arith.mulf %214, %213 : vector<8x32xf32>
    %cst_100 = arith.constant 9.99999997E-7 : f32
    %216 = vector.broadcast %cst_100 : f32 to vector<8x1xf32>
    %217 = arith.addf %211, %216 : vector<8x1xf32>
    %218 = math.rsqrt %217 : vector<8x1xf32>
    %219 = vector.broadcast %218 : vector<8x1xf32> to vector<8x32xf32>
    %220 = arith.mulf %215, %219 : vector<8x32xf32>
    %221 = vector.broadcast %200 : vector<1x32xf32> to vector<8x32xf32>
    %222 = arith.addf %220, %221 : vector<8x32xf32>
    %cst_101 = arith.constant dense<0.000000e+00> : vector<8x96xf32>
    %223 = tpu.matmul %222, %190, %cst_101 {dimension_numbers = #tpu.dot_dimension_numbers<[1], [0], [0], [1], [0, 0, 1, 1], [], []>} : vector<8x32xf32>, vector<32x96xf32>, vector<8x96xf32> -> vector<8x96xf32>
    %224 = vector.broadcast %192 : vector<1x96xf32> to vector<8x96xf32>
    %225 = arith.addf %223, %224 : vector<8x96xf32>
    %226 = vector.extract_strided_slice %225 {offsets = [0, 0], sizes = [8, 32], strides = [1, 1]} : vector<8x96xf32> to vector<8x32xf32>
    %227 = vector.extract_strided_slice %225 {offsets = [0, 32], sizes = [8, 32], strides = [1, 1]} : vector<8x96xf32> to vector<8x32xf32>
    %228 = vector.extract_strided_slice %225 {offsets = [0, 64], sizes = [8, 32], strides = [1, 1]} : vector<8x96xf32> to vector<8x32xf32>
    %229 = vector.extract_strided_slice %226 {offsets = [0, 0], sizes = [8, 8], strides = [1, 1]} : vector<8x32xf32> to vector<8x8xf32>
    %230 = vector.extract_strided_slice %227 {offsets = [0, 0], sizes = [8, 8], strides = [1, 1]} : vector<8x32xf32> to vector<8x8xf32>
    %231 = vector.extract_strided_slice %228 {offsets = [0, 0], sizes = [8, 8], strides = [1, 1]} : vector<8x32xf32> to vector<8x8xf32>
    %cst_102 = arith.constant dense<0.000000e+00> : vector<8x8xf32>
    %232 = tpu.matmul %229, %230, %cst_102 {dimension_numbers = #tpu.dot_dimension_numbers<[1], [1], [0], [0], [0, 0, 1, 0], [], []>} : vector<8x8xf32>, vector<8x8xf32>, vector<8x8xf32> -> vector<8x8xf32>
    %cst_103 = arith.constant 5.000000e-01 : f32
    %233 = vector.broadcast %cst_103 : f32 to vector<1x8xf32>
    %234 = arith.cmpf ogt, %5, %233 : vector<1x8xf32>
    %cst_104 = arith.constant -1.000000e+09 : f32
    %235 = vector.shape_cast %234 : vector<1x8xi1> to vector<1x8xi1>
    %236 = vector.broadcast %235 : vector<1x8xi1> to vector<8x8xi1>
    %237 = vector.broadcast %cst_104 : f32 to vector<8x8xf32>
    %238 = arith.select %236, %232, %237 : vector<8x8xi1>, vector<8x8xf32>
    %cst_105 = arith.constant dense<0xFF800000> : vector<8xf32>
    %239 = vector.multi_reduction <maximumf>, %238, %cst_105 [1] : vector<8x8xf32> to vector<8xf32>
    %240 = vector.shape_cast %239 : vector<8xf32> to vector<8x1xf32>
    %241 = vector.broadcast %240 : vector<8x1xf32> to vector<8x8xf32>
    %242 = arith.subf %238, %241 : vector<8x8xf32>
    %243 = math.exp %242 : vector<8x8xf32>
    %cst_106 = arith.constant dense<0.000000e+00> : vector<8xf32>
    %244 = vector.multi_reduction <add>, %243, %cst_106 [1] : vector<8x8xf32> to vector<8xf32>
    %245 = vector.shape_cast %244 : vector<8xf32> to vector<8x1xf32>
    %246 = tpu.reciprocal %245 {approx = true} : vector<8x1xf32> -> vector<8x1xf32>
    %247 = vector.broadcast %246 : vector<8x1xf32> to vector<8x8xf32>
    %248 = arith.mulf %243, %247 : vector<8x8xf32>
    %cst_107 = arith.constant dense<0.000000e+00> : vector<8x8xf32>
    %249 = tpu.matmul %248, %231, %cst_107 {dimension_numbers = #tpu.dot_dimension_numbers<[1], [0], [0], [1], [0, 0, 1, 1], [], []>} : vector<8x8xf32>, vector<8x8xf32>, vector<8x8xf32> -> vector<8x8xf32>
    %250 = vector.extract_strided_slice %194 {offsets = [0, 0], sizes = [8, 32], strides = [1, 1]} : vector<32x32xf32> to vector<8x32xf32>
    %cst_108 = arith.constant dense<0.000000e+00> : vector<8x32xf32>
    %251 = tpu.matmul %249, %250, %cst_108 {dimension_numbers = #tpu.dot_dimension_numbers<[1], [0], [0], [1], [0, 0, 1, 1], [], []>} : vector<8x8xf32>, vector<8x32xf32>, vector<8x32xf32> -> vector<8x32xf32>
    %252 = vector.broadcast %196 : vector<1x32xf32> to vector<8x32xf32>
    %253 = arith.addf %252, %251 : vector<8x32xf32>
    %254 = vector.extract_strided_slice %226 {offsets = [0, 8], sizes = [8, 8], strides = [1, 1]} : vector<8x32xf32> to vector<8x8xf32>
    %255 = vector.extract_strided_slice %227 {offsets = [0, 8], sizes = [8, 8], strides = [1, 1]} : vector<8x32xf32> to vector<8x8xf32>
    %256 = vector.extract_strided_slice %228 {offsets = [0, 8], sizes = [8, 8], strides = [1, 1]} : vector<8x32xf32> to vector<8x8xf32>
    %cst_109 = arith.constant dense<0.000000e+00> : vector<8x8xf32>
    %257 = tpu.matmul %254, %255, %cst_109 {dimension_numbers = #tpu.dot_dimension_numbers<[1], [1], [0], [0], [0, 0, 1, 0], [], []>} : vector<8x8xf32>, vector<8x8xf32>, vector<8x8xf32> -> vector<8x8xf32>
    %cst_110 = arith.constant 5.000000e-01 : f32
    %258 = vector.broadcast %cst_110 : f32 to vector<1x8xf32>
    %259 = arith.cmpf ogt, %5, %258 : vector<1x8xf32>
    %cst_111 = arith.constant -1.000000e+09 : f32
    %260 = vector.shape_cast %259 : vector<1x8xi1> to vector<1x8xi1>
    %261 = vector.broadcast %260 : vector<1x8xi1> to vector<8x8xi1>
    %262 = vector.broadcast %cst_111 : f32 to vector<8x8xf32>
    %263 = arith.select %261, %257, %262 : vector<8x8xi1>, vector<8x8xf32>
    %cst_112 = arith.constant dense<0xFF800000> : vector<8xf32>
    %264 = vector.multi_reduction <maximumf>, %263, %cst_112 [1] : vector<8x8xf32> to vector<8xf32>
    %265 = vector.shape_cast %264 : vector<8xf32> to vector<8x1xf32>
    %266 = vector.broadcast %265 : vector<8x1xf32> to vector<8x8xf32>
    %267 = arith.subf %263, %266 : vector<8x8xf32>
    %268 = math.exp %267 : vector<8x8xf32>
    %cst_113 = arith.constant dense<0.000000e+00> : vector<8xf32>
    %269 = vector.multi_reduction <add>, %268, %cst_113 [1] : vector<8x8xf32> to vector<8xf32>
    %270 = vector.shape_cast %269 : vector<8xf32> to vector<8x1xf32>
    %271 = tpu.reciprocal %270 {approx = true} : vector<8x1xf32> -> vector<8x1xf32>
    %272 = vector.broadcast %271 : vector<8x1xf32> to vector<8x8xf32>
    %273 = arith.mulf %268, %272 : vector<8x8xf32>
    %cst_114 = arith.constant dense<0.000000e+00> : vector<8x8xf32>
    %274 = tpu.matmul %273, %256, %cst_114 {dimension_numbers = #tpu.dot_dimension_numbers<[1], [0], [0], [1], [0, 0, 1, 1], [], []>} : vector<8x8xf32>, vector<8x8xf32>, vector<8x8xf32> -> vector<8x8xf32>
    %275 = vector.extract_strided_slice %194 {offsets = [8, 0], sizes = [8, 32], strides = [1, 1]} : vector<32x32xf32> to vector<8x32xf32>
    %cst_115 = arith.constant dense<0.000000e+00> : vector<8x32xf32>
    %276 = tpu.matmul %274, %275, %cst_115 {dimension_numbers = #tpu.dot_dimension_numbers<[1], [0], [0], [1], [0, 0, 1, 1], [], []>} : vector<8x8xf32>, vector<8x32xf32>, vector<8x32xf32> -> vector<8x32xf32>
    %277 = arith.addf %253, %276 : vector<8x32xf32>
    %278 = vector.extract_strided_slice %226 {offsets = [0, 16], sizes = [8, 8], strides = [1, 1]} : vector<8x32xf32> to vector<8x8xf32>
    %279 = vector.extract_strided_slice %227 {offsets = [0, 16], sizes = [8, 8], strides = [1, 1]} : vector<8x32xf32> to vector<8x8xf32>
    %280 = vector.extract_strided_slice %228 {offsets = [0, 16], sizes = [8, 8], strides = [1, 1]} : vector<8x32xf32> to vector<8x8xf32>
    %cst_116 = arith.constant dense<0.000000e+00> : vector<8x8xf32>
    %281 = tpu.matmul %278, %279, %cst_116 {dimension_numbers = #tpu.dot_dimension_numbers<[1], [1], [0], [0], [0, 0, 1, 0], [], []>} : vector<8x8xf32>, vector<8x8xf32>, vector<8x8xf32> -> vector<8x8xf32>
    %cst_117 = arith.constant 5.000000e-01 : f32
    %282 = vector.broadcast %cst_117 : f32 to vector<1x8xf32>
    %283 = arith.cmpf ogt, %5, %282 : vector<1x8xf32>
    %cst_118 = arith.constant -1.000000e+09 : f32
    %284 = vector.shape_cast %283 : vector<1x8xi1> to vector<1x8xi1>
    %285 = vector.broadcast %284 : vector<1x8xi1> to vector<8x8xi1>
    %286 = vector.broadcast %cst_118 : f32 to vector<8x8xf32>
    %287 = arith.select %285, %281, %286 : vector<8x8xi1>, vector<8x8xf32>
    %cst_119 = arith.constant dense<0xFF800000> : vector<8xf32>
    %288 = vector.multi_reduction <maximumf>, %287, %cst_119 [1] : vector<8x8xf32> to vector<8xf32>
    %289 = vector.shape_cast %288 : vector<8xf32> to vector<8x1xf32>
    %290 = vector.broadcast %289 : vector<8x1xf32> to vector<8x8xf32>
    %291 = arith.subf %287, %290 : vector<8x8xf32>
    %292 = math.exp %291 : vector<8x8xf32>
    %cst_120 = arith.constant dense<0.000000e+00> : vector<8xf32>
    %293 = vector.multi_reduction <add>, %292, %cst_120 [1] : vector<8x8xf32> to vector<8xf32>
    %294 = vector.shape_cast %293 : vector<8xf32> to vector<8x1xf32>
    %295 = tpu.reciprocal %294 {approx = true} : vector<8x1xf32> -> vector<8x1xf32>
    %296 = vector.broadcast %295 : vector<8x1xf32> to vector<8x8xf32>
    %297 = arith.mulf %292, %296 : vector<8x8xf32>
    %cst_121 = arith.constant dense<0.000000e+00> : vector<8x8xf32>
    %298 = tpu.matmul %297, %280, %cst_121 {dimension_numbers = #tpu.dot_dimension_numbers<[1], [0], [0], [1], [0, 0, 1, 1], [], []>} : vector<8x8xf32>, vector<8x8xf32>, vector<8x8xf32> -> vector<8x8xf32>
    %299 = vector.extract_strided_slice %194 {offsets = [16, 0], sizes = [8, 32], strides = [1, 1]} : vector<32x32xf32> to vector<8x32xf32>
    %cst_122 = arith.constant dense<0.000000e+00> : vector<8x32xf32>
    %300 = tpu.matmul %298, %299, %cst_122 {dimension_numbers = #tpu.dot_dimension_numbers<[1], [0], [0], [1], [0, 0, 1, 1], [], []>} : vector<8x8xf32>, vector<8x32xf32>, vector<8x32xf32> -> vector<8x32xf32>
    %301 = arith.addf %277, %300 : vector<8x32xf32>
    %302 = vector.extract_strided_slice %226 {offsets = [0, 24], sizes = [8, 8], strides = [1, 1]} : vector<8x32xf32> to vector<8x8xf32>
    %303 = vector.extract_strided_slice %227 {offsets = [0, 24], sizes = [8, 8], strides = [1, 1]} : vector<8x32xf32> to vector<8x8xf32>
    %304 = vector.extract_strided_slice %228 {offsets = [0, 24], sizes = [8, 8], strides = [1, 1]} : vector<8x32xf32> to vector<8x8xf32>
    %cst_123 = arith.constant dense<0.000000e+00> : vector<8x8xf32>
    %305 = tpu.matmul %302, %303, %cst_123 {dimension_numbers = #tpu.dot_dimension_numbers<[1], [1], [0], [0], [0, 0, 1, 0], [], []>} : vector<8x8xf32>, vector<8x8xf32>, vector<8x8xf32> -> vector<8x8xf32>
    %cst_124 = arith.constant 5.000000e-01 : f32
    %306 = vector.broadcast %cst_124 : f32 to vector<1x8xf32>
    %307 = arith.cmpf ogt, %5, %306 : vector<1x8xf32>
    %cst_125 = arith.constant -1.000000e+09 : f32
    %308 = vector.shape_cast %307 : vector<1x8xi1> to vector<1x8xi1>
    %309 = vector.broadcast %308 : vector<1x8xi1> to vector<8x8xi1>
    %310 = vector.broadcast %cst_125 : f32 to vector<8x8xf32>
    %311 = arith.select %309, %305, %310 : vector<8x8xi1>, vector<8x8xf32>
    %cst_126 = arith.constant dense<0xFF800000> : vector<8xf32>
    %312 = vector.multi_reduction <maximumf>, %311, %cst_126 [1] : vector<8x8xf32> to vector<8xf32>
    %313 = vector.shape_cast %312 : vector<8xf32> to vector<8x1xf32>
    %314 = vector.broadcast %313 : vector<8x1xf32> to vector<8x8xf32>
    %315 = arith.subf %311, %314 : vector<8x8xf32>
    %316 = math.exp %315 : vector<8x8xf32>
    %cst_127 = arith.constant dense<0.000000e+00> : vector<8xf32>
    %317 = vector.multi_reduction <add>, %316, %cst_127 [1] : vector<8x8xf32> to vector<8xf32>
    %318 = vector.shape_cast %317 : vector<8xf32> to vector<8x1xf32>
    %319 = tpu.reciprocal %318 {approx = true} : vector<8x1xf32> -> vector<8x1xf32>
    %320 = vector.broadcast %319 : vector<8x1xf32> to vector<8x8xf32>
    %321 = arith.mulf %316, %320 : vector<8x8xf32>
    %cst_128 = arith.constant dense<0.000000e+00> : vector<8x8xf32>
    %322 = tpu.matmul %321, %304, %cst_128 {dimension_numbers = #tpu.dot_dimension_numbers<[1], [0], [0], [1], [0, 0, 1, 1], [], []>} : vector<8x8xf32>, vector<8x8xf32>, vector<8x8xf32> -> vector<8x8xf32>
    %323 = vector.extract_strided_slice %194 {offsets = [24, 0], sizes = [8, 32], strides = [1, 1]} : vector<32x32xf32> to vector<8x32xf32>
    %cst_129 = arith.constant dense<0.000000e+00> : vector<8x32xf32>
    %324 = tpu.matmul %322, %323, %cst_129 {dimension_numbers = #tpu.dot_dimension_numbers<[1], [0], [0], [1], [0, 0, 1, 1], [], []>} : vector<8x8xf32>, vector<8x32xf32>, vector<8x32xf32> -> vector<8x32xf32>
    %325 = arith.addf %301, %324 : vector<8x32xf32>
    %326 = arith.addf %188, %325 : vector<8x32xf32>
    %c1_130 = arith.constant 1 : index
    %c0_131 = arith.constant 0 : index
    %c0_132 = arith.constant 0 : index
    %327 = vector.load %arg10[%c1_130, %c0_131, %c0_132] : memref<2x32x64xf32, #tpu.memory_space<vmem>>, vector<1x32x64xf32>
    %328 = vector.shape_cast %327 : vector<1x32x64xf32> to vector<32x64xf32>
    %c1_133 = arith.constant 1 : index
    %c0_134 = arith.constant 0 : index
    %c0_135 = arith.constant 0 : index
    %329 = vector.load %arg11[%c1_133, %c0_134, %c0_135] : memref<2x1x64xf32, #tpu.memory_space<vmem>>, vector<1x1x64xf32>
    %330 = vector.shape_cast %329 : vector<1x1x64xf32> to vector<1x64xf32>
    %c1_136 = arith.constant 1 : index
    %c0_137 = arith.constant 0 : index
    %c0_138 = arith.constant 0 : index
    %331 = vector.load %arg12[%c1_136, %c0_137, %c0_138] : memref<2x64x32xf32, #tpu.memory_space<vmem>>, vector<1x64x32xf32>
    %332 = vector.shape_cast %331 : vector<1x64x32xf32> to vector<64x32xf32>
    %c1_139 = arith.constant 1 : index
    %c0_140 = arith.constant 0 : index
    %c0_141 = arith.constant 0 : index
    %333 = vector.load %arg13[%c1_139, %c0_140, %c0_141] : memref<2x1x32xf32, #tpu.memory_space<vmem>>, vector<1x1x32xf32>
    %334 = vector.shape_cast %333 : vector<1x1x32xf32> to vector<1x32xf32>
    %c1_142 = arith.constant 1 : index
    %c0_143 = arith.constant 0 : index
    %c0_144 = arith.constant 0 : index
    %335 = vector.load %arg14[%c1_142, %c0_143, %c0_144] : memref<2x2x32xf32, #tpu.memory_space<vmem>>, vector<1x2x32xf32>
    %336 = vector.shape_cast %335 : vector<1x2x32xf32> to vector<2x32xf32>
    %337 = vector.extract_strided_slice %336 {offsets = [0, 0], sizes = [1, 32], strides = [1, 1]} : vector<2x32xf32> to vector<1x32xf32>
    %338 = vector.extract_strided_slice %336 {offsets = [1, 0], sizes = [1, 32], strides = [1, 1]} : vector<2x32xf32> to vector<1x32xf32>
    %cst_145 = arith.constant dense<0.000000e+00> : vector<8xf32>
    %339 = vector.multi_reduction <add>, %326, %cst_145 [1] : vector<8x32xf32> to vector<8xf32>
    %340 = vector.shape_cast %339 : vector<8xf32> to vector<8x1xf32>
    %cst_146 = arith.constant 3.200000e+01 : f32
    %341 = vector.broadcast %cst_146 : f32 to vector<8x1xf32>
    %342 = arith.divf %340, %341 : vector<8x1xf32>
    %343 = vector.broadcast %342 : vector<8x1xf32> to vector<8x32xf32>
    %344 = arith.subf %326, %343 : vector<8x32xf32>
    %345 = arith.mulf %344, %344 : vector<8x32xf32>
    %cst_147 = arith.constant dense<0.000000e+00> : vector<8xf32>
    %346 = vector.multi_reduction <add>, %345, %cst_147 [1] : vector<8x32xf32> to vector<8xf32>
    %347 = vector.shape_cast %346 : vector<8xf32> to vector<8x1xf32>
    %cst_148 = arith.constant 3.200000e+01 : f32
    %348 = vector.broadcast %cst_148 : f32 to vector<8x1xf32>
    %349 = arith.divf %347, %348 : vector<8x1xf32>
    %350 = vector.broadcast %342 : vector<8x1xf32> to vector<8x32xf32>
    %351 = arith.subf %326, %350 : vector<8x32xf32>
    %352 = vector.broadcast %337 : vector<1x32xf32> to vector<8x32xf32>
    %353 = arith.mulf %352, %351 : vector<8x32xf32>
    %cst_149 = arith.constant 9.99999997E-7 : f32
    %354 = vector.broadcast %cst_149 : f32 to vector<8x1xf32>
    %355 = arith.addf %349, %354 : vector<8x1xf32>
    %356 = math.rsqrt %355 : vector<8x1xf32>
    %357 = vector.broadcast %356 : vector<8x1xf32> to vector<8x32xf32>
    %358 = arith.mulf %353, %357 : vector<8x32xf32>
    %359 = vector.broadcast %338 : vector<1x32xf32> to vector<8x32xf32>
    %360 = arith.addf %358, %359 : vector<8x32xf32>
    %cst_150 = arith.constant dense<0.000000e+00> : vector<8x64xf32>
    %361 = tpu.matmul %360, %328, %cst_150 {dimension_numbers = #tpu.dot_dimension_numbers<[1], [0], [0], [1], [0, 0, 1, 1], [], []>} : vector<8x32xf32>, vector<32x64xf32>, vector<8x64xf32> -> vector<8x64xf32>
    %362 = vector.broadcast %330 : vector<1x64xf32> to vector<8x64xf32>
    %363 = arith.addf %361, %362 : vector<8x64xf32>
    %cst_151 = arith.constant 0.000000e+00 : f32
    %364 = vector.broadcast %cst_151 : f32 to vector<8x64xf32>
    %365 = arith.maximumf %363, %364 : vector<8x64xf32>
    %cst_152 = arith.constant dense<0.000000e+00> : vector<8x32xf32>
    %366 = tpu.matmul %365, %332, %cst_152 {dimension_numbers = #tpu.dot_dimension_numbers<[1], [0], [0], [1], [0, 0, 1, 1], [], []>} : vector<8x64xf32>, vector<64x32xf32>, vector<8x32xf32> -> vector<8x32xf32>
    %367 = arith.addf %326, %366 : vector<8x32xf32>
    %368 = vector.broadcast %334 : vector<1x32xf32> to vector<8x32xf32>
    %369 = arith.addf %367, %368 : vector<8x32xf32>
    %c0_153 = arith.constant 0 : index
    %c0_154 = arith.constant 0 : index
    %370 = vector.load %arg15[%c0_153, %c0_154] : memref<2x32xf32, #tpu.memory_space<vmem>>, vector<2x32xf32>
    %371 = vector.extract_strided_slice %370 {offsets = [0, 0], sizes = [1, 32], strides = [1, 1]} : vector<2x32xf32> to vector<1x32xf32>
    %372 = vector.extract_strided_slice %370 {offsets = [1, 0], sizes = [1, 32], strides = [1, 1]} : vector<2x32xf32> to vector<1x32xf32>
    %cst_155 = arith.constant dense<0.000000e+00> : vector<8xf32>
    %373 = vector.multi_reduction <add>, %369, %cst_155 [1] : vector<8x32xf32> to vector<8xf32>
    %374 = vector.shape_cast %373 : vector<8xf32> to vector<8x1xf32>
    %cst_156 = arith.constant 3.200000e+01 : f32
    %375 = vector.broadcast %cst_156 : f32 to vector<8x1xf32>
    %376 = arith.divf %374, %375 : vector<8x1xf32>
    %377 = vector.broadcast %376 : vector<8x1xf32> to vector<8x32xf32>
    %378 = arith.subf %369, %377 : vector<8x32xf32>
    %379 = arith.mulf %378, %378 : vector<8x32xf32>
    %cst_157 = arith.constant dense<0.000000e+00> : vector<8xf32>
    %380 = vector.multi_reduction <add>, %379, %cst_157 [1] : vector<8x32xf32> to vector<8xf32>
    %381 = vector.shape_cast %380 : vector<8xf32> to vector<8x1xf32>
    %cst_158 = arith.constant 3.200000e+01 : f32
    %382 = vector.broadcast %cst_158 : f32 to vector<8x1xf32>
    %383 = arith.divf %381, %382 : vector<8x1xf32>
    %384 = vector.broadcast %376 : vector<8x1xf32> to vector<8x32xf32>
    %385 = arith.subf %369, %384 : vector<8x32xf32>
    %386 = vector.broadcast %371 : vector<1x32xf32> to vector<8x32xf32>
    %387 = arith.mulf %386, %385 : vector<8x32xf32>
    %cst_159 = arith.constant 9.99999997E-7 : f32
    %388 = vector.broadcast %cst_159 : f32 to vector<8x1xf32>
    %389 = arith.addf %383, %388 : vector<8x1xf32>
    %390 = math.rsqrt %389 : vector<8x1xf32>
    %391 = vector.broadcast %390 : vector<8x1xf32> to vector<8x32xf32>
    %392 = arith.mulf %387, %391 : vector<8x32xf32>
    %393 = vector.broadcast %372 : vector<1x32xf32> to vector<8x32xf32>
    %394 = arith.addf %392, %393 : vector<8x32xf32>
    %c0_160 = arith.constant 0 : index
    %c0_161 = arith.constant 0 : index
    %c0_162 = arith.constant 0 : index
    %395 = vector.load %arg16[%c0_160, %c0_161, %c0_162] : memref<2x32x96xf32, #tpu.memory_space<vmem>>, vector<1x32x96xf32>
    %396 = vector.shape_cast %395 : vector<1x32x96xf32> to vector<32x96xf32>
    %c0_163 = arith.constant 0 : index
    %c0_164 = arith.constant 0 : index
    %c0_165 = arith.constant 0 : index
    %397 = vector.load %arg17[%c0_163, %c0_164, %c0_165] : memref<2x1x96xf32, #tpu.memory_space<vmem>>, vector<1x1x96xf32>
    %398 = vector.shape_cast %397 : vector<1x1x96xf32> to vector<1x96xf32>
    %c0_166 = arith.constant 0 : index
    %c0_167 = arith.constant 0 : index
    %c0_168 = arith.constant 0 : index
    %399 = vector.load %arg18[%c0_166, %c0_167, %c0_168] : memref<2x32x32xf32, #tpu.memory_space<vmem>>, vector<1x32x32xf32>
    %400 = vector.shape_cast %399 : vector<1x32x32xf32> to vector<32x32xf32>
    %c0_169 = arith.constant 0 : index
    %c0_170 = arith.constant 0 : index
    %c0_171 = arith.constant 0 : index
    %401 = vector.load %arg19[%c0_169, %c0_170, %c0_171] : memref<2x1x32xf32, #tpu.memory_space<vmem>>, vector<1x1x32xf32>
    %402 = vector.shape_cast %401 : vector<1x1x32xf32> to vector<1x32xf32>
    %c0_172 = arith.constant 0 : index
    %c0_173 = arith.constant 0 : index
    %c0_174 = arith.constant 0 : index
    %403 = vector.load %arg20[%c0_172, %c0_173, %c0_174] : memref<2x2x32xf32, #tpu.memory_space<vmem>>, vector<1x2x32xf32>
    %404 = vector.shape_cast %403 : vector<1x2x32xf32> to vector<2x32xf32>
    %405 = vector.extract_strided_slice %404 {offsets = [0, 0], sizes = [1, 32], strides = [1, 1]} : vector<2x32xf32> to vector<1x32xf32>
    %406 = vector.extract_strided_slice %404 {offsets = [1, 0], sizes = [1, 32], strides = [1, 1]} : vector<2x32xf32> to vector<1x32xf32>
    %cst_175 = arith.constant dense<0.000000e+00> : vector<8xf32>
    %407 = vector.multi_reduction <add>, %3, %cst_175 [1] : vector<8x32xf32> to vector<8xf32>
    %408 = vector.shape_cast %407 : vector<8xf32> to vector<8x1xf32>
    %cst_176 = arith.constant 3.200000e+01 : f32
    %409 = vector.broadcast %cst_176 : f32 to vector<8x1xf32>
    %410 = arith.divf %408, %409 : vector<8x1xf32>
    %411 = vector.broadcast %410 : vector<8x1xf32> to vector<8x32xf32>
    %412 = arith.subf %3, %411 : vector<8x32xf32>
    %413 = arith.mulf %412, %412 : vector<8x32xf32>
    %cst_177 = arith.constant dense<0.000000e+00> : vector<8xf32>
    %414 = vector.multi_reduction <add>, %413, %cst_177 [1] : vector<8x32xf32> to vector<8xf32>
    %415 = vector.shape_cast %414 : vector<8xf32> to vector<8x1xf32>
    %cst_178 = arith.constant 3.200000e+01 : f32
    %416 = vector.broadcast %cst_178 : f32 to vector<8x1xf32>
    %417 = arith.divf %415, %416 : vector<8x1xf32>
    %418 = vector.broadcast %410 : vector<8x1xf32> to vector<8x32xf32>
    %419 = arith.subf %3, %418 : vector<8x32xf32>
    %420 = vector.broadcast %405 : vector<1x32xf32> to vector<8x32xf32>
    %421 = arith.mulf %420, %419 : vector<8x32xf32>
    %cst_179 = arith.constant 9.99999997E-7 : f32
    %422 = vector.broadcast %cst_179 : f32 to vector<8x1xf32>
    %423 = arith.addf %417, %422 : vector<8x1xf32>
    %424 = math.rsqrt %423 : vector<8x1xf32>
    %425 = vector.broadcast %424 : vector<8x1xf32> to vector<8x32xf32>
    %426 = arith.mulf %421, %425 : vector<8x32xf32>
    %427 = vector.broadcast %406 : vector<1x32xf32> to vector<8x32xf32>
    %428 = arith.addf %426, %427 : vector<8x32xf32>
    %cst_180 = arith.constant dense<0.000000e+00> : vector<8x96xf32>
    %429 = tpu.matmul %428, %396, %cst_180 {dimension_numbers = #tpu.dot_dimension_numbers<[1], [0], [0], [1], [0, 0, 1, 1], [], []>} : vector<8x32xf32>, vector<32x96xf32>, vector<8x96xf32> -> vector<8x96xf32>
    %430 = vector.broadcast %398 : vector<1x96xf32> to vector<8x96xf32>
    %431 = arith.addf %429, %430 : vector<8x96xf32>
    %432 = vector.extract_strided_slice %431 {offsets = [0, 0], sizes = [8, 32], strides = [1, 1]} : vector<8x96xf32> to vector<8x32xf32>
    %433 = vector.extract_strided_slice %431 {offsets = [0, 32], sizes = [8, 32], strides = [1, 1]} : vector<8x96xf32> to vector<8x32xf32>
    %434 = vector.extract_strided_slice %431 {offsets = [0, 64], sizes = [8, 32], strides = [1, 1]} : vector<8x96xf32> to vector<8x32xf32>
    %435 = vector.extract_strided_slice %432 {offsets = [0, 0], sizes = [8, 8], strides = [1, 1]} : vector<8x32xf32> to vector<8x8xf32>
    %436 = vector.extract_strided_slice %433 {offsets = [0, 0], sizes = [8, 8], strides = [1, 1]} : vector<8x32xf32> to vector<8x8xf32>
    %437 = vector.extract_strided_slice %434 {offsets = [0, 0], sizes = [8, 8], strides = [1, 1]} : vector<8x32xf32> to vector<8x8xf32>
    %cst_181 = arith.constant dense<0.000000e+00> : vector<8x8xf32>
    %438 = tpu.matmul %435, %436, %cst_181 {dimension_numbers = #tpu.dot_dimension_numbers<[1], [1], [0], [0], [0, 0, 1, 0], [], []>} : vector<8x8xf32>, vector<8x8xf32>, vector<8x8xf32> -> vector<8x8xf32>
    %cst_182 = arith.constant 5.000000e-01 : f32
    %439 = vector.broadcast %cst_182 : f32 to vector<8x8xf32>
    %440 = arith.cmpf ogt, %7, %439 : vector<8x8xf32>
    %cst_183 = arith.constant -1.000000e+09 : f32
    %441 = vector.broadcast %cst_183 : f32 to vector<8x8xf32>
    %442 = arith.select %440, %438, %441 : vector<8x8xi1>, vector<8x8xf32>
    %cst_184 = arith.constant dense<0xFF800000> : vector<8xf32>
    %443 = vector.multi_reduction <maximumf>, %442, %cst_184 [1] : vector<8x8xf32> to vector<8xf32>
    %444 = vector.shape_cast %443 : vector<8xf32> to vector<8x1xf32>
    %445 = vector.broadcast %444 : vector<8x1xf32> to vector<8x8xf32>
    %446 = arith.subf %442, %445 : vector<8x8xf32>
    %447 = math.exp %446 : vector<8x8xf32>
    %cst_185 = arith.constant dense<0.000000e+00> : vector<8xf32>
    %448 = vector.multi_reduction <add>, %447, %cst_185 [1] : vector<8x8xf32> to vector<8xf32>
    %449 = vector.shape_cast %448 : vector<8xf32> to vector<8x1xf32>
    %450 = tpu.reciprocal %449 {approx = true} : vector<8x1xf32> -> vector<8x1xf32>
    %451 = vector.broadcast %450 : vector<8x1xf32> to vector<8x8xf32>
    %452 = arith.mulf %447, %451 : vector<8x8xf32>
    %cst_186 = arith.constant dense<0.000000e+00> : vector<8x8xf32>
    %453 = tpu.matmul %452, %437, %cst_186 {dimension_numbers = #tpu.dot_dimension_numbers<[1], [0], [0], [1], [0, 0, 1, 1], [], []>} : vector<8x8xf32>, vector<8x8xf32>, vector<8x8xf32> -> vector<8x8xf32>
    %454 = vector.extract_strided_slice %400 {offsets = [0, 0], sizes = [8, 32], strides = [1, 1]} : vector<32x32xf32> to vector<8x32xf32>
    %cst_187 = arith.constant dense<0.000000e+00> : vector<8x32xf32>
    %455 = tpu.matmul %453, %454, %cst_187 {dimension_numbers = #tpu.dot_dimension_numbers<[1], [0], [0], [1], [0, 0, 1, 1], [], []>} : vector<8x8xf32>, vector<8x32xf32>, vector<8x32xf32> -> vector<8x32xf32>
    %456 = vector.broadcast %402 : vector<1x32xf32> to vector<8x32xf32>
    %457 = arith.addf %456, %455 : vector<8x32xf32>
    %458 = vector.extract_strided_slice %432 {offsets = [0, 8], sizes = [8, 8], strides = [1, 1]} : vector<8x32xf32> to vector<8x8xf32>
    %459 = vector.extract_strided_slice %433 {offsets = [0, 8], sizes = [8, 8], strides = [1, 1]} : vector<8x32xf32> to vector<8x8xf32>
    %460 = vector.extract_strided_slice %434 {offsets = [0, 8], sizes = [8, 8], strides = [1, 1]} : vector<8x32xf32> to vector<8x8xf32>
    %cst_188 = arith.constant dense<0.000000e+00> : vector<8x8xf32>
    %461 = tpu.matmul %458, %459, %cst_188 {dimension_numbers = #tpu.dot_dimension_numbers<[1], [1], [0], [0], [0, 0, 1, 0], [], []>} : vector<8x8xf32>, vector<8x8xf32>, vector<8x8xf32> -> vector<8x8xf32>
    %cst_189 = arith.constant 5.000000e-01 : f32
    %462 = vector.broadcast %cst_189 : f32 to vector<8x8xf32>
    %463 = arith.cmpf ogt, %7, %462 : vector<8x8xf32>
    %cst_190 = arith.constant -1.000000e+09 : f32
    %464 = vector.broadcast %cst_190 : f32 to vector<8x8xf32>
    %465 = arith.select %463, %461, %464 : vector<8x8xi1>, vector<8x8xf32>
    %cst_191 = arith.constant dense<0xFF800000> : vector<8xf32>
    %466 = vector.multi_reduction <maximumf>, %465, %cst_191 [1] : vector<8x8xf32> to vector<8xf32>
    %467 = vector.shape_cast %466 : vector<8xf32> to vector<8x1xf32>
    %468 = vector.broadcast %467 : vector<8x1xf32> to vector<8x8xf32>
    %469 = arith.subf %465, %468 : vector<8x8xf32>
    %470 = math.exp %469 : vector<8x8xf32>
    %cst_192 = arith.constant dense<0.000000e+00> : vector<8xf32>
    %471 = vector.multi_reduction <add>, %470, %cst_192 [1] : vector<8x8xf32> to vector<8xf32>
    %472 = vector.shape_cast %471 : vector<8xf32> to vector<8x1xf32>
    %473 = tpu.reciprocal %472 {approx = true} : vector<8x1xf32> -> vector<8x1xf32>
    %474 = vector.broadcast %473 : vector<8x1xf32> to vector<8x8xf32>
    %475 = arith.mulf %470, %474 : vector<8x8xf32>
    %cst_193 = arith.constant dense<0.000000e+00> : vector<8x8xf32>
    %476 = tpu.matmul %475, %460, %cst_193 {dimension_numbers = #tpu.dot_dimension_numbers<[1], [0], [0], [1], [0, 0, 1, 1], [], []>} : vector<8x8xf32>, vector<8x8xf32>, vector<8x8xf32> -> vector<8x8xf32>
    %477 = vector.extract_strided_slice %400 {offsets = [8, 0], sizes = [8, 32], strides = [1, 1]} : vector<32x32xf32> to vector<8x32xf32>
    %cst_194 = arith.constant dense<0.000000e+00> : vector<8x32xf32>
    %478 = tpu.matmul %476, %477, %cst_194 {dimension_numbers = #tpu.dot_dimension_numbers<[1], [0], [0], [1], [0, 0, 1, 1], [], []>} : vector<8x8xf32>, vector<8x32xf32>, vector<8x32xf32> -> vector<8x32xf32>
    %479 = arith.addf %457, %478 : vector<8x32xf32>
    %480 = vector.extract_strided_slice %432 {offsets = [0, 16], sizes = [8, 8], strides = [1, 1]} : vector<8x32xf32> to vector<8x8xf32>
    %481 = vector.extract_strided_slice %433 {offsets = [0, 16], sizes = [8, 8], strides = [1, 1]} : vector<8x32xf32> to vector<8x8xf32>
    %482 = vector.extract_strided_slice %434 {offsets = [0, 16], sizes = [8, 8], strides = [1, 1]} : vector<8x32xf32> to vector<8x8xf32>
    %cst_195 = arith.constant dense<0.000000e+00> : vector<8x8xf32>
    %483 = tpu.matmul %480, %481, %cst_195 {dimension_numbers = #tpu.dot_dimension_numbers<[1], [1], [0], [0], [0, 0, 1, 0], [], []>} : vector<8x8xf32>, vector<8x8xf32>, vector<8x8xf32> -> vector<8x8xf32>
    %cst_196 = arith.constant 5.000000e-01 : f32
    %484 = vector.broadcast %cst_196 : f32 to vector<8x8xf32>
    %485 = arith.cmpf ogt, %7, %484 : vector<8x8xf32>
    %cst_197 = arith.constant -1.000000e+09 : f32
    %486 = vector.broadcast %cst_197 : f32 to vector<8x8xf32>
    %487 = arith.select %485, %483, %486 : vector<8x8xi1>, vector<8x8xf32>
    %cst_198 = arith.constant dense<0xFF800000> : vector<8xf32>
    %488 = vector.multi_reduction <maximumf>, %487, %cst_198 [1] : vector<8x8xf32> to vector<8xf32>
    %489 = vector.shape_cast %488 : vector<8xf32> to vector<8x1xf32>
    %490 = vector.broadcast %489 : vector<8x1xf32> to vector<8x8xf32>
    %491 = arith.subf %487, %490 : vector<8x8xf32>
    %492 = math.exp %491 : vector<8x8xf32>
    %cst_199 = arith.constant dense<0.000000e+00> : vector<8xf32>
    %493 = vector.multi_reduction <add>, %492, %cst_199 [1] : vector<8x8xf32> to vector<8xf32>
    %494 = vector.shape_cast %493 : vector<8xf32> to vector<8x1xf32>
    %495 = tpu.reciprocal %494 {approx = true} : vector<8x1xf32> -> vector<8x1xf32>
    %496 = vector.broadcast %495 : vector<8x1xf32> to vector<8x8xf32>
    %497 = arith.mulf %492, %496 : vector<8x8xf32>
    %cst_200 = arith.constant dense<0.000000e+00> : vector<8x8xf32>
    %498 = tpu.matmul %497, %482, %cst_200 {dimension_numbers = #tpu.dot_dimension_numbers<[1], [0], [0], [1], [0, 0, 1, 1], [], []>} : vector<8x8xf32>, vector<8x8xf32>, vector<8x8xf32> -> vector<8x8xf32>
    %499 = vector.extract_strided_slice %400 {offsets = [16, 0], sizes = [8, 32], strides = [1, 1]} : vector<32x32xf32> to vector<8x32xf32>
    %cst_201 = arith.constant dense<0.000000e+00> : vector<8x32xf32>
    %500 = tpu.matmul %498, %499, %cst_201 {dimension_numbers = #tpu.dot_dimension_numbers<[1], [0], [0], [1], [0, 0, 1, 1], [], []>} : vector<8x8xf32>, vector<8x32xf32>, vector<8x32xf32> -> vector<8x32xf32>
    %501 = arith.addf %479, %500 : vector<8x32xf32>
    %502 = vector.extract_strided_slice %432 {offsets = [0, 24], sizes = [8, 8], strides = [1, 1]} : vector<8x32xf32> to vector<8x8xf32>
    %503 = vector.extract_strided_slice %433 {offsets = [0, 24], sizes = [8, 8], strides = [1, 1]} : vector<8x32xf32> to vector<8x8xf32>
    %504 = vector.extract_strided_slice %434 {offsets = [0, 24], sizes = [8, 8], strides = [1, 1]} : vector<8x32xf32> to vector<8x8xf32>
    %cst_202 = arith.constant dense<0.000000e+00> : vector<8x8xf32>
    %505 = tpu.matmul %502, %503, %cst_202 {dimension_numbers = #tpu.dot_dimension_numbers<[1], [1], [0], [0], [0, 0, 1, 0], [], []>} : vector<8x8xf32>, vector<8x8xf32>, vector<8x8xf32> -> vector<8x8xf32>
    %cst_203 = arith.constant 5.000000e-01 : f32
    %506 = vector.broadcast %cst_203 : f32 to vector<8x8xf32>
    %507 = arith.cmpf ogt, %7, %506 : vector<8x8xf32>
    %cst_204 = arith.constant -1.000000e+09 : f32
    %508 = vector.broadcast %cst_204 : f32 to vector<8x8xf32>
    %509 = arith.select %507, %505, %508 : vector<8x8xi1>, vector<8x8xf32>
    %cst_205 = arith.constant dense<0xFF800000> : vector<8xf32>
    %510 = vector.multi_reduction <maximumf>, %509, %cst_205 [1] : vector<8x8xf32> to vector<8xf32>
    %511 = vector.shape_cast %510 : vector<8xf32> to vector<8x1xf32>
    %512 = vector.broadcast %511 : vector<8x1xf32> to vector<8x8xf32>
    %513 = arith.subf %509, %512 : vector<8x8xf32>
    %514 = math.exp %513 : vector<8x8xf32>
    %cst_206 = arith.constant dense<0.000000e+00> : vector<8xf32>
    %515 = vector.multi_reduction <add>, %514, %cst_206 [1] : vector<8x8xf32> to vector<8xf32>
    %516 = vector.shape_cast %515 : vector<8xf32> to vector<8x1xf32>
    %517 = tpu.reciprocal %516 {approx = true} : vector<8x1xf32> -> vector<8x1xf32>
    %518 = vector.broadcast %517 : vector<8x1xf32> to vector<8x8xf32>
    %519 = arith.mulf %514, %518 : vector<8x8xf32>
    %cst_207 = arith.constant dense<0.000000e+00> : vector<8x8xf32>
    %520 = tpu.matmul %519, %504, %cst_207 {dimension_numbers = #tpu.dot_dimension_numbers<[1], [0], [0], [1], [0, 0, 1, 1], [], []>} : vector<8x8xf32>, vector<8x8xf32>, vector<8x8xf32> -> vector<8x8xf32>
    %521 = vector.extract_strided_slice %400 {offsets = [24, 0], sizes = [8, 32], strides = [1, 1]} : vector<32x32xf32> to vector<8x32xf32>
    %cst_208 = arith.constant dense<0.000000e+00> : vector<8x32xf32>
    %522 = tpu.matmul %520, %521, %cst_208 {dimension_numbers = #tpu.dot_dimension_numbers<[1], [0], [0], [1], [0, 0, 1, 1], [], []>} : vector<8x8xf32>, vector<8x32xf32>, vector<8x32xf32> -> vector<8x32xf32>
    %523 = arith.addf %501, %522 : vector<8x32xf32>
    %524 = arith.addf %3, %523 : vector<8x32xf32>
    %c0_209 = arith.constant 0 : index
    %c0_210 = arith.constant 0 : index
    %c0_211 = arith.constant 0 : index
    %525 = vector.load %arg21[%c0_209, %c0_210, %c0_211] : memref<2x32x32xf32, #tpu.memory_space<vmem>>, vector<1x32x32xf32>
    %526 = vector.shape_cast %525 : vector<1x32x32xf32> to vector<32x32xf32>
    %c0_212 = arith.constant 0 : index
    %c0_213 = arith.constant 0 : index
    %c0_214 = arith.constant 0 : index
    %527 = vector.load %arg22[%c0_212, %c0_213, %c0_214] : memref<2x1x32xf32, #tpu.memory_space<vmem>>, vector<1x1x32xf32>
    %528 = vector.shape_cast %527 : vector<1x1x32xf32> to vector<1x32xf32>
    %c0_215 = arith.constant 0 : index
    %c0_216 = arith.constant 0 : index
    %c0_217 = arith.constant 0 : index
    %529 = vector.load %arg23[%c0_215, %c0_216, %c0_217] : memref<2x32x64xf32, #tpu.memory_space<vmem>>, vector<1x32x64xf32>
    %530 = vector.shape_cast %529 : vector<1x32x64xf32> to vector<32x64xf32>
    %c0_218 = arith.constant 0 : index
    %c0_219 = arith.constant 0 : index
    %c0_220 = arith.constant 0 : index
    %531 = vector.load %arg24[%c0_218, %c0_219, %c0_220] : memref<2x1x64xf32, #tpu.memory_space<vmem>>, vector<1x1x64xf32>
    %532 = vector.shape_cast %531 : vector<1x1x64xf32> to vector<1x64xf32>
    %c0_221 = arith.constant 0 : index
    %c0_222 = arith.constant 0 : index
    %c0_223 = arith.constant 0 : index
    %533 = vector.load %arg25[%c0_221, %c0_222, %c0_223] : memref<2x32x32xf32, #tpu.memory_space<vmem>>, vector<1x32x32xf32>
    %534 = vector.shape_cast %533 : vector<1x32x32xf32> to vector<32x32xf32>
    %c0_224 = arith.constant 0 : index
    %c0_225 = arith.constant 0 : index
    %c0_226 = arith.constant 0 : index
    %535 = vector.load %arg26[%c0_224, %c0_225, %c0_226] : memref<2x1x32xf32, #tpu.memory_space<vmem>>, vector<1x1x32xf32>
    %536 = vector.shape_cast %535 : vector<1x1x32xf32> to vector<1x32xf32>
    %c0_227 = arith.constant 0 : index
    %c0_228 = arith.constant 0 : index
    %c0_229 = arith.constant 0 : index
    %537 = vector.load %arg27[%c0_227, %c0_228, %c0_229] : memref<2x2x32xf32, #tpu.memory_space<vmem>>, vector<1x2x32xf32>
    %538 = vector.shape_cast %537 : vector<1x2x32xf32> to vector<2x32xf32>
    %539 = vector.extract_strided_slice %538 {offsets = [0, 0], sizes = [1, 32], strides = [1, 1]} : vector<2x32xf32> to vector<1x32xf32>
    %540 = vector.extract_strided_slice %538 {offsets = [1, 0], sizes = [1, 32], strides = [1, 1]} : vector<2x32xf32> to vector<1x32xf32>
    %cst_230 = arith.constant dense<0.000000e+00> : vector<8xf32>
    %541 = vector.multi_reduction <add>, %524, %cst_230 [1] : vector<8x32xf32> to vector<8xf32>
    %542 = vector.shape_cast %541 : vector<8xf32> to vector<8x1xf32>
    %cst_231 = arith.constant 3.200000e+01 : f32
    %543 = vector.broadcast %cst_231 : f32 to vector<8x1xf32>
    %544 = arith.divf %542, %543 : vector<8x1xf32>
    %545 = vector.broadcast %544 : vector<8x1xf32> to vector<8x32xf32>
    %546 = arith.subf %524, %545 : vector<8x32xf32>
    %547 = arith.mulf %546, %546 : vector<8x32xf32>
    %cst_232 = arith.constant dense<0.000000e+00> : vector<8xf32>
    %548 = vector.multi_reduction <add>, %547, %cst_232 [1] : vector<8x32xf32> to vector<8xf32>
    %549 = vector.shape_cast %548 : vector<8xf32> to vector<8x1xf32>
    %cst_233 = arith.constant 3.200000e+01 : f32
    %550 = vector.broadcast %cst_233 : f32 to vector<8x1xf32>
    %551 = arith.divf %549, %550 : vector<8x1xf32>
    %552 = vector.broadcast %544 : vector<8x1xf32> to vector<8x32xf32>
    %553 = arith.subf %524, %552 : vector<8x32xf32>
    %554 = vector.broadcast %539 : vector<1x32xf32> to vector<8x32xf32>
    %555 = arith.mulf %554, %553 : vector<8x32xf32>
    %cst_234 = arith.constant 9.99999997E-7 : f32
    %556 = vector.broadcast %cst_234 : f32 to vector<8x1xf32>
    %557 = arith.addf %551, %556 : vector<8x1xf32>
    %558 = math.rsqrt %557 : vector<8x1xf32>
    %559 = vector.broadcast %558 : vector<8x1xf32> to vector<8x32xf32>
    %560 = arith.mulf %555, %559 : vector<8x32xf32>
    %561 = vector.broadcast %540 : vector<1x32xf32> to vector<8x32xf32>
    %562 = arith.addf %560, %561 : vector<8x32xf32>
    %cst_235 = arith.constant dense<0.000000e+00> : vector<8x32xf32>
    %563 = tpu.matmul %562, %526, %cst_235 {dimension_numbers = #tpu.dot_dimension_numbers<[1], [0], [0], [1], [0, 0, 1, 1], [], []>} : vector<8x32xf32>, vector<32x32xf32>, vector<8x32xf32> -> vector<8x32xf32>
    %564 = vector.broadcast %528 : vector<1x32xf32> to vector<8x32xf32>
    %565 = arith.addf %563, %564 : vector<8x32xf32>
    %cst_236 = arith.constant dense<0.000000e+00> : vector<8x64xf32>
    %566 = tpu.matmul %394, %530, %cst_236 {dimension_numbers = #tpu.dot_dimension_numbers<[1], [0], [0], [1], [0, 0, 1, 1], [], []>} : vector<8x32xf32>, vector<32x64xf32>, vector<8x64xf32> -> vector<8x64xf32>
    %567 = vector.broadcast %532 : vector<1x64xf32> to vector<8x64xf32>
    %568 = arith.addf %566, %567 : vector<8x64xf32>
    %569 = vector.extract_strided_slice %568 {offsets = [0, 0], sizes = [8, 32], strides = [1, 1]} : vector<8x64xf32> to vector<8x32xf32>
    %570 = vector.extract_strided_slice %568 {offsets = [0, 32], sizes = [8, 32], strides = [1, 1]} : vector<8x64xf32> to vector<8x32xf32>
    %571 = vector.extract_strided_slice %565 {offsets = [0, 0], sizes = [8, 8], strides = [1, 1]} : vector<8x32xf32> to vector<8x8xf32>
    %572 = vector.extract_strided_slice %569 {offsets = [0, 0], sizes = [8, 8], strides = [1, 1]} : vector<8x32xf32> to vector<8x8xf32>
    %573 = vector.extract_strided_slice %570 {offsets = [0, 0], sizes = [8, 8], strides = [1, 1]} : vector<8x32xf32> to vector<8x8xf32>
    %cst_237 = arith.constant dense<0.000000e+00> : vector<8x8xf32>
    %574 = tpu.matmul %571, %572, %cst_237 {dimension_numbers = #tpu.dot_dimension_numbers<[1], [1], [0], [0], [0, 0, 1, 0], [], []>} : vector<8x8xf32>, vector<8x8xf32>, vector<8x8xf32> -> vector<8x8xf32>
    %cst_238 = arith.constant 5.000000e-01 : f32
    %575 = vector.broadcast %cst_238 : f32 to vector<1x8xf32>
    %576 = arith.cmpf ogt, %5, %575 : vector<1x8xf32>
    %cst_239 = arith.constant -1.000000e+09 : f32
    %577 = vector.shape_cast %576 : vector<1x8xi1> to vector<1x8xi1>
    %578 = vector.broadcast %577 : vector<1x8xi1> to vector<8x8xi1>
    %579 = vector.broadcast %cst_239 : f32 to vector<8x8xf32>
    %580 = arith.select %578, %574, %579 : vector<8x8xi1>, vector<8x8xf32>
    %cst_240 = arith.constant dense<0xFF800000> : vector<8xf32>
    %581 = vector.multi_reduction <maximumf>, %580, %cst_240 [1] : vector<8x8xf32> to vector<8xf32>
    %582 = vector.shape_cast %581 : vector<8xf32> to vector<8x1xf32>
    %583 = vector.broadcast %582 : vector<8x1xf32> to vector<8x8xf32>
    %584 = arith.subf %580, %583 : vector<8x8xf32>
    %585 = math.exp %584 : vector<8x8xf32>
    %cst_241 = arith.constant dense<0.000000e+00> : vector<8xf32>
    %586 = vector.multi_reduction <add>, %585, %cst_241 [1] : vector<8x8xf32> to vector<8xf32>
    %587 = vector.shape_cast %586 : vector<8xf32> to vector<8x1xf32>
    %588 = tpu.reciprocal %587 {approx = true} : vector<8x1xf32> -> vector<8x1xf32>
    %589 = vector.broadcast %588 : vector<8x1xf32> to vector<8x8xf32>
    %590 = arith.mulf %585, %589 : vector<8x8xf32>
    %cst_242 = arith.constant dense<0.000000e+00> : vector<8x8xf32>
    %591 = tpu.matmul %590, %573, %cst_242 {dimension_numbers = #tpu.dot_dimension_numbers<[1], [0], [0], [1], [0, 0, 1, 1], [], []>} : vector<8x8xf32>, vector<8x8xf32>, vector<8x8xf32> -> vector<8x8xf32>
    %592 = vector.extract_strided_slice %534 {offsets = [0, 0], sizes = [8, 32], strides = [1, 1]} : vector<32x32xf32> to vector<8x32xf32>
    %cst_243 = arith.constant dense<0.000000e+00> : vector<8x32xf32>
    %593 = tpu.matmul %591, %592, %cst_243 {dimension_numbers = #tpu.dot_dimension_numbers<[1], [0], [0], [1], [0, 0, 1, 1], [], []>} : vector<8x8xf32>, vector<8x32xf32>, vector<8x32xf32> -> vector<8x32xf32>
    %594 = vector.broadcast %536 : vector<1x32xf32> to vector<8x32xf32>
    %595 = arith.addf %594, %593 : vector<8x32xf32>
    %596 = vector.extract_strided_slice %565 {offsets = [0, 8], sizes = [8, 8], strides = [1, 1]} : vector<8x32xf32> to vector<8x8xf32>
    %597 = vector.extract_strided_slice %569 {offsets = [0, 8], sizes = [8, 8], strides = [1, 1]} : vector<8x32xf32> to vector<8x8xf32>
    %598 = vector.extract_strided_slice %570 {offsets = [0, 8], sizes = [8, 8], strides = [1, 1]} : vector<8x32xf32> to vector<8x8xf32>
    %cst_244 = arith.constant dense<0.000000e+00> : vector<8x8xf32>
    %599 = tpu.matmul %596, %597, %cst_244 {dimension_numbers = #tpu.dot_dimension_numbers<[1], [1], [0], [0], [0, 0, 1, 0], [], []>} : vector<8x8xf32>, vector<8x8xf32>, vector<8x8xf32> -> vector<8x8xf32>
    %cst_245 = arith.constant 5.000000e-01 : f32
    %600 = vector.broadcast %cst_245 : f32 to vector<1x8xf32>
    %601 = arith.cmpf ogt, %5, %600 : vector<1x8xf32>
    %cst_246 = arith.constant -1.000000e+09 : f32
    %602 = vector.shape_cast %601 : vector<1x8xi1> to vector<1x8xi1>
    %603 = vector.broadcast %602 : vector<1x8xi1> to vector<8x8xi1>
    %604 = vector.broadcast %cst_246 : f32 to vector<8x8xf32>
    %605 = arith.select %603, %599, %604 : vector<8x8xi1>, vector<8x8xf32>
    %cst_247 = arith.constant dense<0xFF800000> : vector<8xf32>
    %606 = vector.multi_reduction <maximumf>, %605, %cst_247 [1] : vector<8x8xf32> to vector<8xf32>
    %607 = vector.shape_cast %606 : vector<8xf32> to vector<8x1xf32>
    %608 = vector.broadcast %607 : vector<8x1xf32> to vector<8x8xf32>
    %609 = arith.subf %605, %608 : vector<8x8xf32>
    %610 = math.exp %609 : vector<8x8xf32>
    %cst_248 = arith.constant dense<0.000000e+00> : vector<8xf32>
    %611 = vector.multi_reduction <add>, %610, %cst_248 [1] : vector<8x8xf32> to vector<8xf32>
    %612 = vector.shape_cast %611 : vector<8xf32> to vector<8x1xf32>
    %613 = tpu.reciprocal %612 {approx = true} : vector<8x1xf32> -> vector<8x1xf32>
    %614 = vector.broadcast %613 : vector<8x1xf32> to vector<8x8xf32>
    %615 = arith.mulf %610, %614 : vector<8x8xf32>
    %cst_249 = arith.constant dense<0.000000e+00> : vector<8x8xf32>
    %616 = tpu.matmul %615, %598, %cst_249 {dimension_numbers = #tpu.dot_dimension_numbers<[1], [0], [0], [1], [0, 0, 1, 1], [], []>} : vector<8x8xf32>, vector<8x8xf32>, vector<8x8xf32> -> vector<8x8xf32>
    %617 = vector.extract_strided_slice %534 {offsets = [8, 0], sizes = [8, 32], strides = [1, 1]} : vector<32x32xf32> to vector<8x32xf32>
    %cst_250 = arith.constant dense<0.000000e+00> : vector<8x32xf32>
    %618 = tpu.matmul %616, %617, %cst_250 {dimension_numbers = #tpu.dot_dimension_numbers<[1], [0], [0], [1], [0, 0, 1, 1], [], []>} : vector<8x8xf32>, vector<8x32xf32>, vector<8x32xf32> -> vector<8x32xf32>
    %619 = arith.addf %595, %618 : vector<8x32xf32>
    %620 = vector.extract_strided_slice %565 {offsets = [0, 16], sizes = [8, 8], strides = [1, 1]} : vector<8x32xf32> to vector<8x8xf32>
    %621 = vector.extract_strided_slice %569 {offsets = [0, 16], sizes = [8, 8], strides = [1, 1]} : vector<8x32xf32> to vector<8x8xf32>
    %622 = vector.extract_strided_slice %570 {offsets = [0, 16], sizes = [8, 8], strides = [1, 1]} : vector<8x32xf32> to vector<8x8xf32>
    %cst_251 = arith.constant dense<0.000000e+00> : vector<8x8xf32>
    %623 = tpu.matmul %620, %621, %cst_251 {dimension_numbers = #tpu.dot_dimension_numbers<[1], [1], [0], [0], [0, 0, 1, 0], [], []>} : vector<8x8xf32>, vector<8x8xf32>, vector<8x8xf32> -> vector<8x8xf32>
    %cst_252 = arith.constant 5.000000e-01 : f32
    %624 = vector.broadcast %cst_252 : f32 to vector<1x8xf32>
    %625 = arith.cmpf ogt, %5, %624 : vector<1x8xf32>
    %cst_253 = arith.constant -1.000000e+09 : f32
    %626 = vector.shape_cast %625 : vector<1x8xi1> to vector<1x8xi1>
    %627 = vector.broadcast %626 : vector<1x8xi1> to vector<8x8xi1>
    %628 = vector.broadcast %cst_253 : f32 to vector<8x8xf32>
    %629 = arith.select %627, %623, %628 : vector<8x8xi1>, vector<8x8xf32>
    %cst_254 = arith.constant dense<0xFF800000> : vector<8xf32>
    %630 = vector.multi_reduction <maximumf>, %629, %cst_254 [1] : vector<8x8xf32> to vector<8xf32>
    %631 = vector.shape_cast %630 : vector<8xf32> to vector<8x1xf32>
    %632 = vector.broadcast %631 : vector<8x1xf32> to vector<8x8xf32>
    %633 = arith.subf %629, %632 : vector<8x8xf32>
    %634 = math.exp %633 : vector<8x8xf32>
    %cst_255 = arith.constant dense<0.000000e+00> : vector<8xf32>
    %635 = vector.multi_reduction <add>, %634, %cst_255 [1] : vector<8x8xf32> to vector<8xf32>
    %636 = vector.shape_cast %635 : vector<8xf32> to vector<8x1xf32>
    %637 = tpu.reciprocal %636 {approx = true} : vector<8x1xf32> -> vector<8x1xf32>
    %638 = vector.broadcast %637 : vector<8x1xf32> to vector<8x8xf32>
    %639 = arith.mulf %634, %638 : vector<8x8xf32>
    %cst_256 = arith.constant dense<0.000000e+00> : vector<8x8xf32>
    %640 = tpu.matmul %639, %622, %cst_256 {dimension_numbers = #tpu.dot_dimension_numbers<[1], [0], [0], [1], [0, 0, 1, 1], [], []>} : vector<8x8xf32>, vector<8x8xf32>, vector<8x8xf32> -> vector<8x8xf32>
    %641 = vector.extract_strided_slice %534 {offsets = [16, 0], sizes = [8, 32], strides = [1, 1]} : vector<32x32xf32> to vector<8x32xf32>
    %cst_257 = arith.constant dense<0.000000e+00> : vector<8x32xf32>
    %642 = tpu.matmul %640, %641, %cst_257 {dimension_numbers = #tpu.dot_dimension_numbers<[1], [0], [0], [1], [0, 0, 1, 1], [], []>} : vector<8x8xf32>, vector<8x32xf32>, vector<8x32xf32> -> vector<8x32xf32>
    %643 = arith.addf %619, %642 : vector<8x32xf32>
    %644 = vector.extract_strided_slice %565 {offsets = [0, 24], sizes = [8, 8], strides = [1, 1]} : vector<8x32xf32> to vector<8x8xf32>
    %645 = vector.extract_strided_slice %569 {offsets = [0, 24], sizes = [8, 8], strides = [1, 1]} : vector<8x32xf32> to vector<8x8xf32>
    %646 = vector.extract_strided_slice %570 {offsets = [0, 24], sizes = [8, 8], strides = [1, 1]} : vector<8x32xf32> to vector<8x8xf32>
    %cst_258 = arith.constant dense<0.000000e+00> : vector<8x8xf32>
    %647 = tpu.matmul %644, %645, %cst_258 {dimension_numbers = #tpu.dot_dimension_numbers<[1], [1], [0], [0], [0, 0, 1, 0], [], []>} : vector<8x8xf32>, vector<8x8xf32>, vector<8x8xf32> -> vector<8x8xf32>
    %cst_259 = arith.constant 5.000000e-01 : f32
    %648 = vector.broadcast %cst_259 : f32 to vector<1x8xf32>
    %649 = arith.cmpf ogt, %5, %648 : vector<1x8xf32>
    %cst_260 = arith.constant -1.000000e+09 : f32
    %650 = vector.shape_cast %649 : vector<1x8xi1> to vector<1x8xi1>
    %651 = vector.broadcast %650 : vector<1x8xi1> to vector<8x8xi1>
    %652 = vector.broadcast %cst_260 : f32 to vector<8x8xf32>
    %653 = arith.select %651, %647, %652 : vector<8x8xi1>, vector<8x8xf32>
    %cst_261 = arith.constant dense<0xFF800000> : vector<8xf32>
    %654 = vector.multi_reduction <maximumf>, %653, %cst_261 [1] : vector<8x8xf32> to vector<8xf32>
    %655 = vector.shape_cast %654 : vector<8xf32> to vector<8x1xf32>
    %656 = vector.broadcast %655 : vector<8x1xf32> to vector<8x8xf32>
    %657 = arith.subf %653, %656 : vector<8x8xf32>
    %658 = math.exp %657 : vector<8x8xf32>
    %cst_262 = arith.constant dense<0.000000e+00> : vector<8xf32>
    %659 = vector.multi_reduction <add>, %658, %cst_262 [1] : vector<8x8xf32> to vector<8xf32>
    %660 = vector.shape_cast %659 : vector<8xf32> to vector<8x1xf32>
    %661 = tpu.reciprocal %660 {approx = true} : vector<8x1xf32> -> vector<8x1xf32>
    %662 = vector.broadcast %661 : vector<8x1xf32> to vector<8x8xf32>
    %663 = arith.mulf %658, %662 : vector<8x8xf32>
    %cst_263 = arith.constant dense<0.000000e+00> : vector<8x8xf32>
    %664 = tpu.matmul %663, %646, %cst_263 {dimension_numbers = #tpu.dot_dimension_numbers<[1], [0], [0], [1], [0, 0, 1, 1], [], []>} : vector<8x8xf32>, vector<8x8xf32>, vector<8x8xf32> -> vector<8x8xf32>
    %665 = vector.extract_strided_slice %534 {offsets = [24, 0], sizes = [8, 32], strides = [1, 1]} : vector<32x32xf32> to vector<8x32xf32>
    %cst_264 = arith.constant dense<0.000000e+00> : vector<8x32xf32>
    %666 = tpu.matmul %664, %665, %cst_264 {dimension_numbers = #tpu.dot_dimension_numbers<[1], [0], [0], [1], [0, 0, 1, 1], [], []>} : vector<8x8xf32>, vector<8x32xf32>, vector<8x32xf32> -> vector<8x32xf32>
    %667 = arith.addf %643, %666 : vector<8x32xf32>
    %668 = arith.addf %524, %667 : vector<8x32xf32>
    %c0_265 = arith.constant 0 : index
    %c0_266 = arith.constant 0 : index
    %c0_267 = arith.constant 0 : index
    %669 = vector.load %arg28[%c0_265, %c0_266, %c0_267] : memref<2x32x64xf32, #tpu.memory_space<vmem>>, vector<1x32x64xf32>
    %670 = vector.shape_cast %669 : vector<1x32x64xf32> to vector<32x64xf32>
    %c0_268 = arith.constant 0 : index
    %c0_269 = arith.constant 0 : index
    %c0_270 = arith.constant 0 : index
    %671 = vector.load %arg29[%c0_268, %c0_269, %c0_270] : memref<2x1x64xf32, #tpu.memory_space<vmem>>, vector<1x1x64xf32>
    %672 = vector.shape_cast %671 : vector<1x1x64xf32> to vector<1x64xf32>
    %c0_271 = arith.constant 0 : index
    %c0_272 = arith.constant 0 : index
    %c0_273 = arith.constant 0 : index
    %673 = vector.load %arg30[%c0_271, %c0_272, %c0_273] : memref<2x64x32xf32, #tpu.memory_space<vmem>>, vector<1x64x32xf32>
    %674 = vector.shape_cast %673 : vector<1x64x32xf32> to vector<64x32xf32>
    %c0_274 = arith.constant 0 : index
    %c0_275 = arith.constant 0 : index
    %c0_276 = arith.constant 0 : index
    %675 = vector.load %arg31[%c0_274, %c0_275, %c0_276] : memref<2x1x32xf32, #tpu.memory_space<vmem>>, vector<1x1x32xf32>
    %676 = vector.shape_cast %675 : vector<1x1x32xf32> to vector<1x32xf32>
    %c0_277 = arith.constant 0 : index
    %c0_278 = arith.constant 0 : index
    %c0_279 = arith.constant 0 : index
    %677 = vector.load %arg32[%c0_277, %c0_278, %c0_279] : memref<2x2x32xf32, #tpu.memory_space<vmem>>, vector<1x2x32xf32>
    %678 = vector.shape_cast %677 : vector<1x2x32xf32> to vector<2x32xf32>
    %679 = vector.extract_strided_slice %678 {offsets = [0, 0], sizes = [1, 32], strides = [1, 1]} : vector<2x32xf32> to vector<1x32xf32>
    %680 = vector.extract_strided_slice %678 {offsets = [1, 0], sizes = [1, 32], strides = [1, 1]} : vector<2x32xf32> to vector<1x32xf32>
    %cst_280 = arith.constant dense<0.000000e+00> : vector<8xf32>
    %681 = vector.multi_reduction <add>, %668, %cst_280 [1] : vector<8x32xf32> to vector<8xf32>
    %682 = vector.shape_cast %681 : vector<8xf32> to vector<8x1xf32>
    %cst_281 = arith.constant 3.200000e+01 : f32
    %683 = vector.broadcast %cst_281 : f32 to vector<8x1xf32>
    %684 = arith.divf %682, %683 : vector<8x1xf32>
    %685 = vector.broadcast %684 : vector<8x1xf32> to vector<8x32xf32>
    %686 = arith.subf %668, %685 : vector<8x32xf32>
    %687 = arith.mulf %686, %686 : vector<8x32xf32>
    %cst_282 = arith.constant dense<0.000000e+00> : vector<8xf32>
    %688 = vector.multi_reduction <add>, %687, %cst_282 [1] : vector<8x32xf32> to vector<8xf32>
    %689 = vector.shape_cast %688 : vector<8xf32> to vector<8x1xf32>
    %cst_283 = arith.constant 3.200000e+01 : f32
    %690 = vector.broadcast %cst_283 : f32 to vector<8x1xf32>
    %691 = arith.divf %689, %690 : vector<8x1xf32>
    %692 = vector.broadcast %684 : vector<8x1xf32> to vector<8x32xf32>
    %693 = arith.subf %668, %692 : vector<8x32xf32>
    %694 = vector.broadcast %679 : vector<1x32xf32> to vector<8x32xf32>
    %695 = arith.mulf %694, %693 : vector<8x32xf32>
    %cst_284 = arith.constant 9.99999997E-7 : f32
    %696 = vector.broadcast %cst_284 : f32 to vector<8x1xf32>
    %697 = arith.addf %691, %696 : vector<8x1xf32>
    %698 = math.rsqrt %697 : vector<8x1xf32>
    %699 = vector.broadcast %698 : vector<8x1xf32> to vector<8x32xf32>
    %700 = arith.mulf %695, %699 : vector<8x32xf32>
    %701 = vector.broadcast %680 : vector<1x32xf32> to vector<8x32xf32>
    %702 = arith.addf %700, %701 : vector<8x32xf32>
    %cst_285 = arith.constant dense<0.000000e+00> : vector<8x64xf32>
    %703 = tpu.matmul %702, %670, %cst_285 {dimension_numbers = #tpu.dot_dimension_numbers<[1], [0], [0], [1], [0, 0, 1, 1], [], []>} : vector<8x32xf32>, vector<32x64xf32>, vector<8x64xf32> -> vector<8x64xf32>
    %704 = vector.broadcast %672 : vector<1x64xf32> to vector<8x64xf32>
    %705 = arith.addf %703, %704 : vector<8x64xf32>
    %cst_286 = arith.constant 0.000000e+00 : f32
    %706 = vector.broadcast %cst_286 : f32 to vector<8x64xf32>
    %707 = arith.maximumf %705, %706 : vector<8x64xf32>
    %cst_287 = arith.constant dense<0.000000e+00> : vector<8x32xf32>
    %708 = tpu.matmul %707, %674, %cst_287 {dimension_numbers = #tpu.dot_dimension_numbers<[1], [0], [0], [1], [0, 0, 1, 1], [], []>} : vector<8x64xf32>, vector<64x32xf32>, vector<8x32xf32> -> vector<8x32xf32>
    %709 = arith.addf %668, %708 : vector<8x32xf32>
    %710 = vector.broadcast %676 : vector<1x32xf32> to vector<8x32xf32>
    %711 = arith.addf %709, %710 : vector<8x32xf32>
    %c1_288 = arith.constant 1 : index
    %c0_289 = arith.constant 0 : index
    %c0_290 = arith.constant 0 : index
    %712 = vector.load %arg16[%c1_288, %c0_289, %c0_290] : memref<2x32x96xf32, #tpu.memory_space<vmem>>, vector<1x32x96xf32>
    %713 = vector.shape_cast %712 : vector<1x32x96xf32> to vector<32x96xf32>
    %c1_291 = arith.constant 1 : index
    %c0_292 = arith.constant 0 : index
    %c0_293 = arith.constant 0 : index
    %714 = vector.load %arg17[%c1_291, %c0_292, %c0_293] : memref<2x1x96xf32, #tpu.memory_space<vmem>>, vector<1x1x96xf32>
    %715 = vector.shape_cast %714 : vector<1x1x96xf32> to vector<1x96xf32>
    %c1_294 = arith.constant 1 : index
    %c0_295 = arith.constant 0 : index
    %c0_296 = arith.constant 0 : index
    %716 = vector.load %arg18[%c1_294, %c0_295, %c0_296] : memref<2x32x32xf32, #tpu.memory_space<vmem>>, vector<1x32x32xf32>
    %717 = vector.shape_cast %716 : vector<1x32x32xf32> to vector<32x32xf32>
    %c1_297 = arith.constant 1 : index
    %c0_298 = arith.constant 0 : index
    %c0_299 = arith.constant 0 : index
    %718 = vector.load %arg19[%c1_297, %c0_298, %c0_299] : memref<2x1x32xf32, #tpu.memory_space<vmem>>, vector<1x1x32xf32>
    %719 = vector.shape_cast %718 : vector<1x1x32xf32> to vector<1x32xf32>
    %c1_300 = arith.constant 1 : index
    %c0_301 = arith.constant 0 : index
    %c0_302 = arith.constant 0 : index
    %720 = vector.load %arg20[%c1_300, %c0_301, %c0_302] : memref<2x2x32xf32, #tpu.memory_space<vmem>>, vector<1x2x32xf32>
    %721 = vector.shape_cast %720 : vector<1x2x32xf32> to vector<2x32xf32>
    %722 = vector.extract_strided_slice %721 {offsets = [0, 0], sizes = [1, 32], strides = [1, 1]} : vector<2x32xf32> to vector<1x32xf32>
    %723 = vector.extract_strided_slice %721 {offsets = [1, 0], sizes = [1, 32], strides = [1, 1]} : vector<2x32xf32> to vector<1x32xf32>
    %cst_303 = arith.constant dense<0.000000e+00> : vector<8xf32>
    %724 = vector.multi_reduction <add>, %711, %cst_303 [1] : vector<8x32xf32> to vector<8xf32>
    %725 = vector.shape_cast %724 : vector<8xf32> to vector<8x1xf32>
    %cst_304 = arith.constant 3.200000e+01 : f32
    %726 = vector.broadcast %cst_304 : f32 to vector<8x1xf32>
    %727 = arith.divf %725, %726 : vector<8x1xf32>
    %728 = vector.broadcast %727 : vector<8x1xf32> to vector<8x32xf32>
    %729 = arith.subf %711, %728 : vector<8x32xf32>
    %730 = arith.mulf %729, %729 : vector<8x32xf32>
    %cst_305 = arith.constant dense<0.000000e+00> : vector<8xf32>
    %731 = vector.multi_reduction <add>, %730, %cst_305 [1] : vector<8x32xf32> to vector<8xf32>
    %732 = vector.shape_cast %731 : vector<8xf32> to vector<8x1xf32>
    %cst_306 = arith.constant 3.200000e+01 : f32
    %733 = vector.broadcast %cst_306 : f32 to vector<8x1xf32>
    %734 = arith.divf %732, %733 : vector<8x1xf32>
    %735 = vector.broadcast %727 : vector<8x1xf32> to vector<8x32xf32>
    %736 = arith.subf %711, %735 : vector<8x32xf32>
    %737 = vector.broadcast %722 : vector<1x32xf32> to vector<8x32xf32>
    %738 = arith.mulf %737, %736 : vector<8x32xf32>
    %cst_307 = arith.constant 9.99999997E-7 : f32
    %739 = vector.broadcast %cst_307 : f32 to vector<8x1xf32>
    %740 = arith.addf %734, %739 : vector<8x1xf32>
    %741 = math.rsqrt %740 : vector<8x1xf32>
    %742 = vector.broadcast %741 : vector<8x1xf32> to vector<8x32xf32>
    %743 = arith.mulf %738, %742 : vector<8x32xf32>
    %744 = vector.broadcast %723 : vector<1x32xf32> to vector<8x32xf32>
    %745 = arith.addf %743, %744 : vector<8x32xf32>
    %cst_308 = arith.constant dense<0.000000e+00> : vector<8x96xf32>
    %746 = tpu.matmul %745, %713, %cst_308 {dimension_numbers = #tpu.dot_dimension_numbers<[1], [0], [0], [1], [0, 0, 1, 1], [], []>} : vector<8x32xf32>, vector<32x96xf32>, vector<8x96xf32> -> vector<8x96xf32>
    %747 = vector.broadcast %715 : vector<1x96xf32> to vector<8x96xf32>
    %748 = arith.addf %746, %747 : vector<8x96xf32>
    %749 = vector.extract_strided_slice %748 {offsets = [0, 0], sizes = [8, 32], strides = [1, 1]} : vector<8x96xf32> to vector<8x32xf32>
    %750 = vector.extract_strided_slice %748 {offsets = [0, 32], sizes = [8, 32], strides = [1, 1]} : vector<8x96xf32> to vector<8x32xf32>
    %751 = vector.extract_strided_slice %748 {offsets = [0, 64], sizes = [8, 32], strides = [1, 1]} : vector<8x96xf32> to vector<8x32xf32>
    %752 = vector.extract_strided_slice %749 {offsets = [0, 0], sizes = [8, 8], strides = [1, 1]} : vector<8x32xf32> to vector<8x8xf32>
    %753 = vector.extract_strided_slice %750 {offsets = [0, 0], sizes = [8, 8], strides = [1, 1]} : vector<8x32xf32> to vector<8x8xf32>
    %754 = vector.extract_strided_slice %751 {offsets = [0, 0], sizes = [8, 8], strides = [1, 1]} : vector<8x32xf32> to vector<8x8xf32>
    %cst_309 = arith.constant dense<0.000000e+00> : vector<8x8xf32>
    %755 = tpu.matmul %752, %753, %cst_309 {dimension_numbers = #tpu.dot_dimension_numbers<[1], [1], [0], [0], [0, 0, 1, 0], [], []>} : vector<8x8xf32>, vector<8x8xf32>, vector<8x8xf32> -> vector<8x8xf32>
    %cst_310 = arith.constant 5.000000e-01 : f32
    %756 = vector.broadcast %cst_310 : f32 to vector<8x8xf32>
    %757 = arith.cmpf ogt, %7, %756 : vector<8x8xf32>
    %cst_311 = arith.constant -1.000000e+09 : f32
    %758 = vector.broadcast %cst_311 : f32 to vector<8x8xf32>
    %759 = arith.select %757, %755, %758 : vector<8x8xi1>, vector<8x8xf32>
    %cst_312 = arith.constant dense<0xFF800000> : vector<8xf32>
    %760 = vector.multi_reduction <maximumf>, %759, %cst_312 [1] : vector<8x8xf32> to vector<8xf32>
    %761 = vector.shape_cast %760 : vector<8xf32> to vector<8x1xf32>
    %762 = vector.broadcast %761 : vector<8x1xf32> to vector<8x8xf32>
    %763 = arith.subf %759, %762 : vector<8x8xf32>
    %764 = math.exp %763 : vector<8x8xf32>
    %cst_313 = arith.constant dense<0.000000e+00> : vector<8xf32>
    %765 = vector.multi_reduction <add>, %764, %cst_313 [1] : vector<8x8xf32> to vector<8xf32>
    %766 = vector.shape_cast %765 : vector<8xf32> to vector<8x1xf32>
    %767 = tpu.reciprocal %766 {approx = true} : vector<8x1xf32> -> vector<8x1xf32>
    %768 = vector.broadcast %767 : vector<8x1xf32> to vector<8x8xf32>
    %769 = arith.mulf %764, %768 : vector<8x8xf32>
    %cst_314 = arith.constant dense<0.000000e+00> : vector<8x8xf32>
    %770 = tpu.matmul %769, %754, %cst_314 {dimension_numbers = #tpu.dot_dimension_numbers<[1], [0], [0], [1], [0, 0, 1, 1], [], []>} : vector<8x8xf32>, vector<8x8xf32>, vector<8x8xf32> -> vector<8x8xf32>
    %771 = vector.extract_strided_slice %717 {offsets = [0, 0], sizes = [8, 32], strides = [1, 1]} : vector<32x32xf32> to vector<8x32xf32>
    %cst_315 = arith.constant dense<0.000000e+00> : vector<8x32xf32>
    %772 = tpu.matmul %770, %771, %cst_315 {dimension_numbers = #tpu.dot_dimension_numbers<[1], [0], [0], [1], [0, 0, 1, 1], [], []>} : vector<8x8xf32>, vector<8x32xf32>, vector<8x32xf32> -> vector<8x32xf32>
    %773 = vector.broadcast %719 : vector<1x32xf32> to vector<8x32xf32>
    %774 = arith.addf %773, %772 : vector<8x32xf32>
    %775 = vector.extract_strided_slice %749 {offsets = [0, 8], sizes = [8, 8], strides = [1, 1]} : vector<8x32xf32> to vector<8x8xf32>
    %776 = vector.extract_strided_slice %750 {offsets = [0, 8], sizes = [8, 8], strides = [1, 1]} : vector<8x32xf32> to vector<8x8xf32>
    %777 = vector.extract_strided_slice %751 {offsets = [0, 8], sizes = [8, 8], strides = [1, 1]} : vector<8x32xf32> to vector<8x8xf32>
    %cst_316 = arith.constant dense<0.000000e+00> : vector<8x8xf32>
    %778 = tpu.matmul %775, %776, %cst_316 {dimension_numbers = #tpu.dot_dimension_numbers<[1], [1], [0], [0], [0, 0, 1, 0], [], []>} : vector<8x8xf32>, vector<8x8xf32>, vector<8x8xf32> -> vector<8x8xf32>
    %cst_317 = arith.constant 5.000000e-01 : f32
    %779 = vector.broadcast %cst_317 : f32 to vector<8x8xf32>
    %780 = arith.cmpf ogt, %7, %779 : vector<8x8xf32>
    %cst_318 = arith.constant -1.000000e+09 : f32
    %781 = vector.broadcast %cst_318 : f32 to vector<8x8xf32>
    %782 = arith.select %780, %778, %781 : vector<8x8xi1>, vector<8x8xf32>
    %cst_319 = arith.constant dense<0xFF800000> : vector<8xf32>
    %783 = vector.multi_reduction <maximumf>, %782, %cst_319 [1] : vector<8x8xf32> to vector<8xf32>
    %784 = vector.shape_cast %783 : vector<8xf32> to vector<8x1xf32>
    %785 = vector.broadcast %784 : vector<8x1xf32> to vector<8x8xf32>
    %786 = arith.subf %782, %785 : vector<8x8xf32>
    %787 = math.exp %786 : vector<8x8xf32>
    %cst_320 = arith.constant dense<0.000000e+00> : vector<8xf32>
    %788 = vector.multi_reduction <add>, %787, %cst_320 [1] : vector<8x8xf32> to vector<8xf32>
    %789 = vector.shape_cast %788 : vector<8xf32> to vector<8x1xf32>
    %790 = tpu.reciprocal %789 {approx = true} : vector<8x1xf32> -> vector<8x1xf32>
    %791 = vector.broadcast %790 : vector<8x1xf32> to vector<8x8xf32>
    %792 = arith.mulf %787, %791 : vector<8x8xf32>
    %cst_321 = arith.constant dense<0.000000e+00> : vector<8x8xf32>
    %793 = tpu.matmul %792, %777, %cst_321 {dimension_numbers = #tpu.dot_dimension_numbers<[1], [0], [0], [1], [0, 0, 1, 1], [], []>} : vector<8x8xf32>, vector<8x8xf32>, vector<8x8xf32> -> vector<8x8xf32>
    %794 = vector.extract_strided_slice %717 {offsets = [8, 0], sizes = [8, 32], strides = [1, 1]} : vector<32x32xf32> to vector<8x32xf32>
    %cst_322 = arith.constant dense<0.000000e+00> : vector<8x32xf32>
    %795 = tpu.matmul %793, %794, %cst_322 {dimension_numbers = #tpu.dot_dimension_numbers<[1], [0], [0], [1], [0, 0, 1, 1], [], []>} : vector<8x8xf32>, vector<8x32xf32>, vector<8x32xf32> -> vector<8x32xf32>
    %796 = arith.addf %774, %795 : vector<8x32xf32>
    %797 = vector.extract_strided_slice %749 {offsets = [0, 16], sizes = [8, 8], strides = [1, 1]} : vector<8x32xf32> to vector<8x8xf32>
    %798 = vector.extract_strided_slice %750 {offsets = [0, 16], sizes = [8, 8], strides = [1, 1]} : vector<8x32xf32> to vector<8x8xf32>
    %799 = vector.extract_strided_slice %751 {offsets = [0, 16], sizes = [8, 8], strides = [1, 1]} : vector<8x32xf32> to vector<8x8xf32>
    %cst_323 = arith.constant dense<0.000000e+00> : vector<8x8xf32>
    %800 = tpu.matmul %797, %798, %cst_323 {dimension_numbers = #tpu.dot_dimension_numbers<[1], [1], [0], [0], [0, 0, 1, 0], [], []>} : vector<8x8xf32>, vector<8x8xf32>, vector<8x8xf32> -> vector<8x8xf32>
    %cst_324 = arith.constant 5.000000e-01 : f32
    %801 = vector.broadcast %cst_324 : f32 to vector<8x8xf32>
    %802 = arith.cmpf ogt, %7, %801 : vector<8x8xf32>
    %cst_325 = arith.constant -1.000000e+09 : f32
    %803 = vector.broadcast %cst_325 : f32 to vector<8x8xf32>
    %804 = arith.select %802, %800, %803 : vector<8x8xi1>, vector<8x8xf32>
    %cst_326 = arith.constant dense<0xFF800000> : vector<8xf32>
    %805 = vector.multi_reduction <maximumf>, %804, %cst_326 [1] : vector<8x8xf32> to vector<8xf32>
    %806 = vector.shape_cast %805 : vector<8xf32> to vector<8x1xf32>
    %807 = vector.broadcast %806 : vector<8x1xf32> to vector<8x8xf32>
    %808 = arith.subf %804, %807 : vector<8x8xf32>
    %809 = math.exp %808 : vector<8x8xf32>
    %cst_327 = arith.constant dense<0.000000e+00> : vector<8xf32>
    %810 = vector.multi_reduction <add>, %809, %cst_327 [1] : vector<8x8xf32> to vector<8xf32>
    %811 = vector.shape_cast %810 : vector<8xf32> to vector<8x1xf32>
    %812 = tpu.reciprocal %811 {approx = true} : vector<8x1xf32> -> vector<8x1xf32>
    %813 = vector.broadcast %812 : vector<8x1xf32> to vector<8x8xf32>
    %814 = arith.mulf %809, %813 : vector<8x8xf32>
    %cst_328 = arith.constant dense<0.000000e+00> : vector<8x8xf32>
    %815 = tpu.matmul %814, %799, %cst_328 {dimension_numbers = #tpu.dot_dimension_numbers<[1], [0], [0], [1], [0, 0, 1, 1], [], []>} : vector<8x8xf32>, vector<8x8xf32>, vector<8x8xf32> -> vector<8x8xf32>
    %816 = vector.extract_strided_slice %717 {offsets = [16, 0], sizes = [8, 32], strides = [1, 1]} : vector<32x32xf32> to vector<8x32xf32>
    %cst_329 = arith.constant dense<0.000000e+00> : vector<8x32xf32>
    %817 = tpu.matmul %815, %816, %cst_329 {dimension_numbers = #tpu.dot_dimension_numbers<[1], [0], [0], [1], [0, 0, 1, 1], [], []>} : vector<8x8xf32>, vector<8x32xf32>, vector<8x32xf32> -> vector<8x32xf32>
    %818 = arith.addf %796, %817 : vector<8x32xf32>
    %819 = vector.extract_strided_slice %749 {offsets = [0, 24], sizes = [8, 8], strides = [1, 1]} : vector<8x32xf32> to vector<8x8xf32>
    %820 = vector.extract_strided_slice %750 {offsets = [0, 24], sizes = [8, 8], strides = [1, 1]} : vector<8x32xf32> to vector<8x8xf32>
    %821 = vector.extract_strided_slice %751 {offsets = [0, 24], sizes = [8, 8], strides = [1, 1]} : vector<8x32xf32> to vector<8x8xf32>
    %cst_330 = arith.constant dense<0.000000e+00> : vector<8x8xf32>
    %822 = tpu.matmul %819, %820, %cst_330 {dimension_numbers = #tpu.dot_dimension_numbers<[1], [1], [0], [0], [0, 0, 1, 0], [], []>} : vector<8x8xf32>, vector<8x8xf32>, vector<8x8xf32> -> vector<8x8xf32>
    %cst_331 = arith.constant 5.000000e-01 : f32
    %823 = vector.broadcast %cst_331 : f32 to vector<8x8xf32>
    %824 = arith.cmpf ogt, %7, %823 : vector<8x8xf32>
    %cst_332 = arith.constant -1.000000e+09 : f32
    %825 = vector.broadcast %cst_332 : f32 to vector<8x8xf32>
    %826 = arith.select %824, %822, %825 : vector<8x8xi1>, vector<8x8xf32>
    %cst_333 = arith.constant dense<0xFF800000> : vector<8xf32>
    %827 = vector.multi_reduction <maximumf>, %826, %cst_333 [1] : vector<8x8xf32> to vector<8xf32>
    %828 = vector.shape_cast %827 : vector<8xf32> to vector<8x1xf32>
    %829 = vector.broadcast %828 : vector<8x1xf32> to vector<8x8xf32>
    %830 = arith.subf %826, %829 : vector<8x8xf32>
    %831 = math.exp %830 : vector<8x8xf32>
    %cst_334 = arith.constant dense<0.000000e+00> : vector<8xf32>
    %832 = vector.multi_reduction <add>, %831, %cst_334 [1] : vector<8x8xf32> to vector<8xf32>
    %833 = vector.shape_cast %832 : vector<8xf32> to vector<8x1xf32>
    %834 = tpu.reciprocal %833 {approx = true} : vector<8x1xf32> -> vector<8x1xf32>
    %835 = vector.broadcast %834 : vector<8x1xf32> to vector<8x8xf32>
    %836 = arith.mulf %831, %835 : vector<8x8xf32>
    %cst_335 = arith.constant dense<0.000000e+00> : vector<8x8xf32>
    %837 = tpu.matmul %836, %821, %cst_335 {dimension_numbers = #tpu.dot_dimension_numbers<[1], [0], [0], [1], [0, 0, 1, 1], [], []>} : vector<8x8xf32>, vector<8x8xf32>, vector<8x8xf32> -> vector<8x8xf32>
    %838 = vector.extract_strided_slice %717 {offsets = [24, 0], sizes = [8, 32], strides = [1, 1]} : vector<32x32xf32> to vector<8x32xf32>
    %cst_336 = arith.constant dense<0.000000e+00> : vector<8x32xf32>
    %839 = tpu.matmul %837, %838, %cst_336 {dimension_numbers = #tpu.dot_dimension_numbers<[1], [0], [0], [1], [0, 0, 1, 1], [], []>} : vector<8x8xf32>, vector<8x32xf32>, vector<8x32xf32> -> vector<8x32xf32>
    %840 = arith.addf %818, %839 : vector<8x32xf32>
    %841 = arith.addf %711, %840 : vector<8x32xf32>
    %c1_337 = arith.constant 1 : index
    %c0_338 = arith.constant 0 : index
    %c0_339 = arith.constant 0 : index
    %842 = vector.load %arg21[%c1_337, %c0_338, %c0_339] : memref<2x32x32xf32, #tpu.memory_space<vmem>>, vector<1x32x32xf32>
    %843 = vector.shape_cast %842 : vector<1x32x32xf32> to vector<32x32xf32>
    %c1_340 = arith.constant 1 : index
    %c0_341 = arith.constant 0 : index
    %c0_342 = arith.constant 0 : index
    %844 = vector.load %arg22[%c1_340, %c0_341, %c0_342] : memref<2x1x32xf32, #tpu.memory_space<vmem>>, vector<1x1x32xf32>
    %845 = vector.shape_cast %844 : vector<1x1x32xf32> to vector<1x32xf32>
    %c1_343 = arith.constant 1 : index
    %c0_344 = arith.constant 0 : index
    %c0_345 = arith.constant 0 : index
    %846 = vector.load %arg23[%c1_343, %c0_344, %c0_345] : memref<2x32x64xf32, #tpu.memory_space<vmem>>, vector<1x32x64xf32>
    %847 = vector.shape_cast %846 : vector<1x32x64xf32> to vector<32x64xf32>
    %c1_346 = arith.constant 1 : index
    %c0_347 = arith.constant 0 : index
    %c0_348 = arith.constant 0 : index
    %848 = vector.load %arg24[%c1_346, %c0_347, %c0_348] : memref<2x1x64xf32, #tpu.memory_space<vmem>>, vector<1x1x64xf32>
    %849 = vector.shape_cast %848 : vector<1x1x64xf32> to vector<1x64xf32>
    %c1_349 = arith.constant 1 : index
    %c0_350 = arith.constant 0 : index
    %c0_351 = arith.constant 0 : index
    %850 = vector.load %arg25[%c1_349, %c0_350, %c0_351] : memref<2x32x32xf32, #tpu.memory_space<vmem>>, vector<1x32x32xf32>
    %851 = vector.shape_cast %850 : vector<1x32x32xf32> to vector<32x32xf32>
    %c1_352 = arith.constant 1 : index
    %c0_353 = arith.constant 0 : index
    %c0_354 = arith.constant 0 : index
    %852 = vector.load %arg26[%c1_352, %c0_353, %c0_354] : memref<2x1x32xf32, #tpu.memory_space<vmem>>, vector<1x1x32xf32>
    %853 = vector.shape_cast %852 : vector<1x1x32xf32> to vector<1x32xf32>
    %c1_355 = arith.constant 1 : index
    %c0_356 = arith.constant 0 : index
    %c0_357 = arith.constant 0 : index
    %854 = vector.load %arg27[%c1_355, %c0_356, %c0_357] : memref<2x2x32xf32, #tpu.memory_space<vmem>>, vector<1x2x32xf32>
    %855 = vector.shape_cast %854 : vector<1x2x32xf32> to vector<2x32xf32>
    %856 = vector.extract_strided_slice %855 {offsets = [0, 0], sizes = [1, 32], strides = [1, 1]} : vector<2x32xf32> to vector<1x32xf32>
    %857 = vector.extract_strided_slice %855 {offsets = [1, 0], sizes = [1, 32], strides = [1, 1]} : vector<2x32xf32> to vector<1x32xf32>
    %cst_358 = arith.constant dense<0.000000e+00> : vector<8xf32>
    %858 = vector.multi_reduction <add>, %841, %cst_358 [1] : vector<8x32xf32> to vector<8xf32>
    %859 = vector.shape_cast %858 : vector<8xf32> to vector<8x1xf32>
    %cst_359 = arith.constant 3.200000e+01 : f32
    %860 = vector.broadcast %cst_359 : f32 to vector<8x1xf32>
    %861 = arith.divf %859, %860 : vector<8x1xf32>
    %862 = vector.broadcast %861 : vector<8x1xf32> to vector<8x32xf32>
    %863 = arith.subf %841, %862 : vector<8x32xf32>
    %864 = arith.mulf %863, %863 : vector<8x32xf32>
    %cst_360 = arith.constant dense<0.000000e+00> : vector<8xf32>
    %865 = vector.multi_reduction <add>, %864, %cst_360 [1] : vector<8x32xf32> to vector<8xf32>
    %866 = vector.shape_cast %865 : vector<8xf32> to vector<8x1xf32>
    %cst_361 = arith.constant 3.200000e+01 : f32
    %867 = vector.broadcast %cst_361 : f32 to vector<8x1xf32>
    %868 = arith.divf %866, %867 : vector<8x1xf32>
    %869 = vector.broadcast %861 : vector<8x1xf32> to vector<8x32xf32>
    %870 = arith.subf %841, %869 : vector<8x32xf32>
    %871 = vector.broadcast %856 : vector<1x32xf32> to vector<8x32xf32>
    %872 = arith.mulf %871, %870 : vector<8x32xf32>
    %cst_362 = arith.constant 9.99999997E-7 : f32
    %873 = vector.broadcast %cst_362 : f32 to vector<8x1xf32>
    %874 = arith.addf %868, %873 : vector<8x1xf32>
    %875 = math.rsqrt %874 : vector<8x1xf32>
    %876 = vector.broadcast %875 : vector<8x1xf32> to vector<8x32xf32>
    %877 = arith.mulf %872, %876 : vector<8x32xf32>
    %878 = vector.broadcast %857 : vector<1x32xf32> to vector<8x32xf32>
    %879 = arith.addf %877, %878 : vector<8x32xf32>
    %cst_363 = arith.constant dense<0.000000e+00> : vector<8x32xf32>
    %880 = tpu.matmul %879, %843, %cst_363 {dimension_numbers = #tpu.dot_dimension_numbers<[1], [0], [0], [1], [0, 0, 1, 1], [], []>} : vector<8x32xf32>, vector<32x32xf32>, vector<8x32xf32> -> vector<8x32xf32>
    %881 = vector.broadcast %845 : vector<1x32xf32> to vector<8x32xf32>
    %882 = arith.addf %880, %881 : vector<8x32xf32>
    %cst_364 = arith.constant dense<0.000000e+00> : vector<8x64xf32>
    %883 = tpu.matmul %394, %847, %cst_364 {dimension_numbers = #tpu.dot_dimension_numbers<[1], [0], [0], [1], [0, 0, 1, 1], [], []>} : vector<8x32xf32>, vector<32x64xf32>, vector<8x64xf32> -> vector<8x64xf32>
    %884 = vector.broadcast %849 : vector<1x64xf32> to vector<8x64xf32>
    %885 = arith.addf %883, %884 : vector<8x64xf32>
    %886 = vector.extract_strided_slice %885 {offsets = [0, 0], sizes = [8, 32], strides = [1, 1]} : vector<8x64xf32> to vector<8x32xf32>
    %887 = vector.extract_strided_slice %885 {offsets = [0, 32], sizes = [8, 32], strides = [1, 1]} : vector<8x64xf32> to vector<8x32xf32>
    %888 = vector.extract_strided_slice %882 {offsets = [0, 0], sizes = [8, 8], strides = [1, 1]} : vector<8x32xf32> to vector<8x8xf32>
    %889 = vector.extract_strided_slice %886 {offsets = [0, 0], sizes = [8, 8], strides = [1, 1]} : vector<8x32xf32> to vector<8x8xf32>
    %890 = vector.extract_strided_slice %887 {offsets = [0, 0], sizes = [8, 8], strides = [1, 1]} : vector<8x32xf32> to vector<8x8xf32>
    %cst_365 = arith.constant dense<0.000000e+00> : vector<8x8xf32>
    %891 = tpu.matmul %888, %889, %cst_365 {dimension_numbers = #tpu.dot_dimension_numbers<[1], [1], [0], [0], [0, 0, 1, 0], [], []>} : vector<8x8xf32>, vector<8x8xf32>, vector<8x8xf32> -> vector<8x8xf32>
    %cst_366 = arith.constant 5.000000e-01 : f32
    %892 = vector.broadcast %cst_366 : f32 to vector<1x8xf32>
    %893 = arith.cmpf ogt, %5, %892 : vector<1x8xf32>
    %cst_367 = arith.constant -1.000000e+09 : f32
    %894 = vector.shape_cast %893 : vector<1x8xi1> to vector<1x8xi1>
    %895 = vector.broadcast %894 : vector<1x8xi1> to vector<8x8xi1>
    %896 = vector.broadcast %cst_367 : f32 to vector<8x8xf32>
    %897 = arith.select %895, %891, %896 : vector<8x8xi1>, vector<8x8xf32>
    %cst_368 = arith.constant dense<0xFF800000> : vector<8xf32>
    %898 = vector.multi_reduction <maximumf>, %897, %cst_368 [1] : vector<8x8xf32> to vector<8xf32>
    %899 = vector.shape_cast %898 : vector<8xf32> to vector<8x1xf32>
    %900 = vector.broadcast %899 : vector<8x1xf32> to vector<8x8xf32>
    %901 = arith.subf %897, %900 : vector<8x8xf32>
    %902 = math.exp %901 : vector<8x8xf32>
    %cst_369 = arith.constant dense<0.000000e+00> : vector<8xf32>
    %903 = vector.multi_reduction <add>, %902, %cst_369 [1] : vector<8x8xf32> to vector<8xf32>
    %904 = vector.shape_cast %903 : vector<8xf32> to vector<8x1xf32>
    %905 = tpu.reciprocal %904 {approx = true} : vector<8x1xf32> -> vector<8x1xf32>
    %906 = vector.broadcast %905 : vector<8x1xf32> to vector<8x8xf32>
    %907 = arith.mulf %902, %906 : vector<8x8xf32>
    %cst_370 = arith.constant dense<0.000000e+00> : vector<8x8xf32>
    %908 = tpu.matmul %907, %890, %cst_370 {dimension_numbers = #tpu.dot_dimension_numbers<[1], [0], [0], [1], [0, 0, 1, 1], [], []>} : vector<8x8xf32>, vector<8x8xf32>, vector<8x8xf32> -> vector<8x8xf32>
    %909 = vector.extract_strided_slice %851 {offsets = [0, 0], sizes = [8, 32], strides = [1, 1]} : vector<32x32xf32> to vector<8x32xf32>
    %cst_371 = arith.constant dense<0.000000e+00> : vector<8x32xf32>
    %910 = tpu.matmul %908, %909, %cst_371 {dimension_numbers = #tpu.dot_dimension_numbers<[1], [0], [0], [1], [0, 0, 1, 1], [], []>} : vector<8x8xf32>, vector<8x32xf32>, vector<8x32xf32> -> vector<8x32xf32>
    %911 = vector.broadcast %853 : vector<1x32xf32> to vector<8x32xf32>
    %912 = arith.addf %911, %910 : vector<8x32xf32>
    %913 = vector.extract_strided_slice %882 {offsets = [0, 8], sizes = [8, 8], strides = [1, 1]} : vector<8x32xf32> to vector<8x8xf32>
    %914 = vector.extract_strided_slice %886 {offsets = [0, 8], sizes = [8, 8], strides = [1, 1]} : vector<8x32xf32> to vector<8x8xf32>
    %915 = vector.extract_strided_slice %887 {offsets = [0, 8], sizes = [8, 8], strides = [1, 1]} : vector<8x32xf32> to vector<8x8xf32>
    %cst_372 = arith.constant dense<0.000000e+00> : vector<8x8xf32>
    %916 = tpu.matmul %913, %914, %cst_372 {dimension_numbers = #tpu.dot_dimension_numbers<[1], [1], [0], [0], [0, 0, 1, 0], [], []>} : vector<8x8xf32>, vector<8x8xf32>, vector<8x8xf32> -> vector<8x8xf32>
    %cst_373 = arith.constant 5.000000e-01 : f32
    %917 = vector.broadcast %cst_373 : f32 to vector<1x8xf32>
    %918 = arith.cmpf ogt, %5, %917 : vector<1x8xf32>
    %cst_374 = arith.constant -1.000000e+09 : f32
    %919 = vector.shape_cast %918 : vector<1x8xi1> to vector<1x8xi1>
    %920 = vector.broadcast %919 : vector<1x8xi1> to vector<8x8xi1>
    %921 = vector.broadcast %cst_374 : f32 to vector<8x8xf32>
    %922 = arith.select %920, %916, %921 : vector<8x8xi1>, vector<8x8xf32>
    %cst_375 = arith.constant dense<0xFF800000> : vector<8xf32>
    %923 = vector.multi_reduction <maximumf>, %922, %cst_375 [1] : vector<8x8xf32> to vector<8xf32>
    %924 = vector.shape_cast %923 : vector<8xf32> to vector<8x1xf32>
    %925 = vector.broadcast %924 : vector<8x1xf32> to vector<8x8xf32>
    %926 = arith.subf %922, %925 : vector<8x8xf32>
    %927 = math.exp %926 : vector<8x8xf32>
    %cst_376 = arith.constant dense<0.000000e+00> : vector<8xf32>
    %928 = vector.multi_reduction <add>, %927, %cst_376 [1] : vector<8x8xf32> to vector<8xf32>
    %929 = vector.shape_cast %928 : vector<8xf32> to vector<8x1xf32>
    %930 = tpu.reciprocal %929 {approx = true} : vector<8x1xf32> -> vector<8x1xf32>
    %931 = vector.broadcast %930 : vector<8x1xf32> to vector<8x8xf32>
    %932 = arith.mulf %927, %931 : vector<8x8xf32>
    %cst_377 = arith.constant dense<0.000000e+00> : vector<8x8xf32>
    %933 = tpu.matmul %932, %915, %cst_377 {dimension_numbers = #tpu.dot_dimension_numbers<[1], [0], [0], [1], [0, 0, 1, 1], [], []>} : vector<8x8xf32>, vector<8x8xf32>, vector<8x8xf32> -> vector<8x8xf32>
    %934 = vector.extract_strided_slice %851 {offsets = [8, 0], sizes = [8, 32], strides = [1, 1]} : vector<32x32xf32> to vector<8x32xf32>
    %cst_378 = arith.constant dense<0.000000e+00> : vector<8x32xf32>
    %935 = tpu.matmul %933, %934, %cst_378 {dimension_numbers = #tpu.dot_dimension_numbers<[1], [0], [0], [1], [0, 0, 1, 1], [], []>} : vector<8x8xf32>, vector<8x32xf32>, vector<8x32xf32> -> vector<8x32xf32>
    %936 = arith.addf %912, %935 : vector<8x32xf32>
    %937 = vector.extract_strided_slice %882 {offsets = [0, 16], sizes = [8, 8], strides = [1, 1]} : vector<8x32xf32> to vector<8x8xf32>
    %938 = vector.extract_strided_slice %886 {offsets = [0, 16], sizes = [8, 8], strides = [1, 1]} : vector<8x32xf32> to vector<8x8xf32>
    %939 = vector.extract_strided_slice %887 {offsets = [0, 16], sizes = [8, 8], strides = [1, 1]} : vector<8x32xf32> to vector<8x8xf32>
    %cst_379 = arith.constant dense<0.000000e+00> : vector<8x8xf32>
    %940 = tpu.matmul %937, %938, %cst_379 {dimension_numbers = #tpu.dot_dimension_numbers<[1], [1], [0], [0], [0, 0, 1, 0], [], []>} : vector<8x8xf32>, vector<8x8xf32>, vector<8x8xf32> -> vector<8x8xf32>
    %cst_380 = arith.constant 5.000000e-01 : f32
    %941 = vector.broadcast %cst_380 : f32 to vector<1x8xf32>
    %942 = arith.cmpf ogt, %5, %941 : vector<1x8xf32>
    %cst_381 = arith.constant -1.000000e+09 : f32
    %943 = vector.shape_cast %942 : vector<1x8xi1> to vector<1x8xi1>
    %944 = vector.broadcast %943 : vector<1x8xi1> to vector<8x8xi1>
    %945 = vector.broadcast %cst_381 : f32 to vector<8x8xf32>
    %946 = arith.select %944, %940, %945 : vector<8x8xi1>, vector<8x8xf32>
    %cst_382 = arith.constant dense<0xFF800000> : vector<8xf32>
    %947 = vector.multi_reduction <maximumf>, %946, %cst_382 [1] : vector<8x8xf32> to vector<8xf32>
    %948 = vector.shape_cast %947 : vector<8xf32> to vector<8x1xf32>
    %949 = vector.broadcast %948 : vector<8x1xf32> to vector<8x8xf32>
    %950 = arith.subf %946, %949 : vector<8x8xf32>
    %951 = math.exp %950 : vector<8x8xf32>
    %cst_383 = arith.constant dense<0.000000e+00> : vector<8xf32>
    %952 = vector.multi_reduction <add>, %951, %cst_383 [1] : vector<8x8xf32> to vector<8xf32>
    %953 = vector.shape_cast %952 : vector<8xf32> to vector<8x1xf32>
    %954 = tpu.reciprocal %953 {approx = true} : vector<8x1xf32> -> vector<8x1xf32>
    %955 = vector.broadcast %954 : vector<8x1xf32> to vector<8x8xf32>
    %956 = arith.mulf %951, %955 : vector<8x8xf32>
    %cst_384 = arith.constant dense<0.000000e+00> : vector<8x8xf32>
    %957 = tpu.matmul %956, %939, %cst_384 {dimension_numbers = #tpu.dot_dimension_numbers<[1], [0], [0], [1], [0, 0, 1, 1], [], []>} : vector<8x8xf32>, vector<8x8xf32>, vector<8x8xf32> -> vector<8x8xf32>
    %958 = vector.extract_strided_slice %851 {offsets = [16, 0], sizes = [8, 32], strides = [1, 1]} : vector<32x32xf32> to vector<8x32xf32>
    %cst_385 = arith.constant dense<0.000000e+00> : vector<8x32xf32>
    %959 = tpu.matmul %957, %958, %cst_385 {dimension_numbers = #tpu.dot_dimension_numbers<[1], [0], [0], [1], [0, 0, 1, 1], [], []>} : vector<8x8xf32>, vector<8x32xf32>, vector<8x32xf32> -> vector<8x32xf32>
    %960 = arith.addf %936, %959 : vector<8x32xf32>
    %961 = vector.extract_strided_slice %882 {offsets = [0, 24], sizes = [8, 8], strides = [1, 1]} : vector<8x32xf32> to vector<8x8xf32>
    %962 = vector.extract_strided_slice %886 {offsets = [0, 24], sizes = [8, 8], strides = [1, 1]} : vector<8x32xf32> to vector<8x8xf32>
    %963 = vector.extract_strided_slice %887 {offsets = [0, 24], sizes = [8, 8], strides = [1, 1]} : vector<8x32xf32> to vector<8x8xf32>
    %cst_386 = arith.constant dense<0.000000e+00> : vector<8x8xf32>
    %964 = tpu.matmul %961, %962, %cst_386 {dimension_numbers = #tpu.dot_dimension_numbers<[1], [1], [0], [0], [0, 0, 1, 0], [], []>} : vector<8x8xf32>, vector<8x8xf32>, vector<8x8xf32> -> vector<8x8xf32>
    %cst_387 = arith.constant 5.000000e-01 : f32
    %965 = vector.broadcast %cst_387 : f32 to vector<1x8xf32>
    %966 = arith.cmpf ogt, %5, %965 : vector<1x8xf32>
    %cst_388 = arith.constant -1.000000e+09 : f32
    %967 = vector.shape_cast %966 : vector<1x8xi1> to vector<1x8xi1>
    %968 = vector.broadcast %967 : vector<1x8xi1> to vector<8x8xi1>
    %969 = vector.broadcast %cst_388 : f32 to vector<8x8xf32>
    %970 = arith.select %968, %964, %969 : vector<8x8xi1>, vector<8x8xf32>
    %cst_389 = arith.constant dense<0xFF800000> : vector<8xf32>
    %971 = vector.multi_reduction <maximumf>, %970, %cst_389 [1] : vector<8x8xf32> to vector<8xf32>
    %972 = vector.shape_cast %971 : vector<8xf32> to vector<8x1xf32>
    %973 = vector.broadcast %972 : vector<8x1xf32> to vector<8x8xf32>
    %974 = arith.subf %970, %973 : vector<8x8xf32>
    %975 = math.exp %974 : vector<8x8xf32>
    %cst_390 = arith.constant dense<0.000000e+00> : vector<8xf32>
    %976 = vector.multi_reduction <add>, %975, %cst_390 [1] : vector<8x8xf32> to vector<8xf32>
    %977 = vector.shape_cast %976 : vector<8xf32> to vector<8x1xf32>
    %978 = tpu.reciprocal %977 {approx = true} : vector<8x1xf32> -> vector<8x1xf32>
    %979 = vector.broadcast %978 : vector<8x1xf32> to vector<8x8xf32>
    %980 = arith.mulf %975, %979 : vector<8x8xf32>
    %cst_391 = arith.constant dense<0.000000e+00> : vector<8x8xf32>
    %981 = tpu.matmul %980, %963, %cst_391 {dimension_numbers = #tpu.dot_dimension_numbers<[1], [0], [0], [1], [0, 0, 1, 1], [], []>} : vector<8x8xf32>, vector<8x8xf32>, vector<8x8xf32> -> vector<8x8xf32>
    %982 = vector.extract_strided_slice %851 {offsets = [24, 0], sizes = [8, 32], strides = [1, 1]} : vector<32x32xf32> to vector<8x32xf32>
    %cst_392 = arith.constant dense<0.000000e+00> : vector<8x32xf32>
    %983 = tpu.matmul %981, %982, %cst_392 {dimension_numbers = #tpu.dot_dimension_numbers<[1], [0], [0], [1], [0, 0, 1, 1], [], []>} : vector<8x8xf32>, vector<8x32xf32>, vector<8x32xf32> -> vector<8x32xf32>
    %984 = arith.addf %960, %983 : vector<8x32xf32>
    %985 = arith.addf %841, %984 : vector<8x32xf32>
    %c1_393 = arith.constant 1 : index
    %c0_394 = arith.constant 0 : index
    %c0_395 = arith.constant 0 : index
    %986 = vector.load %arg28[%c1_393, %c0_394, %c0_395] : memref<2x32x64xf32, #tpu.memory_space<vmem>>, vector<1x32x64xf32>
    %987 = vector.shape_cast %986 : vector<1x32x64xf32> to vector<32x64xf32>
    %c1_396 = arith.constant 1 : index
    %c0_397 = arith.constant 0 : index
    %c0_398 = arith.constant 0 : index
    %988 = vector.load %arg29[%c1_396, %c0_397, %c0_398] : memref<2x1x64xf32, #tpu.memory_space<vmem>>, vector<1x1x64xf32>
    %989 = vector.shape_cast %988 : vector<1x1x64xf32> to vector<1x64xf32>
    %c1_399 = arith.constant 1 : index
    %c0_400 = arith.constant 0 : index
    %c0_401 = arith.constant 0 : index
    %990 = vector.load %arg30[%c1_399, %c0_400, %c0_401] : memref<2x64x32xf32, #tpu.memory_space<vmem>>, vector<1x64x32xf32>
    %991 = vector.shape_cast %990 : vector<1x64x32xf32> to vector<64x32xf32>
    %c1_402 = arith.constant 1 : index
    %c0_403 = arith.constant 0 : index
    %c0_404 = arith.constant 0 : index
    %992 = vector.load %arg31[%c1_402, %c0_403, %c0_404] : memref<2x1x32xf32, #tpu.memory_space<vmem>>, vector<1x1x32xf32>
    %993 = vector.shape_cast %992 : vector<1x1x32xf32> to vector<1x32xf32>
    %c1_405 = arith.constant 1 : index
    %c0_406 = arith.constant 0 : index
    %c0_407 = arith.constant 0 : index
    %994 = vector.load %arg32[%c1_405, %c0_406, %c0_407] : memref<2x2x32xf32, #tpu.memory_space<vmem>>, vector<1x2x32xf32>
    %995 = vector.shape_cast %994 : vector<1x2x32xf32> to vector<2x32xf32>
    %996 = vector.extract_strided_slice %995 {offsets = [0, 0], sizes = [1, 32], strides = [1, 1]} : vector<2x32xf32> to vector<1x32xf32>
    %997 = vector.extract_strided_slice %995 {offsets = [1, 0], sizes = [1, 32], strides = [1, 1]} : vector<2x32xf32> to vector<1x32xf32>
    %cst_408 = arith.constant dense<0.000000e+00> : vector<8xf32>
    %998 = vector.multi_reduction <add>, %985, %cst_408 [1] : vector<8x32xf32> to vector<8xf32>
    %999 = vector.shape_cast %998 : vector<8xf32> to vector<8x1xf32>
    %cst_409 = arith.constant 3.200000e+01 : f32
    %1000 = vector.broadcast %cst_409 : f32 to vector<8x1xf32>
    %1001 = arith.divf %999, %1000 : vector<8x1xf32>
    %1002 = vector.broadcast %1001 : vector<8x1xf32> to vector<8x32xf32>
    %1003 = arith.subf %985, %1002 : vector<8x32xf32>
    %1004 = arith.mulf %1003, %1003 : vector<8x32xf32>
    %cst_410 = arith.constant dense<0.000000e+00> : vector<8xf32>
    %1005 = vector.multi_reduction <add>, %1004, %cst_410 [1] : vector<8x32xf32> to vector<8xf32>
    %1006 = vector.shape_cast %1005 : vector<8xf32> to vector<8x1xf32>
    %cst_411 = arith.constant 3.200000e+01 : f32
    %1007 = vector.broadcast %cst_411 : f32 to vector<8x1xf32>
    %1008 = arith.divf %1006, %1007 : vector<8x1xf32>
    %1009 = vector.broadcast %1001 : vector<8x1xf32> to vector<8x32xf32>
    %1010 = arith.subf %985, %1009 : vector<8x32xf32>
    %1011 = vector.broadcast %996 : vector<1x32xf32> to vector<8x32xf32>
    %1012 = arith.mulf %1011, %1010 : vector<8x32xf32>
    %cst_412 = arith.constant 9.99999997E-7 : f32
    %1013 = vector.broadcast %cst_412 : f32 to vector<8x1xf32>
    %1014 = arith.addf %1008, %1013 : vector<8x1xf32>
    %1015 = math.rsqrt %1014 : vector<8x1xf32>
    %1016 = vector.broadcast %1015 : vector<8x1xf32> to vector<8x32xf32>
    %1017 = arith.mulf %1012, %1016 : vector<8x32xf32>
    %1018 = vector.broadcast %997 : vector<1x32xf32> to vector<8x32xf32>
    %1019 = arith.addf %1017, %1018 : vector<8x32xf32>
    %cst_413 = arith.constant dense<0.000000e+00> : vector<8x64xf32>
    %1020 = tpu.matmul %1019, %987, %cst_413 {dimension_numbers = #tpu.dot_dimension_numbers<[1], [0], [0], [1], [0, 0, 1, 1], [], []>} : vector<8x32xf32>, vector<32x64xf32>, vector<8x64xf32> -> vector<8x64xf32>
    %1021 = vector.broadcast %989 : vector<1x64xf32> to vector<8x64xf32>
    %1022 = arith.addf %1020, %1021 : vector<8x64xf32>
    %cst_414 = arith.constant 0.000000e+00 : f32
    %1023 = vector.broadcast %cst_414 : f32 to vector<8x64xf32>
    %1024 = arith.maximumf %1022, %1023 : vector<8x64xf32>
    %cst_415 = arith.constant dense<0.000000e+00> : vector<8x32xf32>
    %1025 = tpu.matmul %1024, %991, %cst_415 {dimension_numbers = #tpu.dot_dimension_numbers<[1], [0], [0], [1], [0, 0, 1, 1], [], []>} : vector<8x64xf32>, vector<64x32xf32>, vector<8x32xf32> -> vector<8x32xf32>
    %1026 = arith.addf %985, %1025 : vector<8x32xf32>
    %1027 = vector.broadcast %993 : vector<1x32xf32> to vector<8x32xf32>
    %1028 = arith.addf %1026, %1027 : vector<8x32xf32>
    %c0_416 = arith.constant 0 : index
    %c0_417 = arith.constant 0 : index
    %1029 = vector.load %arg33[%c0_416, %c0_417] : memref<2x32xf32, #tpu.memory_space<vmem>>, vector<2x32xf32>
    %1030 = vector.extract_strided_slice %1029 {offsets = [0, 0], sizes = [1, 32], strides = [1, 1]} : vector<2x32xf32> to vector<1x32xf32>
    %1031 = vector.extract_strided_slice %1029 {offsets = [1, 0], sizes = [1, 32], strides = [1, 1]} : vector<2x32xf32> to vector<1x32xf32>
    %cst_418 = arith.constant dense<0.000000e+00> : vector<8xf32>
    %1032 = vector.multi_reduction <add>, %1028, %cst_418 [1] : vector<8x32xf32> to vector<8xf32>
    %1033 = vector.shape_cast %1032 : vector<8xf32> to vector<8x1xf32>
    %cst_419 = arith.constant 3.200000e+01 : f32
    %1034 = vector.broadcast %cst_419 : f32 to vector<8x1xf32>
    %1035 = arith.divf %1033, %1034 : vector<8x1xf32>
    %1036 = vector.broadcast %1035 : vector<8x1xf32> to vector<8x32xf32>
    %1037 = arith.subf %1028, %1036 : vector<8x32xf32>
    %1038 = arith.mulf %1037, %1037 : vector<8x32xf32>
    %cst_420 = arith.constant dense<0.000000e+00> : vector<8xf32>
    %1039 = vector.multi_reduction <add>, %1038, %cst_420 [1] : vector<8x32xf32> to vector<8xf32>
    %1040 = vector.shape_cast %1039 : vector<8xf32> to vector<8x1xf32>
    %cst_421 = arith.constant 3.200000e+01 : f32
    %1041 = vector.broadcast %cst_421 : f32 to vector<8x1xf32>
    %1042 = arith.divf %1040, %1041 : vector<8x1xf32>
    %1043 = vector.broadcast %1035 : vector<8x1xf32> to vector<8x32xf32>
    %1044 = arith.subf %1028, %1043 : vector<8x32xf32>
    %1045 = vector.broadcast %1030 : vector<1x32xf32> to vector<8x32xf32>
    %1046 = arith.mulf %1045, %1044 : vector<8x32xf32>
    %cst_422 = arith.constant 9.99999997E-7 : f32
    %1047 = vector.broadcast %cst_422 : f32 to vector<8x1xf32>
    %1048 = arith.addf %1042, %1047 : vector<8x1xf32>
    %1049 = math.rsqrt %1048 : vector<8x1xf32>
    %1050 = vector.broadcast %1049 : vector<8x1xf32> to vector<8x32xf32>
    %1051 = arith.mulf %1046, %1050 : vector<8x32xf32>
    %1052 = vector.broadcast %1031 : vector<1x32xf32> to vector<8x32xf32>
    %1053 = arith.addf %1051, %1052 : vector<8x32xf32>
    %c0_423 = arith.constant 0 : index
    %c0_424 = arith.constant 0 : index
    %c0_425 = arith.constant 0 : index
    %1054 = vector.load %arg34[%c0_423, %c0_424, %c0_425] : memref<1x8x32xf32, #tpu.memory_space<vmem>>, vector<1x8x32xf32>
    %1055 = vector.shape_cast %1054 : vector<1x8x32xf32> to vector<8x32xf32>
    %1056 = vector.shape_cast %1053 : vector<8x32xf32> to vector<1x8x32xf32>
    tpu.vector_store %arg34[%c0_423, %c0_424, %c0_425], %1056 {strides = array<i32>} : memref<1x8x32xf32, #tpu.memory_space<vmem>>, vector<1x8x32xf32>,
    return
  }
  func.func @transform_0(%arg0: i32) -> (i32, i32, i32) {
    %c0_i32 = arith.constant 0 : i32
    %c0_i32_0 = arith.constant 0 : i32
    %c0_i32_1 = arith.constant 0 : i32
    return %arg0, %c0_i32, %c0_i32_0 : i32, i32, i32
  }
  func.func @transform_1(%arg0: i32) -> (i32, i32, i32) {
    %c0_i32 = arith.constant 0 : i32
    %c0_i32_0 = arith.constant 0 : i32
    %c0_i32_1 = arith.constant 0 : i32
    return %arg0, %c0_i32, %c0_i32_0 : i32, i32, i32
  }
  func.func @transform_2(%arg0: i32) -> (i32, i32, i32) {
    %c0_i32 = arith.constant 0 : i32
    %c0_i32_0 = arith.constant 0 : i32
    %c0_i32_1 = arith.constant 0 : i32
    return %arg0, %c0_i32, %c0_i32_0 : i32, i32, i32
  }
  func.func @transform_3(%arg0: i32) -> (i32, i32, i32) {
    %c0_i32 = arith.constant 0 : i32
    %c0_i32_0 = arith.constant 0 : i32
    %c0_i32_1 = arith.constant 0 : i32
    return %arg0, %c0_i32, %c0_i32_0 : i32, i32, i32
  }
  func.func @transform_4(%arg0: i32) -> (i32, i32, i32) {
    %c0_i32 = arith.constant 0 : i32
    %c0_i32_0 = arith.constant 0 : i32
    %c0_i32_1 = arith.constant 0 : i32
    %c0_i32_2 = arith.constant 0 : i32
    return %c0_i32, %c0_i32_0, %c0_i32_1 : i32, i32, i32
  }
  func.func @transform_5(%arg0: i32) -> (i32, i32, i32) {
    %c0_i32 = arith.constant 0 : i32
    %c0_i32_0 = arith.constant 0 : i32
    %c0_i32_1 = arith.constant 0 : i32
    %c0_i32_2 = arith.constant 0 : i32
    return %c0_i32, %c0_i32_0, %c0_i32_1 : i32, i32, i32
  }
  func.func @transform_6(%arg0: i32) -> (i32, i32, i32) {
    %c0_i32 = arith.constant 0 : i32
    %c0_i32_0 = arith.constant 0 : i32
    %c0_i32_1 = arith.constant 0 : i32
    %c0_i32_2 = arith.constant 0 : i32
    return %c0_i32, %c0_i32_0, %c0_i32_1 : i32, i32, i32
  }
  func.func @transform_7(%arg0: i32) -> (i32, i32, i32) {
    %c0_i32 = arith.constant 0 : i32
    %c0_i32_0 = arith.constant 0 : i32
    %c0_i32_1 = arith.constant 0 : i32
    %c0_i32_2 = arith.constant 0 : i32
    return %c0_i32, %c0_i32_0, %c0_i32_1 : i32, i32, i32
  }
  func.func @transform_8(%arg0: i32) -> (i32, i32, i32) {
    %c0_i32 = arith.constant 0 : i32
    %c0_i32_0 = arith.constant 0 : i32
    %c0_i32_1 = arith.constant 0 : i32
    %c0_i32_2 = arith.constant 0 : i32
    return %c0_i32, %c0_i32_0, %c0_i32_1 : i32, i32, i32
  }
  func.func @transform_9(%arg0: i32) -> (i32, i32, i32) {
    %c0_i32 = arith.constant 0 : i32
    %c0_i32_0 = arith.constant 0 : i32
    %c0_i32_1 = arith.constant 0 : i32
    %c0_i32_2 = arith.constant 0 : i32
    return %c0_i32, %c0_i32_0, %c0_i32_1 : i32, i32, i32
  }
  func.func @transform_10(%arg0: i32) -> (i32, i32, i32) {
    %c0_i32 = arith.constant 0 : i32
    %c0_i32_0 = arith.constant 0 : i32
    %c0_i32_1 = arith.constant 0 : i32
    %c0_i32_2 = arith.constant 0 : i32
    return %c0_i32, %c0_i32_0, %c0_i32_1 : i32, i32, i32
  }
  func.func @transform_11(%arg0: i32) -> (i32, i32, i32) {
    %c0_i32 = arith.constant 0 : i32
    %c0_i32_0 = arith.constant 0 : i32
    %c0_i32_1 = arith.constant 0 : i32
    %c0_i32_2 = arith.constant 0 : i32
    return %c0_i32, %c0_i32_0, %c0_i32_1 : i32, i32, i32
  }
  func.func @transform_12(%arg0: i32) -> (i32, i32, i32) {
    %c0_i32 = arith.constant 0 : i32
    %c0_i32_0 = arith.constant 0 : i32
    %c0_i32_1 = arith.constant 0 : i32
    %c0_i32_2 = arith.constant 0 : i32
    return %c0_i32, %c0_i32_0, %c0_i32_1 : i32, i32, i32
  }
  func.func @transform_13(%arg0: i32) -> (i32, i32, i32) {
    %c0_i32 = arith.constant 0 : i32
    %c0_i32_0 = arith.constant 0 : i32
    %c0_i32_1 = arith.constant 0 : i32
    %c0_i32_2 = arith.constant 0 : i32
    return %c0_i32, %c0_i32_0, %c0_i32_1 : i32, i32, i32
  }
  func.func @transform_14(%arg0: i32) -> (i32, i32) {
    %c0_i32 = arith.constant 0 : i32
    %c0_i32_0 = arith.constant 0 : i32
    %c0_i32_1 = arith.constant 0 : i32
    return %c0_i32, %c0_i32_0 : i32, i32
  }
  func.func @transform_15(%arg0: i32) -> (i32, i32, i32) {
    %c0_i32 = arith.constant 0 : i32
    %c0_i32_0 = arith.constant 0 : i32
    %c0_i32_1 = arith.constant 0 : i32
    %c0_i32_2 = arith.constant 0 : i32
    return %c0_i32, %c0_i32_0, %c0_i32_1 : i32, i32, i32
  }
  func.func @transform_16(%arg0: i32) -> (i32, i32, i32) {
    %c0_i32 = arith.constant 0 : i32
    %c0_i32_0 = arith.constant 0 : i32
    %c0_i32_1 = arith.constant 0 : i32
    %c0_i32_2 = arith.constant 0 : i32
    return %c0_i32, %c0_i32_0, %c0_i32_1 : i32, i32, i32
  }
  func.func @transform_17(%arg0: i32) -> (i32, i32, i32) {
    %c0_i32 = arith.constant 0 : i32
    %c0_i32_0 = arith.constant 0 : i32
    %c0_i32_1 = arith.constant 0 : i32
    %c0_i32_2 = arith.constant 0 : i32
    return %c0_i32, %c0_i32_0, %c0_i32_1 : i32, i32, i32
  }
  func.func @transform_18(%arg0: i32) -> (i32, i32, i32) {
    %c0_i32 = arith.constant 0 : i32
    %c0_i32_0 = arith.constant 0 : i32
    %c0_i32_1 = arith.constant 0 : i32
    %c0_i32_2 = arith.constant 0 : i32
    return %c0_i32, %c0_i32_0, %c0_i32_1 : i32, i32, i32
  }
  func.func @transform_19(%arg0: i32) -> (i32, i32, i32) {
    %c0_i32 = arith.constant 0 : i32
    %c0_i32_0 = arith.constant 0 : i32
    %c0_i32_1 = arith.constant 0 : i32
    %c0_i32_2 = arith.constant 0 : i32
    return %c0_i32, %c0_i32_0, %c0_i32_1 : i32, i32, i32
  }
  func.func @transform_20(%arg0: i32) -> (i32, i32, i32) {
    %c0_i32 = arith.constant 0 : i32
    %c0_i32_0 = arith.constant 0 : i32
    %c0_i32_1 = arith.constant 0 : i32
    %c0_i32_2 = arith.constant 0 : i32
    return %c0_i32, %c0_i32_0, %c0_i32_1 : i32, i32, i32
  }
  func.func @transform_21(%arg0: i32) -> (i32, i32, i32) {
    %c0_i32 = arith.constant 0 : i32
    %c0_i32_0 = arith.constant 0 : i32
    %c0_i32_1 = arith.constant 0 : i32
    %c0_i32_2 = arith.constant 0 : i32
    return %c0_i32, %c0_i32_0, %c0_i32_1 : i32, i32, i32
  }
  func.func @transform_22(%arg0: i32) -> (i32, i32, i32) {
    %c0_i32 = arith.constant 0 : i32
    %c0_i32_0 = arith.constant 0 : i32
    %c0_i32_1 = arith.constant 0 : i32
    %c0_i32_2 = arith.constant 0 : i32
    return %c0_i32, %c0_i32_0, %c0_i32_1 : i32, i32, i32
  }
  func.func @transform_23(%arg0: i32) -> (i32, i32, i32) {
    %c0_i32 = arith.constant 0 : i32
    %c0_i32_0 = arith.constant 0 : i32
    %c0_i32_1 = arith.constant 0 : i32
    %c0_i32_2 = arith.constant 0 : i32
    return %c0_i32, %c0_i32_0, %c0_i32_1 : i32, i32, i32
  }
  func.func @transform_24(%arg0: i32) -> (i32, i32, i32) {
    %c0_i32 = arith.constant 0 : i32
    %c0_i32_0 = arith.constant 0 : i32
    %c0_i32_1 = arith.constant 0 : i32
    %c0_i32_2 = arith.constant 0 : i32
    return %c0_i32, %c0_i32_0, %c0_i32_1 : i32, i32, i32
  }
  func.func @transform_25(%arg0: i32) -> (i32, i32, i32) {
    %c0_i32 = arith.constant 0 : i32
    %c0_i32_0 = arith.constant 0 : i32
    %c0_i32_1 = arith.constant 0 : i32
    %c0_i32_2 = arith.constant 0 : i32
    return %c0_i32, %c0_i32_0, %c0_i32_1 : i32, i32, i32
  }
  func.func @transform_26(%arg0: i32) -> (i32, i32, i32) {
    %c0_i32 = arith.constant 0 : i32
    %c0_i32_0 = arith.constant 0 : i32
    %c0_i32_1 = arith.constant 0 : i32
    %c0_i32_2 = arith.constant 0 : i32
    return %c0_i32, %c0_i32_0, %c0_i32_1 : i32, i32, i32
  }
  func.func @transform_27(%arg0: i32) -> (i32, i32, i32) {
    %c0_i32 = arith.constant 0 : i32
    %c0_i32_0 = arith.constant 0 : i32
    %c0_i32_1 = arith.constant 0 : i32
    %c0_i32_2 = arith.constant 0 : i32
    return %c0_i32, %c0_i32_0, %c0_i32_1 : i32, i32, i32
  }
  func.func @transform_28(%arg0: i32) -> (i32, i32, i32) {
    %c0_i32 = arith.constant 0 : i32
    %c0_i32_0 = arith.constant 0 : i32
    %c0_i32_1 = arith.constant 0 : i32
    %c0_i32_2 = arith.constant 0 : i32
    return %c0_i32, %c0_i32_0, %c0_i32_1 : i32, i32, i32
  }
  func.func @transform_29(%arg0: i32) -> (i32, i32, i32) {
    %c0_i32 = arith.constant 0 : i32
    %c0_i32_0 = arith.constant 0 : i32
    %c0_i32_1 = arith.constant 0 : i32
    %c0_i32_2 = arith.constant 0 : i32
    return %c0_i32, %c0_i32_0, %c0_i32_1 : i32, i32, i32
  }
  func.func @transform_30(%arg0: i32) -> (i32, i32, i32) {
    %c0_i32 = arith.constant 0 : i32
    %c0_i32_0 = arith.constant 0 : i32
    %c0_i32_1 = arith.constant 0 : i32
    %c0_i32_2 = arith.constant 0 : i32
    return %c0_i32, %c0_i32_0, %c0_i32_1 : i32, i32, i32
  }
  func.func @transform_31(%arg0: i32) -> (i32, i32, i32) {
    %c0_i32 = arith.constant 0 : i32
    %c0_i32_0 = arith.constant 0 : i32
    %c0_i32_1 = arith.constant 0 : i32
    %c0_i32_2 = arith.constant 0 : i32
    return %c0_i32, %c0_i32_0, %c0_i32_1 : i32, i32, i32
  }
  func.func @transform_32(%arg0: i32) -> (i32, i32) {
    %c0_i32 = arith.constant 0 : i32
    %c0_i32_0 = arith.constant 0 : i32
    %c0_i32_1 = arith.constant 0 : i32
    return %c0_i32, %c0_i32_0 : i32, i32
  }
  func.func @transform_33(%arg0: i32) -> (i32, i32, i32) {
    %c0_i32 = arith.constant 0 : i32
    %c0_i32_0 = arith.constant 0 : i32
    %c0_i32_1 = arith.constant 0 : i32
    return %arg0, %c0_i32, %c0_i32_0 : i32, i32, i32
  }
}

</mosaic_0001>

<bundles_post_ra>
// kernel: encoder_decoder_forward.1
= control target key start
LH: loop header
LB: loop body
LE: loop exit
PB: predicated region body
PF: predicated region fallthrough
CT: control target
= control target key end

     0   :  { %s10012_s6 = smov 1   ;;  %s10013_s10 = smov 2   ;;  %s11270_s0 = inlined_call_operand.smem [shape: u32[34], index: -1, kind: input, shape index: {}] }
   0x1   :  { %s10068_s5 = sld [smem:[%s11270_s0]]   ;;  %s10014_s14 = smov 3  }
   0x2   :  { %s10073_s9 = sld [smem:[%s11270_s0 + %s10012_s6]]   ;;  %s10015_s18 = smov 4  }
   0x3   :  { %s10078_s13 = sld [smem:[%s11270_s0 + %s10013_s10]]   ;;  %s10016_s22 = smov 5  }
   0x4   :  { %s10083_s17 = sld [smem:[%s11270_s0 + %s10014_s14]]   ;;  %s10017_s26 = smov 6  }
   0x5   :  { %s10088_s21 = sld [smem:[%s11270_s0 + %s10015_s18]]   ;;  %s10018_s30 = smov 7  }
   0x6   :  { %s10093_s25 = sld [smem:[%s11270_s0 + %s10016_s22]]   ;;  %s10019_s4 = smov 8  }
   0x7   :  { %11328 = sst [smem:[#allocation5_spill]] %s10068_s5  ;;  %s10020_s10 = smov 9  }
   0x8   :  { %11329 = sst [smem:[#allocation6_spill]] %s10073_s9  ;;  %s10021_s15 = smov 10  }
   0x9   :  { %11330 = sst [smem:[#allocation7_spill]] %s10078_s13  ;;  %s10022_s20 = smov 11  }
   0xa   :  { %11331 = sst [smem:[#allocation8_spill]] %s10083_s17  ;;  %s10024_s1 = smov 13  }
   0xb   :  { %11332 = sst [smem:[#allocation9_spill]] %s10088_s21  ;;  %s10025_s7 = smov 14  }
   0xc   :  { %11333 = sst [smem:[#allocation10_spill]] %s10093_s25  ;;  %s10027_s22 = smov 16  }
   0xd   :  { %s10098_s29 = sld [smem:[%s11270_s0 + %s10017_s26]]   ;;  %s10023_s26 = smov 12  }
   0xe   :  { %s10103_s3 = sld [smem:[%s11270_s0 + %s10018_s30]]   ;;  %s10028_s28 = smov 17  }
   0xf   :  { %s10108_s8 = sld [smem:[%s11270_s0 + %s10019_s4]]  }
  0x10   :  { %s10113_s14 = sld [smem:[%s11270_s0 + %s10020_s10]]  }
  0x11   :  { %s10118_s19 = sld [smem:[%s11270_s0 + %s10021_s15]]   ;;  %s10026_s15 = smov 15  }
  0x12   :  { %s10123_s24 = sld [smem:[%s11270_s0 + %s10022_s20]]  }
  0x13   :  { %11334 = sst [smem:[#allocation11_spill]] %s10098_s29 }
  0x14   :  { %11335 = sst [smem:[#allocation12_spill]] %s10103_s3 }
  0x15   :  { %11336 = sst [smem:[#allocation13_spill]] %s10108_s8 }
  0x16   :  { %11337 = sst [smem:[#allocation14_spill]] %s10113_s14 }
  0x17   :  { %11338 = sst [smem:[#allocation15_spill]] %s10118_s19 }
  0x18   :  { %11339 = sst [smem:[#allocation16_spill]] %s10123_s24 }
  0x19   :  { %s10128_s30 = sld [smem:[%s11270_s0 + %s10023_s26]]  }
  0x1a   :  { %s10133_s6 = sld [smem:[%s11270_s0 + %s10024_s1]]  }
  0x1b   :  { %s10138_s12 = sld [smem:[%s11270_s0 + %s10025_s7]]   ;;  %s10029_s7 = smov 18  }
  0x1c   :  { %s10143_s20 = sld [smem:[%s11270_s0 + %s10026_s15]]   ;;  %s10030_s15 = smov 19  }
  0x1d   :  { %s10148_s27 = sld [smem:[%s11270_s0 + %s10027_s22]]   ;;  %s10031_s22 = smov 20  }
  0x1e   :  { %s10153_s4 = sld [smem:[%s11270_s0 + %s10028_s28]]   ;;  %s10032_s28 = smov 21  }
  0x1f   :  { %11340 = sst [smem:[#allocation17_spill]] %s10128_s30 }
  0x20   :  { %11341 = sst [smem:[#allocation18_spill]] %s10133_s6 }
  0x21   :  { %11342 = sst [smem:[#allocation19_spill]] %s10138_s12 }
  0x22   :  { %11343 = sst [smem:[#allocation20_spill]] %s10143_s20 }
  0x23   :  { %11344 = sst [smem:[#allocation21_spill]] %s10148_s27 }
  0x24   :  { %11345 = sst [smem:[#allocation22_spill]] %s10153_s4 }
  0x25   :  { %s10158_s12 = sld [smem:[%s11270_s0 + %s10029_s7]]   ;;  %s10033_s7 = smov 22  }
  0x26   :  { %s10163_s17 = sld [smem:[%s11270_s0 + %s10030_s15]]   ;;  %s10034_s15 = smov 23  }
  0x27   :  { %s10168_s27 = sld [smem:[%s11270_s0 + %s10031_s22]]   ;;  %s10035_s22 = smov 24  }
  0x28   :  { %s10173_s4 = sld [smem:[%s11270_s0 + %s10032_s28]]   ;;  %s10036_s28 = smov 25  }
  0x29   :  { %s10183_s20 = sld [smem:[%s11270_s0 + %s10034_s15]]   ;;  %s10038_s15 = smov 27  }
  0x2b   :  { %11346 = sst [smem:[#allocation23_spill]] %s10158_s12 }
  0x2c   :  { %s10178_s12 = sld [smem:[%s11270_s0 + %s10033_s7]]   ;;  %s10037_s7 = smov 26  }
  0x2d   :  { %11347 = sst [smem:[#allocation24_spill]] %s10168_s27 }
  0x2e   :  { %11348 = sst [smem:[#allocation25_spill]] %s10173_s4 }
  0x2f   :  { %11350 = sst [smem:[#allocation27_spill]] %s10183_s20 }
  0x30   :  { %s10188_s27 = sld [smem:[%s11270_s0 + %s10035_s22]]   ;;  %s10039_s22 = smov 28  }
  0x31   :  { %s10193_s4 = sld [smem:[%s11270_s0 + %s10036_s28]]   ;;  %s10040_s28 = smov 29  }
  0x32   :  { %11349 = sst [smem:[#allocation26_spill]] %s10178_s12 }
  0x33   :  { %s10198_s12 = sld [smem:[%s11270_s0 + %s10037_s7]]   ;;  %s10041_s7 = smov 30  }
  0x34   :  { %s10203_s20 = sld [smem:[%s11270_s0 + %s10038_s15]]   ;;  %s10042_s15 = smov 31  }
  0x36   :  { %11351 = sst [smem:[#allocation28_spill]] %s10188_s27 }
  0x37   :  { %11352 = sst [smem:[#allocation29_spill]] %s10193_s4 }
  0x38   :  { %s10208_s27 = sld [smem:[%s11270_s0 + %s10039_s22]]   ;;  %s10043_s22 = smov 32  }
  0x39   :  { %11353 = sst [smem:[#allocation30_spill]] %s10198_s12 }
  0x3a   :  { %11354 = sst [smem:[#allocation31_spill]] %s10203_s20 }
  0x3b   :  { %s10213_s4 = sld [smem:[%s11270_s0 + %s10040_s28]]   ;;  %s10044_s28 = smov 33  }
  0x3c   :  { %s10218_s12 = sld [smem:[%s11270_s0 + %s10041_s7]]  }
  0x3d   :  { %s10223_s20 = sld [smem:[%s11270_s0 + %s10042_s15]]  }
  0x3e   :  { %11355 = sst [smem:[#allocation32_spill]] %s10208_s27 }
  0x3f   :  { %s10228_s27 = sld [smem:[%s11270_s0 + %s10043_s22]]  }
  0x41   :  { %11356 = sst [smem:[#allocation33_spill]] %s10213_s4 }
  0x42   :  { %s10233_s4 = sld [smem:[%s11270_s0 + %s10044_s28]]  }
  0x45   :  { %11357 = sst [smem:[#allocation34_spill]] %s10228_s27 }
  0x48   :  { %11358 = sst [smem:[#allocation35_spill]] %s10233_s4 }
  0x49   :  { %72 = vsyncpa [#allocation3], 0 }
  0x4a   :  { %74 = vsyncpa [#allocation3 + $0x1], 0  ;;  %s10235_s7 = smov 0   ;;  %s10237_s10 = smov 0  }
  0x4b   :  { %s10239_s11 = smov 0   ;;  %s10241_s15 = smov 0  }
  0x4c LB: > { %s11359_s30 = sld [smem:[#allocation17_spill]]  ;;  %s10256_s0 = sadd.s32 4294967295, %s10010_s15   ;;  %s10002_s10 = sphi %s10237_s10, %s11426_s10   ;;  %s9998_s7 = sphi %s10235_s7, %s11425_s7   ;;  %s10010_s15 = sphi %s10241_s15, %s11422_s15   ;;  %s10006_s11 = sphi %s10239_s11, %s11424_s11  }
  0x4d   : > { %s11360_s24 = sld [smem:[#allocation16_spill]]  ;;  %s8722_s16 = sadd.s32 4294967294, %s10010_s15  }
  0x4e   : > { %s11361_s19 = sld [smem:[#allocation15_spill]]  ;;  %s10260_s18 = sadd.s32 1, %s10010_s15  }
  0x4f   : > { %s11362_s14 = sld [smem:[#allocation14_spill]]  ;;  %s800_s22 = sadd.s32 1, %s10006_s11 }
  0x50   : > { %s11363_s6 = sld [smem:[#allocation18_spill]]  ;;  %s797_s23 = ssub.s32 %s10010_s15, %s10260_s18 }
  0x51   : > { %s11364_s29 = sld [smem:[#allocation11_spill]]  ;;  %p810_p0 = scmp.ne.s32.totalorder %s10006_s11, %s10002_s10 }
  0x52   : > { %s11365_s3 = sld [smem:[#allocation12_spill]]  ;;  %p798_p1 = scmp.eq.s32.totalorder %s797_s23, 0 }
  0x53   : > { %s11366_s25 = sld [smem:[#allocation10_spill]]  ;;  %p811_p2 = scmp.eq.s32.totalorder %s10256_s0, 1 }
  0x54   : > { %s11367_s21 = sld [smem:[#allocation9_spill]]  ;;  %p816_p3 = scmp.ne.s32.totalorder %s10002_s10, %s9998_s7 }
  0x55   : > { %s11368_s8 = sld [smem:[#allocation13_spill]]  ;;  %p817_p4 = scmp.eq.s32.totalorder %s8722_s16, 1 }
  0x56   : > { %11369 = sst [smem:[#allocation36_spill]] %s9998_s7  ;;  %p10273_p5 = por %p811_p2, %p810_p0 }
  0x57   : > { %11370 = sst [smem:[#allocation37_spill]] %s10006_s11  ;;  %p10277_p6 = por %p817_p4, %p816_p3 }
  0x58   : > { %11371 = sst [smem:[#allocation38_spill]] %s10010_s15  ;;  %p8725_p7 = scmp.ge.s32.totalorder %s10010_s15, 1 }
  0x59   : > { %11372 = sst [smem:[#allocation39_spill]] %s10256_s0  ;;  %p949_p8 = scmp.lt.s32.totalorder %s10010_s15, 3 }
  0x5a   : > { %11373 = sst [smem:[#allocation40_spill]] %s10260_s18 }
  0x5b   : > { %s10271_s26 = scalar_select %p798_p1, %s10006_s11, %s800_s22  }
  0x5c   : > { %s11375_s28 = scalar_select %p10273_p5, 1, 0 }
  0x5d   : > { %11374 = sst [smem:[#allocation41_spill]] %s10271_s26  ;;  %p950_p9 = pnand %p8725_p7, %p949_p8 }
  0x5e   : > { %11376 = sst [smem:[#allocation42_spill]] %s11375_s28  ;;  %p1043_p10 = scmp.lt.s32.totalorder (!%p950_p9), %s10256_s0, 1 }
  0x5f   : > { %s11377_s1 = scalar_select %p10277_p6, 1, 0 }
  0x60   : > { %953 = sbr.rel (%p950_p9) target bundleno = 20567 (0x5057), region = 152  ;;  %s11379_s5 = sld [smem:[#allocation5_spill]] (!%p950_p9) }
  0x61   : > { %11378 = sst [smem:[#allocation43_spill]] %s11377_s1  ;;  %s11285_s23 = smov (!%p950_p9), 64  }
  0x62   : > { %s11380_s13 = sld [smem:[#allocation7_spill]] (!%p950_p9)  ;;  %s11391_s26 = smov (!%p950_p9), 104  }
  0x63   : > { %s11392_s11 = smov (!%p950_p9), 72   ;;  %s11394_s9 = sld [smem:[#allocation6_spill]] (!%p950_p9) }
  0x64   : > { %s11405_s18 = sld [smem:[#allocation25_spill]] (!%p950_p9) }
  0x65   : > { %s10285_s2 = scalar_select %p1043_p10, %s10256_s0, 1  ;;  %vm1073_vm0 = vcmask 261120   ;;  %v1065_v7 = vld [vmem:[%s11367_s21 + $0x18] sm:$0xff]  ;;  %v10045_v8 = vmov 0.0   ;;  %v1064_v9 = vld [vmem:[%s11367_s21 + $0x10] sm:$0xff]  ;;  %vm10046_vm1 = vmmov 0   ;;  %v1085_v13 = vlaneseq }
  0x66   : > { %9176 = vmatprep.subr.mxu0 %v10045_v8  ;;  %9184 = vmatprep.mubr.msk.f32.mxu0 %vm10046_vm1, %v10045_v8  ;;  %v1063_v10 = vld [vmem:[%s11367_s21 + $0x8] sm:$0xff]  ;;  %v1062_v11 = vld [vmem:[%s11367_s21] sm:$0xff]  ;;  %vm1180_vm2 = vcmask 64512   ;;  %v10049_v33 = vmov 0   ;;  %vm2269_vm5 = vcmask 523264   ;;  %s11406_s1 = sld [smem:[#allocation28_spill]] }
  0x67   : > { %s10288_s16 = sshll.u32 %s10285_s2, 3  ;;  %9177 = vmatpush3.msra.mxu0 %v1065_v7  ;;  %9192 = vmatprep.subr.mxu1 %v10045_v8  ;;  %v1086_v16 = vshrl.u32 %v1085_v13, 7  ;;  %v1072_v18 = vld [vmem:[%s11368_s8] sm:$0x3]  ;;  %s11407_s7 = sld [smem:[#allocation29_spill]] }
  0x68   : > { %s1046_s22 = scalar_lea.vmem %s11379_s5, %s10288_s16  ;;  %9178 = vmatprep.subr.mxu0 %v10045_v8  ;;  %9194 = vmatprep.mubr.msk.f32.mxu1 %vm10046_vm1, %v10045_v8  ;;  %v8730_v26 = vld [vmem:[%s11366_s25] ss:$0 sm:$0xff]  ;;  %s11386_s5 = smov 64  }
  0x69   : > { %v10292_v0 = vld [vmem:[%s1046_s22] sm:$0xff]  ;;  %9179 = vmatpush3.msra.mxu0 %v1064_v9  ;;  %v10312_v17 = vsub.s32 0, %v1086_v16  ;;  %v10316_v20 = vsub.s32 1, %v1086_v16  ;;  %s11291_s22 = smov 96   ;;  %s11411_s15 = sld [smem:[#allocation33_spill]] }
  0x6a   : > { %v1074_v1 = vsel %vm1073_vm0, %v10292_v0, 0.0  ;;  %9180 = vmatprep.subr.mxu0 %v10045_v8  ;;  %v1067_v51 = vld [vmem:[%s11364_s29] sm:$0xff] }
  0x6b   : > { %1075 = vadd.xlane.f32.xlu0 %v1074_v1  ;;  %9181 = vmatpush3.msra.mxu0 %v1063_v10  ;;  %v1088_v19 = vrot.slane %v1072_v18, %v10312_v17  ;;  %v1096_v22 = vrot.slane %v1072_v18, %v10316_v20 }
  0x6c   : > { %9182 = vmatprep.subr.mxu0 %v10045_v8 }
  0x6d   : > { %9183 = vmatpush3.msra.mxu0 %v1062_v11  ;;  %s11408_s28 = smov %s11407_s7 }
  0x6e   : > { %9187 = vmatprep.subr.mxu0 %v10045_v8 }
  0x6f   : > { %s11412_s0 = smov %s11411_s15 }
  0xf4   : > { %v1076_v2 = vpop.xlane.xlu0 %1075 }
  0xf5   : > { %v1078_v3 = vmul.f32 0.03125, %v1076_v2  ;;  %v1068_v2 = vld [vmem:[%s11364_s29 + $0x8] sm:$0xff] }
  0xf7   : > { %v1079_v4 = vsub.f32 %v10292_v0, %v1078_v3 }
  0xf9   : > { %v1080_v5 = vmul.f32 %v1079_v4, %v1079_v4  ;;  %v1089_v21 = vmul.f32 %v1088_v19, %v1079_v4 }
  0xfb   : > { %v1081_v6 = vsel %vm1073_vm0, %v1080_v5, 0.0 }
  0xfc   : > { %1082 = vadd.xlane.f32.xlu0 %v1081_v6 }
 0x185   : > { %v1083_v12 = vpop.xlane.xlu0 %1082 }
 0x186   : > { %v1084_v14 = vmul.f32 0.03125, %v1083_v12 }
 0x188   : > { %v1090_v15 = vadd.f32 1e-06, %v1084_v14 }
 0x18a   : > { %9830 = vrsqrt.f32 %v1090_v15 }
 0x197   : > { %v9831_v23 = vpop.eup %9830 }
 0x198   : > { %v1092_v24 = vmul.f32 %v9831_v23, %v1089_v21 }
 0x19a   : > { %v1097_v25 = vadd.f32 %v1096_v22, %v1092_v24  ;;  %v8736_v24 = vld [vmem:[%s11365_s3] ss:$0 sm:$0xff] }
 0x19c   : > { %9185 = vmatmul.mubr.msk.f32.vlgmr.msra.gmra.mxu0 %vm1073_vm0, %v1097_v25 }
 0x19d   : > { %9189 = vmatprep.mubr.msk.f32.mxu0 %vm10046_vm1, %v10045_v8 }
 0x25c   : > { %v1173_v27 = vpop.f32.mrf.mxu0 }
 0x25d   : > { %v10323_v28 = vadd.f32 %v8730_v26, %v1173_v27 }
 0x25e   : > { %v9186_v29 = vpop.f32.mrf.mxu0 }
 0x25f   : > { %1274 = vrot.lane.b32.xlu0 %v10323_v28, %s11285_s23  ;;  %1178 = vrot.lane.b32.xlu1 %v10323_v28, %s11291_s22  ;;  %s1053_s23 = scalar_lea.vmem %s11380_s13, %s10285_s2  ;;  %s11289_s2 = smov 88  }
 0x260   : > { %v1060_v32 = vld [vmem:[%s1053_s23] sm:$0x1]  ;;  %s11287_s23 = smov 120   ;;  %s11305_s22 = smov 112  }
 0x261   : > { %vm1255_vm3 = vcmp.gt.f32.partialorder %v1060_v32, 0.5  ;;  %s11388_s13 = smov 112  }
 0x262   : > { %v1256_v34 = vsel %vm1255_vm3, 1, %v10049_v33 }
 0x263   : > { %v1260_v35 = vrot.slane %v1256_v34, %v10312_v17 }
 0x265   : > { %vm10339_vm4 = vcmp.eq.s32.totalorder %v1260_v35, 1  ;;  %v1069_v35 = vld [vmem:[%s11364_s29 + $0x10] sm:$0xff] }
 0x2d1   : > { %v1275_v30 = vpop.permute.xlu0 %1274  ;;  %v1179_v31 = vpop.permute.xlu1 %1178 }
 0x2d2   : > { %9188 = vmatpush3.xpose.msk.msra.mxu0 %vm1180_vm2, %v1179_v31  ;;  %9193 = vmatpush3.msra.mxu1 %v1275_v30 }
 0x2d3   : > { %9202 = vmatprep.subr.mxu1 %v10045_v8  ;;  %9197 = vmatprep.subr.mxu0 %v10045_v8 }
 0x2d5   : > { %9190 = vmatmul.mubr.msk.f32.vlgmr.msra.gmra.mxu0 %vm1180_vm2, %v10323_v28 }
 0x2d6   : > { %9199 = vmatprep.mubr.msk.f32.mxu0 %vm10046_vm1, %v10045_v8  ;;  %9198 = vmatpush3.msra.mxu0 %v1067_v51 }
 0x2d7   : > { %9207 = vmatprep.subr.mxu0 %v10045_v8 }
 0x395   : > { %v1251_v37 = vpop.f32.mrf.mxu0 }
 0x396   : > { %v1262_v38 = vsel %vm10339_vm4, %v1251_v37, -1e+09 }
 0x397   : > { %v9191_v39 = vpop.f32.mrf.mxu0  ;;  %v1263_v40 = vsel %vm1180_vm2, %v1262_v38, -inf }
 0x398   : > { %1264 = vmax.xlane.f32.xlu1 %v1263_v40 }
 0x421   : > { %v1265_v41 = vpop.xlane.xlu1 %1264 }
 0x422   : > { %v1266_v42 = vsub.f32 %v1262_v38, %v1265_v41 }
 0x424   : > { %v1267_v43 = vmul.f32 1.442695, %v1266_v42 }
 0x426   : > { %9832 = vpow2.f32 %v1267_v43 }
 0x433   : > { %v9833_v44 = vpop.eup %9832 }
 0x434   : > { %v1269_v45 = vsel %vm1180_vm2, %v9833_v44, 0.0 }
 0x435   : > { %1270 = vadd.xlane.f32.xlu0 %v1269_v45 }
 0x44b   : > { %1432 = vrot.lane.b32.xlu0 %v10323_v28, %s11289_s2  ;;  %s11297_s2 = smov 80  }
 0x44f   : > { %1430 = vrot.lane.b32.xlu0 %v10323_v28, %s11287_s23  ;;  %s11293_s23 = smov 56  }
 0x4be   : > { %v1271_v46 = vpop.xlane.xlu0 %1270 }
 0x4bf   : > { %9834 = vrcp.f32 %v1271_v46 }
 0x4c2   : > { %v1433_v48 = vpop.permute.xlu0 %1432 }
 0x4c6   : > { %v1431_v50 = vpop.permute.xlu0 %1430 }
 0x4cc   : > { %v9835_v47 = vpop.eup %9834 }
 0x4cd   : > { %v1273_v49 = vmul.f32 %v9835_v47, %v9833_v44 }
 0x4cf   : > { %9195 = vmatmul.mubr.msk.f32.vlgmr.msra.gmra.mxu1 %vm1180_vm2, %v1273_v49  ;;  %v1070_v49 = vld [vmem:[%s11364_s29 + $0x18] sm:$0xff] }
 0x4d0   : > { %9203 = vmatpush3.xpose.msk.msra.mxu1 %vm1180_vm2, %v1433_v48  ;;  %9204 = vmatprep.mubr.msk.f32.mxu1 %vm10046_vm1, %v10045_v8 }
 0x4d1   : > { %9212 = vmatprep.subr.mxu1 %v10045_v8 }
 0x4d3   : > { %9205 = vmatmul.mubr.msk.f32.vlgmr.msra.gmra.mxu1 %vm1180_vm2, %v1431_v50 }
 0x4d4   : > { %9214 = vmatprep.mubr.msk.f32.mxu1 %vm10046_vm1, %v10045_v8  ;;  %9213 = vmatpush3.msra.mxu1 %v1068_v2 }
 0x4d5   : > { %9222 = vmatprep.subr.mxu1 %v10045_v8 }
 0x58f   : > { %v1346_v52 = vpop.f32.mrf.mxu1 }
 0x590   : > { %9200 = vmatmul.mubr.msk.f32.vlgmr.msra.gmra.mxu0 %vm1180_vm2, %v1346_v52 }
 0x591   : > { %v9196_v53 = vpop.f32.mrf.mxu1  ;;  %9209 = vmatprep.mubr.msk.f32.mxu0 %vm10046_vm1, %v10045_v8 }
 0x593   : > { %v1504_v54 = vpop.f32.mrf.mxu1 }
 0x594   : > { %v1508_v55 = vsel %vm10339_vm4, %v1504_v54, -1e+09 }
 0x595   : > { %v9206_v56 = vpop.f32.mrf.mxu1  ;;  %v1509_v57 = vsel %vm1180_vm2, %v1508_v55, -inf }
 0x596   : > { %1510 = vmax.xlane.f32.xlu1 %v1509_v57 }
 0x5a7   : > { %1520 = vrot.lane.b32.xlu1 %v10323_v28, %s11293_s23  ;;  %s11295_s23 = smov 48  }
 0x5ab   : > { %1672 = vrot.lane.b32.xlu1 %v10323_v28, %s11297_s2  ;;  %s11303_s2 = smov 104  }
 0x5af   : > { %1670 = vrot.lane.b32.xlu1 %v10323_v28, %s11305_s22  ;;  %s11385_s22 = smov 120  }
 0x61f   : > { %v1511_v58 = vpop.xlane.xlu1 %1510 }
 0x620   : > { %v1512_v59 = vsub.f32 %v1508_v55, %v1511_v58 }
 0x622   : > { %v1513_v60 = vmul.f32 1.442695, %v1512_v59 }
 0x623   : > { %v1521_v61 = vpop.permute.xlu1 %1520 }
 0x624   : > { %9836 = vpow2.f32 %v1513_v60  ;;  %9208 = vmatpush3.msra.mxu0 %v1521_v61 }
 0x625   : > { %9217 = vmatprep.subr.mxu0 %v10045_v8 }
 0x627   : > { %v1673_v6 = vpop.permute.xlu1 %1672 }
 0x62b   : > { %v1671_v9 = vpop.permute.xlu1 %1670 }
 0x631   : > { %v9837_v62 = vpop.eup %9836 }
 0x632   : > { %v1515_v63 = vsel %vm1180_vm2, %v9837_v62, 0.0 }
 0x633   : > { %1516 = vadd.xlane.f32.xlu0 %v1515_v63 }
 0x649   : > { %1760 = vrot.lane.b32.xlu0 %v10323_v28, %s11295_s23  ;;  %s11299_s23 = smov 72  }
 0x650   : > { %v1419_v1 = vpop.f32.mrf.mxu0 }
 0x651   : > { %v1429_v25 = vadd.f32 %v8736_v24, %v1419_v1 }
 0x652   : > { %v9201_v3 = vpop.f32.mrf.mxu0 }
 0x6bc   : > { %v1517_v4 = vpop.xlane.xlu0 %1516 }
 0x6bd   : > { %9838 = vrcp.f32 %v1517_v4  ;;  %v2154_v4 = vld [vmem:[%s11362_s14 + $0x18] sm:$0xff] }
 0x6c0   : > { %v1761_v11 = vpop.permute.xlu0 %1760 }
 0x6ca   : > { %v9839_v5 = vpop.eup %9838 }
 0x6cb   : > { %v1519_v7 = vmul.f32 %v9839_v5, %v9837_v62  ;;  %v2153_v5 = vld [vmem:[%s11362_s14 + $0x10] sm:$0xff] }
 0x6cd   : > { %9210 = vmatmul.mubr.msk.f32.vlgmr.msra.gmra.mxu0 %vm1180_vm2, %v1519_v7  ;;  %v2163_v7 = vld [vmem:[%s11360_s24 + $0x38] sm:$0xff] }
 0x6ce   : > { %9218 = vmatpush3.xpose.msk.msra.mxu0 %vm1180_vm2, %v1673_v6  ;;  %9219 = vmatprep.mubr.msk.f32.mxu0 %vm10046_vm1, %v10045_v8  ;;  %v2151_v6 = vld [vmem:[%s11362_s14] sm:$0xff] }
 0x6cf   : > { %9227 = vmatprep.subr.mxu0 %v10045_v8 }
 0x6d1   : > { %9220 = vmatmul.mubr.msk.f32.vlgmr.msra.gmra.mxu0 %vm1180_vm2, %v1671_v9  ;;  %v2162_v9 = vld [vmem:[%s11360_s24 + $0x30] sm:$0xff] }
 0x6d2   : > { %9229 = vmatprep.mubr.msk.f32.mxu0 %vm10046_vm1, %v10045_v8  ;;  %9228 = vmatpush3.msra.mxu0 %v1069_v35 }
 0x6d3   : > { %9237 = vmatprep.subr.mxu0 %v10045_v8 }
 0x78d   : > { %v1592_v10 = vpop.f32.mrf.mxu0 }
 0x78e   : > { %9215 = vmatmul.mubr.msk.f32.vlgmr.msra.gmra.mxu1 %vm1180_vm2, %v1592_v10  ;;  %v2161_v10 = vld [vmem:[%s11360_s24 + $0x28] sm:$0xff] }
 0x78f   : > { %9223 = vmatpush3.msra.mxu1 %v1761_v11  ;;  %v9211_v12 = vpop.f32.mrf.mxu0  ;;  %9224 = vmatprep.mubr.msk.f32.mxu1 %vm10046_vm1, %v10045_v8  ;;  %v2160_v11 = vld [vmem:[%s11360_s24 + $0x20] sm:$0xff] }
 0x790   : > { %9232 = vmatprep.subr.mxu1 %v10045_v8  ;;  %v2159_v12 = vld [vmem:[%s11360_s24 + $0x18] sm:$0xff] }
 0x791   : > { %v1744_v13 = vpop.f32.mrf.mxu0 }
 0x792   : > { %v1748_v14 = vsel %vm10339_vm4, %v1744_v13, -1e+09 }
 0x793   : > { %v9221_v15 = vpop.f32.mrf.mxu0  ;;  %v1749_v16 = vsel %vm1180_vm2, %v1748_v14, -inf }
 0x794   : > { %1750 = vmax.xlane.f32.xlu1 %v1749_v16  ;;  %v2165_v16 = vld [vmem:[%s11363_s6] sm:$0x3] }
 0x81d   : > { %v1751_v18 = vpop.xlane.xlu1 %1750 }
 0x81e   : > { %v1752_v19 = vsub.f32 %v1748_v14, %v1751_v18  ;;  %v2179_v18 = vrot.slane %v2165_v16, %v10312_v17 }
 0x820   : > { %v1753_v21 = vmul.f32 1.442695, %v1752_v19  ;;  %v2187_v19 = vrot.slane %v2165_v16, %v10316_v20  ;;  %v8758_v16 = vld [vmem:[%s11364_s29 + $0x20] sm:$0xff] }
 0x822   : > { %9840 = vpow2.f32 %v1753_v21 }
 0x82f   : > { %v9841_v22 = vpop.eup %9840 }
 0x830   : > { %v1755_v23 = vsel %vm1180_vm2, %v9841_v22, 0.0 }
 0x831   : > { %1756 = vadd.xlane.f32.xlu0 %v1755_v23 }
 0x847   : > { %1912 = vrot.lane.b32.xlu0 %v10323_v28, %s11299_s23  ;;  %s11301_s23 = smov 40  }
 0x84b   : > { %1910 = vrot.lane.b32.xlu0 %v10323_v28, %s11303_s2  ;;  %s11384_s2 = smov 88  }
 0x84e   : > { %v1665_v26 = vpop.f32.mrf.mxu1 }
 0x84f   : > { %v1669_v27 = vadd.f32 %v1665_v26, %v1429_v25  ;;  %v2158_v25 = vld [vmem:[%s11360_s24 + $0x10] sm:$0xff]  ;;  %v2157_v26 = vld [vmem:[%s11360_s24 + $0x8] sm:$0xff] }
 0x850   : > { %v9216_v29 = vpop.f32.mrf.mxu1 }
 0x851   : > { %v8749_v29 = vld [vmem:[%s11361_s19] ss:$0 sm:$0xff] }
 0x8ba   : > { %v1757_v30 = vpop.xlane.xlu0 %1756 }
 0x8bb   : > { %9842 = vrcp.f32 %v1757_v30 }
 0x8be   : > { %v1913_v32 = vpop.permute.xlu0 %1912 }
 0x8c2   : > { %v1911_v34 = vpop.permute.xlu0 %1910 }
 0x8c8   : > { %v9843_v31 = vpop.eup %9842 }
 0x8c9   : > { %v1759_v33 = vmul.f32 %v9843_v31, %v9841_v22 }
 0x8cb   : > { %9225 = vmatmul.mubr.msk.f32.vlgmr.msra.gmra.mxu1 %vm1180_vm2, %v1759_v33 }
 0x8cc   : > { %9233 = vmatpush3.xpose.msk.msra.mxu1 %vm1180_vm2, %v1913_v32  ;;  %9234 = vmatprep.mubr.msk.f32.mxu1 %vm10046_vm1, %v10045_v8 }
 0x8cd   : > { %9242 = vmatprep.subr.mxu1 %v10045_v8 }
 0x8cf   : > { %9235 = vmatmul.mubr.msk.f32.vlgmr.msra.gmra.mxu1 %vm1180_vm2, %v1911_v34  ;;  %v8752_v34 = vld [vmem:[%s11359_s30] ss:$0 sm:$0xff] }
 0x8d0   : > { %9244 = vmatprep.mubr.msk.f32.mxu1 %vm10046_vm1, %v10045_v8  ;;  %9243 = vmatpush3.msra.mxu1 %v1070_v49  ;;  %v8753_v49 = vld [vmem:[%s11367_s21 + $0x20] sm:$0xff] }
 0x8d1   : > { %9258 = vmatprep.subr.mxu1 %v10045_v8 }
 0x98b   : > { %v1832_v37 = vpop.f32.mrf.mxu1 }
 0x98c   : > { %9230 = vmatmul.mubr.msk.f32.vlgmr.msra.gmra.mxu0 %vm1180_vm2, %v1832_v37 }
 0x98d   : > { %v9226_v38 = vpop.f32.mrf.mxu1  ;;  %9239 = vmatprep.mubr.msk.f32.mxu0 %vm10046_vm1, %v10045_v8 }
 0x98f   : > { %v1984_v39 = vpop.f32.mrf.mxu1 }
 0x990   : > { %v1988_v40 = vsel %vm10339_vm4, %v1984_v39, -1e+09 }
 0x991   : > { %v9236_v41 = vpop.f32.mrf.mxu1  ;;  %v1989_v42 = vsel %vm1180_vm2, %v1988_v40, -inf }
 0x992   : > { %1990 = vmax.xlane.f32.xlu1 %v1989_v42 }
 0x9a3   : > { %2000 = vrot.lane.b32.xlu1 %v10323_v28, %s11301_s23  ;;  %s11383_s23 = smov 96  }
 0xa1b   : > { %v1991_v43 = vpop.xlane.xlu1 %1990 }
 0xa1c   : > { %v1992_v44 = vsub.f32 %v1988_v40, %v1991_v43 }
 0xa1e   : > { %v1993_v45 = vmul.f32 1.442695, %v1992_v44 }
 0xa1f   : > { %v2001_v46 = vpop.permute.xlu1 %2000 }
 0xa20   : > { %9844 = vpow2.f32 %v1993_v45  ;;  %9238 = vmatpush3.msra.mxu0 %v2001_v46  ;;  %v8756_v46 = vld [vmem:[%s11367_s21 + $0x38] sm:$0xff] }
 0xa21   : > { %9247 = vmatprep.subr.mxu0 %v10045_v8 }
 0xa2d   : > { %v9845_v47 = vpop.eup %9844 }
 0xa2e   : > { %v1995_v48 = vsel %vm1180_vm2, %v9845_v47, 0.0 }
 0xa2f   : > { %1996 = vadd.xlane.f32.xlu0 %v1995_v48  ;;  %v8754_v48 = vld [vmem:[%s11367_s21 + $0x28] sm:$0xff] }
 0xa4c   : > { %v1905_v50 = vpop.f32.mrf.mxu0 }
 0xa4d   : > { %v1909_v51 = vadd.f32 %v1905_v50, %v1669_v27  ;;  %v2156_v27 = vld [vmem:[%s11360_s24] sm:$0xff] }
 0xa4e   : > { %v9231_v52 = vpop.f32.mrf.mxu0 }
 0xab8   : > { %v1997_v28 = vpop.xlane.xlu0 %1996 }
 0xab9   : > { %9846 = vrcp.f32 %v1997_v28  ;;  %v8763_v28 = vld [vmem:[%s11368_s8 + $0x2] sm:$0x3]  ;;  %s11387_s8 = smov 56  }
 0xac6   : > { %v9847_v53 = vpop.eup %9846 }
 0xac7   : > { %v1999_v54 = vmul.f32 %v9847_v53, %v9845_v47  ;;  %v8755_v47 = vld [vmem:[%s11367_s21 + $0x30] sm:$0xff]  ;;  %v2380_v53 = vrot.slane %v8763_v28, %v10312_v17  ;;  %s11389_s21 = smov 80  }
 0xac9   : > { %9240 = vmatmul.mubr.msk.f32.vlgmr.msra.gmra.mxu0 %vm1180_vm2, %v1999_v54  ;;  %v2388_v54 = vrot.slane %v8763_v28, %v10316_v20 }
 0xaca   : > { %9255 = vmatprep.mubr.msk.f32.mxu0 %vm10046_vm1, %v10045_v8  ;;  %9248 = vmatpush3.msra.mxu0 %v2154_v4 }
 0xacb   : > { %9249 = vmatprep.subr.mxu0 %v10045_v8 }
 0xacc   : > { %9250 = vmatpush3.msra.mxu0 %v2153_v5 }
 0xacd   : > { %9251 = vmatprep.subr.mxu0 %v10045_v8 }
 0xb89   : > { %v2072_v55 = vpop.f32.mrf.mxu0 }
 0xb8a   : > { %9245 = vmatmul.mubr.msk.f32.vlgmr.msra.gmra.mxu1 %vm1180_vm2, %v2072_v55 }
 0xb8b   : > { %v9241_v56 = vpop.f32.mrf.mxu0  ;;  %9274 = vmatprep.mubr.msk.f32.mxu1 %vm10046_vm1, %v10045_v8  ;;  %9259 = vmatpush3.msra.mxu1 %v2163_v7 }
 0xb8c   : > { %9260 = vmatprep.subr.mxu1 %v10045_v8 }
 0xb8d   : > { %9261 = vmatpush3.msra.mxu1 %v2162_v9 }
 0xb8e   : > { %9262 = vmatprep.subr.mxu1 %v10045_v8 }
 0xb8f   : > { %9263 = vmatpush3.msra.mxu1 %v2161_v10 }
 0xb90   : > { %9264 = vmatprep.subr.mxu1 %v10045_v8 }
 0xb91   : > { %9265 = vmatpush3.msra.mxu1 %v2160_v11 }
 0xb92   : > { %9266 = vmatprep.subr.mxu1 %v10045_v8 }
 0xb93   : > { %9267 = vmatpush3.msra.mxu1 %v2159_v12 }
 0xb94   : > { %9268 = vmatprep.subr.mxu1 %v10045_v8 }
 0xb95   : > { %9269 = vmatpush3.msra.mxu1 %v2158_v25 }
 0xb96   : > { %9270 = vmatprep.subr.mxu1 %v10045_v8 }
 0xb97   : > { %9271 = vmatpush3.msra.mxu1 %v2157_v26 }
 0xb98   : > { %9272 = vmatprep.subr.mxu1 %v10045_v8 }
 0xb99   : > { %9273 = vmatpush3.msra.mxu1 %v2156_v27 }
 0xb9a   : > { %9293 = vmatprep.subr.mxu1 %v10045_v8 }
 0xc4a   : > { %v2145_v57 = vpop.f32.mrf.mxu1 }
 0xc4b   : > { %v2149_v58 = vadd.f32 %v2145_v57, %v1909_v51 }
 0xc4c   : > { %v9246_v59 = vpop.f32.mrf.mxu1 }
 0xc4d   : > { %v10429_v60 = vadd.f32 %v2149_v58, %v10292_v0  ;;  %v2152_v0 = vld [vmem:[%s11362_s14 + $0x8] sm:$0xff]  ;;  %v8764_v59 = vld [vmem:[%s11366_s25 + $0x1] ss:$0 sm:$0xff]  ;;  %s11390_s25 = smov 48  }
 0xc4e   : > { %9252 = vmatpush3.msra.mxu0 %v2152_v0 }
 0xc4f   : > { %v2166_v61 = vsel %vm1073_vm0, %v10429_v60, 0.0  ;;  %9253 = vmatprep.subr.mxu0 %v10045_v8 }
 0xc50   : > { %2167 = vadd.xlane.f32.xlu1 %v2166_v61  ;;  %9254 = vmatpush3.msra.mxu0 %v2151_v6 }
 0xc51   : > { %9277 = vmatprep.subr.mxu0 %v10045_v8 }
 0xcd9   : > { %v2168_v62 = vpop.xlane.xlu1 %2167 }
 0xcda   : > { %v2169_v63 = vmul.f32 0.03125, %v2168_v62 }
 0xcdc   : > { %v2170_v1 = vsub.f32 %v10429_v60, %v2169_v63 }
 0xcde   : > { %v2171_v2 = vmul.f32 %v2170_v1, %v2170_v1  ;;  %v2180_v21 = vmul.f32 %v2179_v18, %v2170_v1 }
 0xce0   : > { %v2172_v3 = vsel %vm1073_vm0, %v2171_v2, 0.0 }
 0xce1   : > { %2173 = vadd.xlane.f32.xlu0 %v2172_v3 }
 0xd6a   : > { %v2174_v13 = vpop.xlane.xlu0 %2173 }
 0xd6b   : > { %v2175_v14 = vmul.f32 0.03125, %v2174_v13 }
 0xd6d   : > { %v2181_v15 = vadd.f32 1e-06, %v2175_v14 }
 0xd6f   : > { %9848 = vrsqrt.f32 %v2181_v15 }
 0xd7c   : > { %v9849_v22 = vpop.eup %9848 }
 0xd7d   : > { %v2183_v23 = vmul.f32 %v9849_v22, %v2180_v21 }
 0xd7f   : > { %v2188_v24 = vadd.f32 %v2187_v19, %v2183_v23 }
 0xd81   : > { %9256 = vmatmul.mubr.msk.f32.vlgmr.msra.gmra.mxu0 %vm1073_vm0, %v2188_v24 }
 0xd82   : > { %9285 = vmatprep.mubr.msk.f32.mxu0 %vm10046_vm1, %v10045_v8  ;;  %9278 = vmatpush3.msra.mxu0 %v8756_v46 }
 0xd83   : > { %9279 = vmatprep.subr.mxu0 %v10045_v8 }
 0xd84   : > { %9280 = vmatpush3.msra.mxu0 %v8755_v47 }
 0xd85   : > { %9281 = vmatprep.subr.mxu0 %v10045_v8 }
 0xd86   : > { %9282 = vmatpush3.msra.mxu0 %v8754_v48 }
 0xd87   : > { %9283 = vmatprep.subr.mxu0 %v10045_v8 }
 0xd88   : > { %9284 = vmatpush3.msra.mxu0 %v8753_v49 }
 0xd89   : > { %9288 = vmatprep.subr.mxu0 %v10045_v8 }
 0xe41   : > { %v2264_v30 = vpop.f32.mrf.mxu0 }
 0xe42   : > { %v2265_v31 = vadd.f32 %v8749_v29, %v2264_v30 }
 0xe43   : > { %v9257_v32 = vpop.f32.mrf.mxu0 }
 0xe44   : > { %v2268_v33 = vmax.f32 %v2265_v31, 0.0 }
 0xe46   : > { %9275 = vmatmul.mubr.msk.f32.vlgmr.msra.gmra.mxu1 %vm2269_vm5, %v2268_v33 }
 0xe47   : > { %9295 = vmatprep.mubr.msk.f32.mxu1 %vm10046_vm1, %v10045_v8 }
 0xf06   : > { %v2339_v35 = vpop.f32.mrf.mxu1 }
 0xf07   : > { %v2343_v37 = vadd.f32 %v2339_v35, %v10429_v60 }
 0xf08   : > { %v9276_v38 = vpop.f32.mrf.mxu1 }
 0xf09   : > { %v10471_v39 = vadd.f32 %v8752_v34, %v2343_v37 }
 0xf0b   : > { %v2367_v40 = vsel %vm1073_vm0, %v10471_v39, 0.0 }
 0xf0c   : > { %2368 = vadd.xlane.f32.xlu0 %v2367_v40 }
 0xf95   : > { %v2369_v41 = vpop.xlane.xlu0 %2368 }
 0xf96   : > { %v2370_v42 = vmul.f32 0.03125, %v2369_v41  ;;  %v8759_v41 = vld [vmem:[%s11364_s29 + $0x28] sm:$0xff] }
 0xf98   : > { %v2371_v43 = vsub.f32 %v10471_v39, %v2370_v42 }
 0xf9a   : > { %v2372_v44 = vmul.f32 %v2371_v43, %v2371_v43  ;;  %v2381_v55 = vmul.f32 %v2380_v53, %v2371_v43  ;;  %v8770_v53 = vld [vmem:[%s11365_s3 + $0x1] ss:$0 sm:$0xff]  ;;  %s11393_s3 = smov 40  }
 0xf9c   : > { %v2373_v45 = vsel %vm1073_vm0, %v2372_v44, 0.0 }
 0xf9d   : > { %2374 = vadd.xlane.f32.xlu0 %v2373_v45 }
0x1026   : > { %v2375_v50 = vpop.xlane.xlu0 %2374 }
0x1027   : > { %v2376_v51 = vmul.f32 0.03125, %v2375_v50 }
0x1029   : > { %v2382_v52 = vadd.f32 1e-06, %v2376_v51 }
0x102b   : > { %9850 = vrsqrt.f32 %v2382_v52 }
0x1038   : > { %v9851_v56 = vpop.eup %9850 }
0x1039   : > { %v2384_v57 = vmul.f32 %v9851_v56, %v2381_v55 }
0x103b   : > { %v2389_v58 = vadd.f32 %v2388_v54, %v2384_v57 }
0x103d   : > { %9286 = vmatmul.mubr.msk.f32.vlgmr.msra.gmra.mxu0 %vm1073_vm0, %v2389_v58 }
0x103e   : > { %9290 = vmatprep.mubr.msk.f32.mxu0 %vm10046_vm1, %v10045_v8 }
0x10fd   : > { %v2465_v60 = vpop.f32.mrf.mxu0 }
0x10fe   : > { %v10492_v61 = vadd.f32 %v8764_v59, %v2465_v60 }
0x10ff   : > { %v9287_v62 = vpop.f32.mrf.mxu0 }
0x1100   : > { %2470 = vrot.lane.b32.xlu0 %v10492_v61, %s11383_s23 }
0x1104   : > { %2716 = vrot.lane.b32.xlu0 %v10492_v61, %s11384_s2 }
0x1108   : > { %2714 = vrot.lane.b32.xlu0 %v10492_v61, %s11385_s22 }
0x1172   : > { %v2471_v63 = vpop.permute.xlu0 %2470 }
0x1173   : > { %9289 = vmatpush3.xpose.msk.msra.mxu0 %vm1180_vm2, %v2471_v63 }
0x1174   : > { %9298 = vmatprep.subr.mxu0 %v10045_v8 }
0x1176   : > { %9291 = vmatmul.mubr.msk.f32.vlgmr.msra.gmra.mxu0 %vm1180_vm2, %v10492_v61  ;;  %v2717_v13 = vpop.permute.xlu0 %2716 }
0x1177   : > { %9300 = vmatprep.mubr.msk.f32.mxu0 %vm10046_vm1, %v10045_v8  ;;  %9299 = vmatpush3.msra.mxu0 %v8758_v16 }
0x1178   : > { %9308 = vmatprep.subr.mxu0 %v10045_v8 }
0x117a   : > { %v2715_v15 = vpop.permute.xlu0 %2714 }
0x1236   : > { %v2542_v1 = vpop.f32.mrf.mxu0 }
0x1237   : > { %v2546_v2 = vsel %vm10339_vm4, %v2542_v1, -1e+09  ;;  %v8760_v1 = vld [vmem:[%s11364_s29 + $0x30] sm:$0xff] }
0x1238   : > { %v9292_v3 = vpop.f32.mrf.mxu0  ;;  %v2547_v4 = vsel %vm1180_vm2, %v2546_v2, -inf }
0x1239   : > { %2548 = vmax.xlane.f32.xlu1 %v2547_v4 }
0x12c2   : > { %v2549_v5 = vpop.xlane.xlu1 %2548 }
0x12c3   : > { %v2550_v0 = vsub.f32 %v2546_v2, %v2549_v5 }
0x12c5   : > { %v2551_v6 = vmul.f32 1.442695, %v2550_v0 }
0x12c7   : > { %9852 = vpow2.f32 %v2551_v6 }
0x12d4   : > { %v9853_v7 = vpop.eup %9852 }
0x12d5   : > { %v2553_v9 = vsel %vm1180_vm2, %v9853_v7, 0.0 }
0x12d6   : > { %2554 = vadd.xlane.f32.xlu1 %v2553_v9 }
0x12e7   : > { %2558 = vrot.lane.b32.xlu1 %v10492_v61, %s11386_s5 }
0x135f   : > { %v2555_v10 = vpop.xlane.xlu1 %2554 }
0x1360   : > { %9854 = vrcp.f32 %v2555_v10 }
0x1363   : > { %v2559_v11 = vpop.permute.xlu1 %2558 }
0x1364   : > { %9294 = vmatpush3.msra.mxu1 %v2559_v11 }
0x1365   : > { %9303 = vmatprep.subr.mxu1 %v10045_v8 }
0x136d   : > { %v9855_v12 = vpop.eup %9854 }
0x136e   : > { %v2557_v14 = vmul.f32 %v9855_v12, %v9853_v7 }
0x1370   : > { %9296 = vmatmul.mubr.msk.f32.vlgmr.msra.gmra.mxu1 %vm1180_vm2, %v2557_v14 }
0x1371   : > { %9304 = vmatpush3.xpose.msk.msra.mxu1 %vm1180_vm2, %v2717_v13  ;;  %9305 = vmatprep.mubr.msk.f32.mxu1 %vm10046_vm1, %v10045_v8  ;;  %v8761_v13 = vld [vmem:[%s11364_s29 + $0x38] sm:$0xff]  ;;  %s1050_s29 = scalar_lea.vmem %s11394_s9, %s10288_s16  ;;  %s11397_s9 = sld [smem:[#allocation8_spill]] }
0x1372   : > { %9313 = vmatprep.subr.mxu1 %v10045_v8 }
0x1374   : > { %9306 = vmatmul.mubr.msk.f32.vlgmr.msra.gmra.mxu1 %vm1180_vm2, %v2715_v15 }
0x1375   : > { %9315 = vmatprep.mubr.msk.f32.mxu1 %vm10046_vm1, %v10045_v8  ;;  %9314 = vmatpush3.msra.mxu1 %v8759_v41 }
0x1376   : > { %9323 = vmatprep.subr.mxu1 %v10045_v8 }
0x1430   : > { %v2630_v18 = vpop.f32.mrf.mxu1 }
0x1431   : > { %9301 = vmatmul.mubr.msk.f32.vlgmr.msra.gmra.mxu0 %vm1180_vm2, %v2630_v18 }
0x1432   : > { %v9297_v19 = vpop.f32.mrf.mxu1  ;;  %9310 = vmatprep.mubr.msk.f32.mxu0 %vm10046_vm1, %v10045_v8 }
0x1434   : > { %v2788_v21 = vpop.f32.mrf.mxu1 }
0x1435   : > { %v2792_v22 = vsel %vm10339_vm4, %v2788_v21, -1e+09 }
0x1436   : > { %v9307_v23 = vpop.f32.mrf.mxu1  ;;  %v2793_v24 = vsel %vm1180_vm2, %v2792_v22, -inf }
0x1437   : > { %2794 = vmax.xlane.f32.xlu0 %v2793_v24 }
0x144d   : > { %2804 = vrot.lane.b32.xlu0 %v10492_v61, %s11387_s8 }
0x1451   : > { %2954 = vrot.lane.b32.xlu0 %v10492_v61, %s11388_s13 }
0x14c0   : > { %v2795_v25 = vpop.xlane.xlu0 %2794 }
0x14c1   : > { %v2796_v26 = vsub.f32 %v2792_v22, %v2795_v25 }
0x14c3   : > { %v2797_v27 = vmul.f32 1.442695, %v2796_v26 }
0x14c4   : > { %v2805_v29 = vpop.permute.xlu0 %2804 }
0x14c5   : > { %9856 = vpow2.f32 %v2797_v27  ;;  %9309 = vmatpush3.msra.mxu0 %v2805_v29  ;;  %v10595_v29 = vld [vmem:[%s1050_s29] sm:$0xff]  ;;  %s11395_s29 = sld [smem:[#allocation20_spill]] }
0x14c6   : > { %9318 = vmatprep.subr.mxu0 %v10045_v8 }
0x14c8   : > { %v2955_v40 = vpop.permute.xlu0 %2954 }
0x14d2   : > { %v9857_v30 = vpop.eup %9856 }
0x14d3   : > { %v2799_v31 = vsel %vm1180_vm2, %v9857_v30, 0.0 }
0x14d4   : > { %2800 = vadd.xlane.f32.xlu1 %v2799_v31  ;;  %v3674_v31 = vsel %vm1073_vm0, %v10595_v29, 0.0 }
0x14e5   : > { %2956 = vrot.lane.b32.xlu1 %v10492_v61, %s11389_s21 }
0x14f1   : > { %v2703_v32 = vpop.f32.mrf.mxu0 }
0x14f2   : > { %v2713_v54 = vadd.f32 %v8770_v53, %v2703_v32 }
0x14f3   : > { %v9302_v33 = vpop.f32.mrf.mxu0 }
0x155d   : > { %v2801_v34 = vpop.xlane.xlu1 %2800 }
0x155e   : > { %9858 = vrcp.f32 %v2801_v34 }
0x1561   : > { %v2957_v38 = vpop.permute.xlu1 %2956 }
0x156b   : > { %v9859_v35 = vpop.eup %9858 }
0x156c   : > { %v2803_v37 = vmul.f32 %v9859_v35, %v9857_v30 }
0x156e   : > { %9311 = vmatmul.mubr.msk.f32.vlgmr.msra.gmra.mxu0 %vm1180_vm2, %v2803_v37 }
0x156f   : > { %9319 = vmatpush3.xpose.msk.msra.mxu0 %vm1180_vm2, %v2957_v38  ;;  %9320 = vmatprep.mubr.msk.f32.mxu0 %vm10046_vm1, %v10045_v8 }
0x1570   : > { %9328 = vmatprep.subr.mxu0 %v10045_v8 }
0x1572   : > { %9321 = vmatmul.mubr.msk.f32.vlgmr.msra.gmra.mxu0 %vm1180_vm2, %v2955_v40 }
0x1573   : > { %9330 = vmatprep.mubr.msk.f32.mxu0 %vm10046_vm1, %v10045_v8  ;;  %9329 = vmatpush3.msra.mxu0 %v8760_v1 }
0x1574   : > { %9338 = vmatprep.subr.mxu0 %v10045_v8 }
0x162e   : > { %v2876_v42 = vpop.f32.mrf.mxu0 }
0x162f   : > { %9316 = vmatmul.mubr.msk.f32.vlgmr.msra.gmra.mxu1 %vm1180_vm2, %v2876_v42 }
0x1630   : > { %v9312_v43 = vpop.f32.mrf.mxu0  ;;  %9325 = vmatprep.mubr.msk.f32.mxu1 %vm10046_vm1, %v10045_v8 }
0x1631   : > { %v8786_v43 = vld [vmem:[%s11362_s14 + $0x38] sm:$0xff] }
0x1632   : > { %v3028_v44 = vpop.f32.mrf.mxu0 }
0x1633   : > { %v3032_v45 = vsel %vm10339_vm4, %v3028_v44, -1e+09  ;;  %v8785_v44 = vld [vmem:[%s11362_s14 + $0x30] sm:$0xff] }
0x1634   : > { %v9322_v46 = vpop.f32.mrf.mxu0  ;;  %v3033_v47 = vsel %vm1180_vm2, %v3032_v45, -inf }
0x1635   : > { %3034 = vmax.xlane.f32.xlu0 %v3033_v47  ;;  %v8783_v46 = vld [vmem:[%s11362_s14 + $0x20] sm:$0xff]  ;;  %v8795_v47 = vld [vmem:[%s11360_s24 + $0x78] sm:$0xff] }
0x164b   : > { %3044 = vrot.lane.b32.xlu0 %v10492_v61, %s11390_s25 }
0x164f   : > { %3194 = vrot.lane.b32.xlu0 %v10492_v61, %s11391_s26 }
0x16be   : > { %v3035_v48 = vpop.xlane.xlu0 %3034 }
0x16bf   : > { %v3036_v49 = vsub.f32 %v3032_v45, %v3035_v48  ;;  %v8784_v45 = vld [vmem:[%s11362_s14 + $0x28] sm:$0xff]  ;;  %v8794_v48 = vld [vmem:[%s11360_s24 + $0x70] sm:$0xff]  ;;  %s1057_s14 = scalar_lea.vmem %s11397_s9, %s10288_s16  ;;  %s11398_s9 = sld [smem:[#allocation22_spill]] }
0x16c0   : > { %s11400_s16 = sld [smem:[#allocation26_spill]] }
0x16c1   : > { %v3037_v50 = vmul.f32 1.442695, %v3036_v49  ;;  %v8793_v49 = vld [vmem:[%s11360_s24 + $0x68] sm:$0xff] }
0x16c2   : > { %v3045_v51 = vpop.permute.xlu0 %3044 }
0x16c3   : > { %9860 = vpow2.f32 %v3037_v50  ;;  %9324 = vmatpush3.msra.mxu1 %v3045_v51  ;;  %v8792_v50 = vld [vmem:[%s11360_s24 + $0x60] sm:$0xff]  ;;  %v8791_v51 = vld [vmem:[%s11360_s24 + $0x58] sm:$0xff] }
0x16c4   : > { %9333 = vmatprep.subr.mxu1 %v10045_v8 }
0x16c6   : > { %v3195_v63 = vpop.permute.xlu0 %3194 }
0x16d0   : > { %v9861_v52 = vpop.eup %9860 }
0x16d1   : > { %v3039_v28 = vsel %vm1180_vm2, %v9861_v52, 0.0 }
0x16d2   : > { %3040 = vadd.xlane.f32.xlu1 %v3039_v28 }
0x16e3   : > { %3196 = vrot.lane.b32.xlu1 %v10492_v61, %s11392_s11 }
0x16ef   : > { %v2949_v55 = vpop.f32.mrf.mxu1 }
0x16f0   : > { %v2953_v56 = vadd.f32 %v2949_v55, %v2713_v54 }
0x16f1   : > { %v9317_v57 = vpop.f32.mrf.mxu1 }
0x16f2   : > { %v8797_v57 = vld [vmem:[%s11363_s6 + $0x2] sm:$0x3]  ;;  %s11396_s6 = sld [smem:[#allocation21_spill]] }
0x175b   : > { %v3041_v58 = vpop.xlane.xlu1 %3040 }
0x175c   : > { %9862 = vrcp.f32 %v3041_v58  ;;  %v3468_v58 = vrot.slane %v8797_v57, %v10312_v17 }
0x175f   : > { %v3197_v62 = vpop.permute.xlu1 %3196 }
0x1769   : > { %v9863_v59 = vpop.eup %9862 }
0x176a   : > { %v3043_v60 = vmul.f32 %v9863_v59, %v9861_v52  ;;  %v3673_v59 = vld [vmem:[%s10163_s17] sm:$0x3] }
0x176b   : > { %v3687_v1 = vrot.slane %v3673_v59, %v10312_v17 }
0x176c   : > { %9326 = vmatmul.mubr.msk.f32.vlgmr.msra.gmra.mxu1 %vm1180_vm2, %v3043_v60  ;;  %v3476_v60 = vrot.slane %v8797_v57, %v10316_v20 }
0x176d   : > { %9334 = vmatpush3.xpose.msk.msra.mxu1 %vm1180_vm2, %v3197_v62  ;;  %9335 = vmatprep.mubr.msk.f32.mxu1 %vm10046_vm1, %v10045_v8 }
0x176e   : > { %9343 = vmatprep.subr.mxu1 %v10045_v8 }
0x1770   : > { %9336 = vmatmul.mubr.msk.f32.vlgmr.msra.gmra.mxu1 %vm1180_vm2, %v3195_v63 }
0x1771   : > { %9345 = vmatprep.mubr.msk.f32.mxu1 %vm10046_vm1, %v10045_v8  ;;  %9344 = vmatpush3.msra.mxu1 %v8761_v13  ;;  %v8790_v13 = vld [vmem:[%s11360_s24 + $0x50] sm:$0xff] }
0x1772   : > { %9359 = vmatprep.subr.mxu1 %v10045_v8 }
0x182c   : > { %v3116_v2 = vpop.f32.mrf.mxu1 }
0x182d   : > { %9331 = vmatmul.mubr.msk.f32.vlgmr.msra.gmra.mxu0 %vm1180_vm2, %v3116_v2 }
0x182e   : > { %v9327_v3 = vpop.f32.mrf.mxu1  ;;  %9340 = vmatprep.mubr.msk.f32.mxu0 %vm10046_vm1, %v10045_v8 }
0x1830   : > { %v3268_v4 = vpop.f32.mrf.mxu1 }
0x1831   : > { %v3272_v5 = vsel %vm10339_vm4, %v3268_v4, -1e+09  ;;  %v3666_v4 = vld [vmem:[%s11395_s29 + $0x18] sm:$0xff] }
0x1832   : > { %v9337_v0 = vpop.f32.mrf.mxu1  ;;  %v3273_v6 = vsel %vm1180_vm2, %v3272_v5, -inf }
0x1833   : > { %3274 = vmax.xlane.f32.xlu1 %v3273_v6  ;;  %v3665_v6 = vld [vmem:[%s11395_s29 + $0x10] sm:$0xff] }
0x18bc   : > { %v3275_v7 = vpop.xlane.xlu1 %3274 }
0x18bd   : > { %v3276_v9 = vsub.f32 %v3272_v5, %v3275_v7  ;;  %v3695_v7 = vrot.slane %v3673_v59, %v10316_v20 }
0x18bf   : > { %v3277_v10 = vmul.f32 1.442695, %v3276_v9  ;;  %v3664_v9 = vld [vmem:[%s11395_s29 + $0x8] sm:$0xff] }
0x18c1   : > { %9864 = vpow2.f32 %v3277_v10 }
0x18ce   : > { %v9865_v11 = vpop.eup %9864 }
0x18cf   : > { %v3279_v12 = vsel %vm1180_vm2, %v9865_v11, 0.0 }
0x18d0   : > { %3280 = vadd.xlane.f32.xlu0 %v3279_v12 }
0x18e6   : > { %3284 = vrot.lane.b32.xlu0 %v10492_v61, %s11393_s3 }
0x18ed   : > { %v3189_v14 = vpop.f32.mrf.mxu0 }
0x18ee   : > { %v3193_v15 = vadd.f32 %v3189_v14, %v2953_v56  ;;  %v8789_v14 = vld [vmem:[%s11360_s24 + $0x48] sm:$0xff] }
0x18ef   : > { %v9332_v16 = vpop.f32.mrf.mxu0 }
0x18f0   : > { %v8798_v16 = vld [vmem:[%s11361_s19 + $0x1] ss:$0 sm:$0xff]  ;;  %s11401_s19 = sld [smem:[#allocation19_spill]] }
0x1959   : > { %v3281_v18 = vpop.xlane.xlu0 %3280 }
0x195a   : > { %9866 = vrcp.f32 %v3281_v18 }
0x195d   : > { %v3285_v19 = vpop.permute.xlu0 %3284 }
0x195e   : > { %9339 = vmatpush3.msra.mxu0 %v3285_v19 }
0x195f   : > { %9348 = vmatprep.subr.mxu0 %v10045_v8 }
0x1967   : > { %v9867_v21 = vpop.eup %9866 }
0x1968   : > { %v3283_v22 = vmul.f32 %v9867_v21, %v9865_v11  ;;  %v3663_v11 = vld [vmem:[%s11395_s29] sm:$0xff] }
0x196a   : > { %9341 = vmatmul.mubr.msk.f32.vlgmr.msra.gmra.mxu0 %vm1180_vm2, %v3283_v22 }
0x196b   : > { %9356 = vmatprep.mubr.msk.f32.mxu0 %vm10046_vm1, %v10045_v8  ;;  %9349 = vmatpush3.msra.mxu0 %v8786_v43 }
0x196c   : > { %9350 = vmatprep.subr.mxu0 %v10045_v8 }
0x196d   : > { %9351 = vmatpush3.msra.mxu0 %v8785_v44 }
0x196e   : > { %9352 = vmatprep.subr.mxu0 %v10045_v8 }
0x196f   : > { %9353 = vmatpush3.msra.mxu0 %v8784_v45 }
0x1970   : > { %9354 = vmatprep.subr.mxu0 %v10045_v8 }
0x1971   : > { %9355 = vmatpush3.msra.mxu0 %v8783_v46 }
0x1972   : > { %9378 = vmatprep.subr.mxu0 %v10045_v8 }
0x1a2a   : > { %v3356_v61 = vpop.f32.mrf.mxu0 }
0x1a2b   : > { %9346 = vmatmul.mubr.msk.f32.vlgmr.msra.gmra.mxu1 %vm1180_vm2, %v3356_v61  ;;  %v8802_v61 = vld [vmem:[%s11396_s6] ss:$0 sm:$0xff] }
0x1a2c   : > { %v9342_v23 = vpop.f32.mrf.mxu0  ;;  %9375 = vmatprep.mubr.msk.f32.mxu1 %vm10046_vm1, %v10045_v8  ;;  %9360 = vmatpush3.msra.mxu1 %v8795_v47 }
0x1a2d   : > { %9361 = vmatprep.subr.mxu1 %v10045_v8 }
0x1a2e   : > { %9362 = vmatpush3.msra.mxu1 %v8794_v48 }
0x1a2f   : > { %9363 = vmatprep.subr.mxu1 %v10045_v8 }
0x1a30   : > { %9364 = vmatpush3.msra.mxu1 %v8793_v49  ;;  %v3668_v49 = vld [vmem:[%s11398_s9] sm:$0xff] }
0x1a31   : > { %9365 = vmatprep.subr.mxu1 %v10045_v8 }
0x1a32   : > { %9366 = vmatpush3.msra.mxu1 %v8792_v50 }
0x1a33   : > { %9367 = vmatprep.subr.mxu1 %v10045_v8 }
0x1a34   : > { %9368 = vmatpush3.msra.mxu1 %v8791_v51 }
0x1a35   : > { %9369 = vmatprep.subr.mxu1 %v10045_v8 }
0x1a36   : > { %9370 = vmatpush3.msra.mxu1 %v8790_v13 }
0x1a37   : > { %9371 = vmatprep.subr.mxu1 %v10045_v8 }
0x1a38   : > { %9372 = vmatpush3.msra.mxu1 %v8789_v14 }
0x1a39   : > { %9373 = vmatprep.subr.mxu1 %v10045_v8 }
0x1aeb   : > { %v3429_v24 = vpop.f32.mrf.mxu1 }
0x1aec   : > { %v3433_v25 = vadd.f32 %v3429_v24, %v3193_v15  ;;  %v8788_v15 = vld [vmem:[%s11360_s24 + $0x40] sm:$0xff]  ;;  %s11402_s24 = sld [smem:[#allocation24_spill]] }
0x1aed   : > { %v9347_v26 = vpop.f32.mrf.mxu1  ;;  %9374 = vmatpush3.msra.mxu1 %v8788_v15 }
0x1aee   : > { %v10593_v27 = vadd.f32 %v3433_v25, %v10471_v39  ;;  %9394 = vmatprep.subr.mxu1 %v10045_v8 }
0x1af0   : > { %v3455_v30 = vsel %vm1073_vm0, %v10593_v27, 0.0 }
0x1af1   : > { %3456 = vadd.xlane.f32.xlu1 %v3455_v30 }
0x1af5   : > { %3675 = vadd.xlane.f32.xlu1 %v3674_v31 }
0x1b7a   : > { %v3457_v32 = vpop.xlane.xlu1 %3456 }
0x1b7b   : > { %v3458_v33 = vmul.f32 0.03125, %v3457_v32  ;;  %v10668_v32 = vld [vmem:[%s1057_s14] sm:$0xff]  ;;  %s11399_s14 = sld [smem:[#allocation23_spill]] }
0x1b7c   : > { %vm3853_vm6 = vcmp.gt.f32.partialorder %v10668_v32, 0.5 }
0x1b7d   : > { %v3459_v34 = vsub.f32 %v10593_v27, %v3458_v33 }
0x1b7e   : > { %v3676_v35 = vpop.xlane.xlu1 %3675 }
0x1b7f   : > { %v3677_v39 = vmul.f32 0.03125, %v3676_v35  ;;  %v3460_v37 = vmul.f32 %v3459_v34, %v3459_v34  ;;  %v3469_v62 = vmul.f32 %v3468_v58, %v3459_v34 }
0x1b81   : > { %v3678_v38 = vsub.f32 %v10595_v29, %v3677_v39  ;;  %v3461_v40 = vsel %vm1073_vm0, %v3460_v37, 0.0 }
0x1b82   : > { %3462 = vadd.xlane.f32.xlu1 %v3461_v40 }
0x1b83   : > { %v3679_v41 = vmul.f32 %v3678_v38, %v3678_v38  ;;  %v3688_v0 = vmul.f32 %v3687_v1, %v3678_v38 }
0x1b85   : > { %v3680_v42 = vsel %vm1073_vm0, %v3679_v41, 0.0 }
0x1b86   : > { %3681 = vadd.xlane.f32.xlu1 %v3680_v42 }
0x1c0b   : > { %v3463_v52 = vpop.xlane.xlu1 %3462 }
0x1c0c   : > { %v3464_v28 = vmul.f32 0.03125, %v3463_v52 }
0x1c0e   : > { %v3470_v53 = vadd.f32 1e-06, %v3464_v28 }
0x1c0f   : > { %v3682_v54 = vpop.xlane.xlu1 %3681 }
0x1c10   : > { %9868 = vrsqrt.f32 %v3470_v53  ;;  %v3683_v55 = vmul.f32 0.03125, %v3682_v54 }
0x1c12   : > { %v3689_v56 = vadd.f32 1e-06, %v3683_v55 }
0x1c14   : > { %9870 = vrsqrt.f32 %v3689_v56 }
0x1c1d   : > { %v9869_v63 = vpop.eup %9868 }
0x1c1e   : > { %v3472_v2 = vmul.f32 %v9869_v63, %v3469_v62 }
0x1c20   : > { %v3477_v3 = vadd.f32 %v3476_v60, %v3472_v2 }
0x1c21   : > { %v9871_v5 = vpop.eup %9870 }
0x1c22   : > { %9357 = vmatmul.mubr.msk.f32.vlgmr.msra.gmra.mxu0 %vm1073_vm0, %v3477_v3  ;;  %v3691_v10 = vmul.f32 %v9871_v5, %v3688_v0  ;;  %v3669_v0 = vld [vmem:[%s11398_s9 + $0x8] sm:$0xff] }
0x1c23   : > { %9379 = vmatpush3.msra.mxu0 %v3666_v4  ;;  %9386 = vmatprep.mubr.msk.f32.mxu0 %vm10046_vm1, %v10045_v8 }
0x1c24   : > { %9380 = vmatprep.subr.mxu0 %v10045_v8  ;;  %v3696_v12 = vadd.f32 %v3695_v7, %v3691_v10 }
0x1c25   : > { %9381 = vmatpush3.msra.mxu0 %v3665_v6 }
0x1c26   : > { %9382 = vmatprep.subr.mxu0 %v10045_v8 }
0x1c27   : > { %9383 = vmatpush3.msra.mxu0 %v3664_v9 }
0x1c28   : > { %9384 = vmatprep.subr.mxu0 %v10045_v8 }
0x1c29   : > { %9385 = vmatpush3.msra.mxu0 %v3663_v11 }
0x1c2a   : > { %9387 = vmatmul.mubr.msk.f32.vlgmr.msra.gmra.mxu0 %vm1073_vm0, %v3696_v12  ;;  %9389 = vmatprep.subr.mxu0 %v10045_v8 }
0x1c2b   : > { %9391 = vmatprep.mubr.msk.f32.mxu0 %vm10046_vm1, %v10045_v8 }
0x1ce2   : > { %v3553_v18 = vpop.f32.mrf.mxu0 }
0x1ce3   : > { %v3554_v19 = vadd.f32 %v8798_v16, %v3553_v18 }
0x1ce4   : > { %v9358_v21 = vpop.f32.mrf.mxu0 }
0x1ce5   : > { %v3557_v22 = vmax.f32 %v3554_v19, 0.0  ;;  %v8808_v21 = vld [vmem:[%s11399_s14] ss:$0 sm:$0xff] }
0x1ce7   : > { %9376 = vmatmul.mubr.msk.f32.vlgmr.msra.gmra.mxu1 %vm2269_vm5, %v3557_v22 }
0x1ce8   : > { %9396 = vmatprep.mubr.msk.f32.mxu1 %vm10046_vm1, %v10045_v8 }
0x1cea   : > { %v3772_v23 = vpop.f32.mrf.mxu0 }
0x1ceb   : > { %v10654_v24 = vadd.f32 %v8802_v61, %v3772_v23 }
0x1cec   : > { %v9388_v25 = vpop.f32.mrf.mxu0 }
0x1ced   : > { %3777 = vrot.lane.b32.xlu1 %v10654_v24, %s11383_s23 }
0x1d5f   : > { %v3778_v26 = vpop.permute.xlu1 %3777 }
0x1d60   : > { %9390 = vmatpush3.xpose.msk.msra.mxu0 %vm1180_vm2, %v3778_v26 }
0x1d61   : > { %9399 = vmatprep.subr.mxu0 %v10045_v8 }
0x1d63   : > { %9392 = vmatmul.mubr.msk.f32.vlgmr.msra.gmra.mxu0 %vm1180_vm2, %v10654_v24 }
0x1d64   : > { %9401 = vmatprep.mubr.msk.f32.mxu0 %vm10046_vm1, %v10045_v8  ;;  %9400 = vmatpush3.msra.mxu0 %v3668_v49  ;;  %v8801_v49 = vld [vmem:[%s11359_s30 + $0x1] ss:$0 sm:$0xff]  ;;  %s11403_s30 = sld [smem:[#allocation30_spill]] }
0x1d65   : > { %9409 = vmatprep.subr.mxu0 %v10045_v8 }
0x1da7   : > { %v10664_v30 = vpop.f32.mrf.mxu1 }
0x1da9   : > { %v9377_v31 = vpop.f32.mrf.mxu1 }
0x1e23   : > { %v3849_v33 = vpop.f32.mrf.mxu0 }
0x1e24   : > { %v3854_v34 = vsel %vm3853_vm6, %v3849_v33, -1e+09 }
0x1e25   : > { %v9393_v35 = vpop.f32.mrf.mxu0  ;;  %v3855_v39 = vsel %vm1180_vm2, %v3854_v34, -inf }
0x1e26   : > { %3856 = vmax.xlane.f32.xlu0 %v3855_v39  ;;  %v3670_v39 = vld [vmem:[%s11398_s9 + $0x10] sm:$0xff] }
0x1e3c   : > { %3866 = vrot.lane.b32.xlu0 %v10654_v24, %s11386_s5 }
0x1e40   : > { %4022 = vrot.lane.b32.xlu0 %v10654_v24, %s11385_s22 }
0x1eaf   : > { %v3857_v37 = vpop.xlane.xlu0 %3856 }
0x1eb0   : > { %v3858_v38 = vsub.f32 %v3854_v34, %v3857_v37 }
0x1eb2   : > { %v3859_v40 = vmul.f32 1.442695, %v3858_v38 }
0x1eb3   : > { %v3867_v41 = vpop.permute.xlu0 %3866 }
0x1eb4   : > { %9872 = vpow2.f32 %v3859_v40  ;;  %9395 = vmatpush3.msra.mxu1 %v3867_v41 }
0x1eb5   : > { %9404 = vmatprep.subr.mxu1 %v10045_v8 }
0x1eb7   : > { %v4023_v48 = vpop.permute.xlu0 %4022 }
0x1ec1   : > { %v9873_v42 = vpop.eup %9872 }
0x1ec2   : > { %v3861_v43 = vsel %vm1180_vm2, %v9873_v42, 0.0 }
0x1ec3   : > { %3862 = vadd.xlane.f32.xlu1 %v3861_v43 }
0x1ed4   : > { %4024 = vrot.lane.b32.xlu1 %v10654_v24, %s11384_s2 }
0x1f4c   : > { %v3863_v44 = vpop.xlane.xlu1 %3862 }
0x1f4d   : > { %9874 = vrcp.f32 %v3863_v44 }
0x1f50   : > { %v4025_v47 = vpop.permute.xlu1 %4024 }
0x1f5a   : > { %v9875_v45 = vpop.eup %9874 }
0x1f5b   : > { %v3865_v46 = vmul.f32 %v9875_v45, %v9873_v42 }
0x1f5d   : > { %9397 = vmatmul.mubr.msk.f32.vlgmr.msra.gmra.mxu1 %vm1180_vm2, %v3865_v46 }
0x1f5e   : > { %9405 = vmatpush3.xpose.msk.msra.mxu1 %vm1180_vm2, %v4025_v47  ;;  %9406 = vmatprep.mubr.msk.f32.mxu1 %vm10046_vm1, %v10045_v8 }
0x1f5f   : > { %9414 = vmatprep.subr.mxu1 %v10045_v8 }
0x1f61   : > { %9407 = vmatmul.mubr.msk.f32.vlgmr.msra.gmra.mxu1 %vm1180_vm2, %v4023_v48  ;;  %v3631_v48 = vadd.f32 %v10664_v30, %v10593_v27 }
0x1f62   : > { %9416 = vmatprep.mubr.msk.f32.mxu1 %vm10046_vm1, %v10045_v8  ;;  %9415 = vmatpush3.msra.mxu1 %v3669_v0 }
0x1f63   : > { %9424 = vmatprep.subr.mxu1 %v10045_v8 }
0x201d   : > { %v3938_v50 = vpop.f32.mrf.mxu1 }
0x201e   : > { %9402 = vmatmul.mubr.msk.f32.vlgmr.msra.gmra.mxu0 %vm1180_vm2, %v3938_v50 }
0x201f   : > { %v9398_v51 = vpop.f32.mrf.mxu1  ;;  %9411 = vmatprep.mubr.msk.f32.mxu0 %vm10046_vm1, %v10045_v8 }
0x2021   : > { %v4096_v52 = vpop.f32.mrf.mxu1 }
0x2022   : > { %v4100_v28 = vsel %vm3853_vm6, %v4096_v52, -1e+09  ;;  %v3638_v52 = vadd.f32 %v8801_v49, %v3631_v48 }
0x2023   : > { %v9408_v53 = vpop.f32.mrf.mxu1  ;;  %v4101_v54 = vsel %vm1180_vm2, %v4100_v28, -inf }
0x2024   : > { %4102 = vmax.xlane.f32.xlu0 %v4101_v54 }
0x203a   : > { %4112 = vrot.lane.b32.xlu0 %v10654_v24, %s11387_s8 }
0x203e   : > { %4262 = vrot.lane.b32.xlu0 %v10654_v24, %s11388_s13 }
0x20ad   : > { %v4103_v55 = vpop.xlane.xlu0 %4102 }
0x20ae   : > { %v4104_v56 = vsub.f32 %v4100_v28, %v4103_v55  ;;  %v3671_v28 = vld [vmem:[%s11398_s9 + $0x18] sm:$0xff] }
0x20b0   : > { %v4105_v57 = vmul.f32 1.442695, %v4104_v56 }
0x20b1   : > { %v4113_v58 = vpop.permute.xlu0 %4112 }
0x20b2   : > { %9876 = vpow2.f32 %v4105_v57  ;;  %9410 = vmatpush3.msra.mxu0 %v4113_v58 }
0x20b3   : > { %9419 = vmatprep.subr.mxu0 %v10045_v8 }
0x20b5   : > { %v4263_v5 = vpop.permute.xlu0 %4262 }
0x20bf   : > { %v9877_v59 = vpop.eup %9876 }
0x20c0   : > { %v4107_v60 = vsel %vm1180_vm2, %v9877_v59, 0.0 }
0x20c1   : > { %4108 = vadd.xlane.f32.xlu1 %v4107_v60 }
0x20d2   : > { %4264 = vrot.lane.b32.xlu1 %v10654_v24, %s11389_s21 }
0x20de   : > { %v4011_v62 = vpop.f32.mrf.mxu0 }
0x20df   : > { %v4021_v22 = vadd.f32 %v8808_v21, %v4011_v62 }
0x20e0   : > { %v9403_v63 = vpop.f32.mrf.mxu0 }
0x214a   : > { %v4109_v1 = vpop.xlane.xlu1 %4108 }
0x214b   : > { %9878 = vrcp.f32 %v4109_v1 }
0x214e   : > { %v4265_v4 = vpop.permute.xlu1 %4264 }
0x2158   : > { %v9879_v2 = vpop.eup %9878 }
0x2159   : > { %v4111_v3 = vmul.f32 %v9879_v2, %v9877_v59 }
0x215b   : > { %9412 = vmatmul.mubr.msk.f32.vlgmr.msra.gmra.mxu0 %vm1180_vm2, %v4111_v3 }
0x215c   : > { %9420 = vmatpush3.xpose.msk.msra.mxu0 %vm1180_vm2, %v4265_v4  ;;  %9421 = vmatprep.mubr.msk.f32.mxu0 %vm10046_vm1, %v10045_v8 }
0x215d   : > { %9429 = vmatprep.subr.mxu0 %v10045_v8 }
0x215f   : > { %9422 = vmatmul.mubr.msk.f32.vlgmr.msra.gmra.mxu0 %vm1180_vm2, %v4263_v5 }
0x2160   : > { %9431 = vmatprep.mubr.msk.f32.mxu0 %vm10046_vm1, %v10045_v8  ;;  %9430 = vmatpush3.msra.mxu0 %v3670_v39 }
0x2161   : > { %9439 = vmatprep.subr.mxu0 %v10045_v8 }
0x221b   : > { %v4184_v6 = vpop.f32.mrf.mxu0 }
0x221c   : > { %9417 = vmatmul.mubr.msk.f32.vlgmr.msra.gmra.mxu1 %vm1180_vm2, %v4184_v6  ;;  %v4751_v6 = vld [vmem:[%s11400_s16 + $0x18] sm:$0xff] }
0x221d   : > { %v9413_v7 = vpop.f32.mrf.mxu0  ;;  %9426 = vmatprep.mubr.msk.f32.mxu1 %vm10046_vm1, %v10045_v8 }
0x221e   : > { %v4750_v7 = vld [vmem:[%s11400_s16 + $0x10] sm:$0xff] }
0x221f   : > { %v4336_v9 = vpop.f32.mrf.mxu0 }
0x2220   : > { %v4340_v10 = vsel %vm3853_vm6, %v4336_v9, -1e+09  ;;  %v4749_v9 = vld [vmem:[%s11400_s16 + $0x8] sm:$0xff] }
0x2221   : > { %v9423_v11 = vpop.f32.mrf.mxu0  ;;  %v4341_v12 = vsel %vm1180_vm2, %v4340_v10, -inf }
0x2222   : > { %4342 = vmax.xlane.f32.xlu0 %v4341_v12 }
0x2238   : > { %4352 = vrot.lane.b32.xlu0 %v10654_v24, %s11390_s25 }
0x223c   : > { %4502 = vrot.lane.b32.xlu0 %v10654_v24, %s11391_s26 }
0x22ab   : > { %v4343_v13 = vpop.xlane.xlu0 %4342 }
0x22ac   : > { %v4344_v14 = vsub.f32 %v4340_v10, %v4343_v13 }
0x22ae   : > { %v4345_v15 = vmul.f32 1.442695, %v4344_v14 }
0x22af   : > { %v4353_v16 = vpop.permute.xlu0 %4352 }
0x22b0   : > { %9880 = vpow2.f32 %v4345_v15  ;;  %9425 = vmatpush3.msra.mxu1 %v4353_v16 }
0x22b1   : > { %9434 = vmatprep.subr.mxu1 %v10045_v8 }
0x22b3   : > { %v4503_v35 = vpop.permute.xlu0 %4502 }
0x22bd   : > { %v9881_v18 = vpop.eup %9880 }
0x22be   : > { %v4347_v19 = vsel %vm1180_vm2, %v9881_v18, 0.0 }
0x22bf   : > { %4348 = vadd.xlane.f32.xlu1 %v4347_v19  ;;  %v3639_v19 = vld [vmem:[%s11401_s19] sm:$0x3]  ;;  %s11404_s19 = sld [smem:[#allocation27_spill]] }
0x22c0   : > { %v3653_v21 = vrot.slane %v3639_v19, %v10312_v17 }
0x22d0   : > { %4504 = vrot.lane.b32.xlu1 %v10654_v24, %s11392_s11 }
0x22dc   : > { %v4257_v61 = vpop.f32.mrf.mxu1 }
0x22dd   : > { %v4261_v23 = vadd.f32 %v4257_v61, %v4021_v22  ;;  %v3661_v22 = vrot.slane %v3639_v19, %v10316_v20  ;;  %v4754_v19 = vld [vmem:[%s11406_s1 + $0x8] sm:$0xff] }
0x22de   : > { %v9418_v25 = vpop.f32.mrf.mxu1 }
0x22df   : > { %v4746_v25 = vld [vmem:[%s11402_s24 + $0x18] sm:$0xff] }
0x2348   : > { %v4349_v26 = vpop.xlane.xlu1 %4348 }
0x2349   : > { %9882 = vrcp.f32 %v4349_v26  ;;  %v4745_v26 = vld [vmem:[%s11402_s24 + $0x10] sm:$0xff] }
0x234c   : > { %v4505_v34 = vpop.permute.xlu1 %4504 }
0x2356   : > { %v9883_v31 = vpop.eup %9882 }
0x2357   : > { %v4351_v33 = vmul.f32 %v9883_v31, %v9881_v18 }
0x2359   : > { %9427 = vmatmul.mubr.msk.f32.vlgmr.msra.gmra.mxu1 %vm1180_vm2, %v4351_v33  ;;  %v4744_v33 = vld [vmem:[%s11402_s24 + $0x8] sm:$0xff] }
0x235a   : > { %9435 = vmatpush3.xpose.msk.msra.mxu1 %vm1180_vm2, %v4505_v34  ;;  %9436 = vmatprep.mubr.msk.f32.mxu1 %vm10046_vm1, %v10045_v8 }
0x235b   : > { %9444 = vmatprep.subr.mxu1 %v10045_v8 }
0x235d   : > { %9437 = vmatmul.mubr.msk.f32.vlgmr.msra.gmra.mxu1 %vm1180_vm2, %v4503_v35  ;;  %v4743_v35 = vld [vmem:[%s11402_s24] sm:$0xff] }
0x235e   : > { %9446 = vmatprep.mubr.msk.f32.mxu1 %vm10046_vm1, %v10045_v8  ;;  %9445 = vmatpush3.msra.mxu1 %v3671_v28 }
0x235f   : > { %9460 = vmatprep.subr.mxu1 %v10045_v8 }
0x2419   : > { %v4424_v37 = vpop.f32.mrf.mxu1 }
0x241a   : > { %9432 = vmatmul.mubr.msk.f32.vlgmr.msra.gmra.mxu0 %vm1180_vm2, %v4424_v37 }
0x241b   : > { %v9428_v38 = vpop.f32.mrf.mxu1  ;;  %9441 = vmatprep.mubr.msk.f32.mxu0 %vm10046_vm1, %v10045_v8 }
0x241d   : > { %v4576_v40 = vpop.f32.mrf.mxu1 }
0x241e   : > { %v4580_v41 = vsel %vm3853_vm6, %v4576_v40, -1e+09  ;;  %v4758_v40 = vld [vmem:[%s11403_s30] sm:$0x3] }
0x241f   : > { %v9438_v42 = vpop.f32.mrf.mxu1  ;;  %v4581_v43 = vsel %vm1180_vm2, %v4580_v41, -inf }
0x2420   : > { %4582 = vmax.xlane.f32.xlu0 %v4581_v43  ;;  %v4780_v42 = vrot.slane %v4758_v40, %v10316_v20 }
0x2436   : > { %4592 = vrot.lane.b32.xlu0 %v10654_v24, %s11393_s3  ;;  %v3640_v24 = vsel %vm1073_vm0, %v3638_v52, 0.0 }
0x24a9   : > { %v4583_v44 = vpop.xlane.xlu0 %4582 }
0x24aa   : > { %v4584_v45 = vsub.f32 %v4580_v41, %v4583_v44  ;;  %v4772_v41 = vrot.slane %v4758_v40, %v10312_v17 }
0x24ac   : > { %v4585_v46 = vmul.f32 1.442695, %v4584_v45 }
0x24ad   : > { %v4593_v47 = vpop.permute.xlu0 %4592 }
0x24ae   : > { %9884 = vpow2.f32 %v4585_v46  ;;  %9440 = vmatpush3.msra.mxu0 %v4593_v47  ;;  %v8823_v47 = vld [vmem:[%s11404_s19] ss:$0 sm:$0xff] }
0x24af   : > { %9449 = vmatprep.subr.mxu0 %v10045_v8 }
0x24bb   : > { %v9885_v50 = vpop.eup %9884 }
0x24bc   : > { %v4587_v51 = vsel %vm1180_vm2, %v9885_v50, 0.0 }
0x24bd   : > { %4588 = vadd.xlane.f32.xlu1 %v4587_v51 }
0x24c1   : > { %3641 = vadd.xlane.f32.xlu1 %v3640_v24 }
0x24da   : > { %v4497_v53 = vpop.f32.mrf.mxu0 }
0x24db   : > { %v4501_v54 = vadd.f32 %v4497_v53, %v4261_v23 }
0x24dc   : > { %v9433_v55 = vpop.f32.mrf.mxu0 }
0x2546   : > { %v4589_v56 = vpop.xlane.xlu1 %4588 }
0x2547   : > { %9886 = vrcp.f32 %v4589_v56 }
0x254a   : > { %v3642_v59 = vpop.xlane.xlu1 %3641 }
0x254b   : > { %v3643_v60 = vmul.f32 0.03125, %v3642_v59 }
0x254d   : > { %v3644_v63 = vsub.f32 %v3638_v52, %v3643_v60  ;;  %v8821_v52 = vld [vmem:[%s11405_s18] ss:$0 sm:$0xff] }
0x254f   : > { %v3645_v5 = vmul.f32 %v3644_v63, %v3644_v63  ;;  %v3654_v61 = vmul.f32 %v3653_v21, %v3644_v63 }
0x2551   : > { %v3646_v0 = vsel %vm1073_vm0, %v3645_v5, 0.0  ;;  %v4753_v5 = vld [vmem:[%s11406_s1] sm:$0xff] }
0x2554   : > { %v9887_v57 = vpop.eup %9886 }
0x2555   : > { %v4591_v27 = vmul.f32 %v9887_v57, %v9885_v50 }
0x2557   : > { %9442 = vmatmul.mubr.msk.f32.vlgmr.msra.gmra.mxu0 %vm1180_vm2, %v4591_v27 }
0x2558   : > { %9457 = vmatprep.mubr.msk.f32.mxu0 %vm10046_vm1, %v10045_v8  ;;  %9450 = vmatpush3.msra.mxu0 %v4746_v25 }
0x2559   : > { %9451 = vmatprep.subr.mxu0 %v10045_v8 }
0x255a   : > { %9452 = vmatpush3.msra.mxu0 %v4745_v26 }
0x255b   : > { %9453 = vmatprep.subr.mxu0 %v10045_v8 }
0x255c   : > { %9454 = vmatpush3.msra.mxu0 %v4744_v33 }
0x255d   : > { %9455 = vmatprep.subr.mxu0 %v10045_v8 }
0x255e   : > { %9456 = vmatpush3.msra.mxu0 %v4743_v35 }
0x255f   : > { %9471 = vmatprep.subr.mxu0 %v10045_v8 }
0x2617   : > { %v4664_v30 = vpop.f32.mrf.mxu0 }
0x2618   : > { %9447 = vmatmul.mubr.msk.f32.vlgmr.msra.gmra.mxu1 %vm1180_vm2, %v4664_v30 }
0x2619   : > { %v9443_v58 = vpop.f32.mrf.mxu0  ;;  %9468 = vmatprep.mubr.msk.f32.mxu1 %vm10046_vm1, %v10045_v8  ;;  %9461 = vmatpush3.msra.mxu1 %v4751_v6 }
0x261a   : > { %9462 = vmatprep.subr.mxu1 %v10045_v8 }
0x261b   : > { %9463 = vmatpush3.msra.mxu1 %v4750_v7 }
0x261c   : > { %9464 = vmatprep.subr.mxu1 %v10045_v8 }
0x261d   : > { %9465 = vmatpush3.msra.mxu1 %v4749_v9 }
0x261e   : > { %9466 = vmatprep.subr.mxu1 %v10045_v8 }
0x26d8   : > { %v4737_v62 = vpop.f32.mrf.mxu1 }
0x26d9   : > { %v4741_v1 = vadd.f32 %v4737_v62, %v4501_v54 }
0x26da   : > { %v9448_v2 = vpop.f32.mrf.mxu1 }
0x26db   : > { %v10764_v3 = vadd.f32 %v4741_v1, %v10595_v29  ;;  %v4748_v29 = vld [vmem:[%s11400_s16] sm:$0xff] }
0x26dc   : > { %9467 = vmatpush3.msra.mxu1 %v4748_v29 }
0x26dd   : > { %v4759_v4 = vsel %vm1073_vm0, %v10764_v3, 0.0  ;;  %9476 = vmatprep.subr.mxu1 %v10045_v8 }
0x26de   : > { %4760 = vadd.xlane.f32.xlu1 %v4759_v4 }
0x26e2   : > { %3647 = vadd.xlane.f32.xlu1 %v3646_v0 }
0x2767   : > { %v4761_v10 = vpop.xlane.xlu1 %4760 }
0x2768   : > { %v4762_v11 = vmul.f32 0.03125, %v4761_v10 }
0x276a   : > { %v4763_v12 = vsub.f32 %v10764_v3, %v4762_v11 }
0x276b   : > { %v3648_v13 = vpop.xlane.xlu1 %3647 }
0x276c   : > { %v3649_v14 = vmul.f32 0.03125, %v3648_v13  ;;  %v4764_v15 = vmul.f32 %v4763_v12, %v4763_v12  ;;  %v4773_v43 = vmul.f32 %v4772_v41, %v4763_v12 }
0x276e   : > { %v3655_v16 = vadd.f32 1e-06, %v3649_v14  ;;  %v4765_v18 = vsel %vm1073_vm0, %v4764_v15, 0.0 }
0x276f   : > { %4766 = vadd.xlane.f32.xlu1 %v4765_v18 }
0x2770   : > { %9888 = vrsqrt.f32 %v3655_v16 }
0x277d   : > { %v9889_v23 = vpop.eup %9888 }
0x277e   : > { %v3657_v31 = vmul.f32 %v9889_v23, %v3654_v61 }
0x2780   : > { %v10786_v34 = vadd.f32 %v3661_v22, %v3657_v31 }
0x2782   : > { %9469 = vmatmul.mubr.msk.f32.vlgmr.msra.gmra.mxu1 %vm1073_vm0, %v10786_v34 }
0x2783   : > { %9478 = vmatprep.mubr.msk.f32.mxu1 %vm10046_vm1, %v10045_v8 }
0x27f8   : > { %v4767_v39 = vpop.xlane.xlu1 %4766 }
0x27f9   : > { %v4768_v37 = vmul.f32 0.03125, %v4767_v39 }
0x27fb   : > { %v4774_v38 = vadd.f32 1e-06, %v4768_v37 }
0x27fd   : > { %9890 = vrsqrt.f32 %v4774_v38 }
0x280a   : > { %v9891_v44 = vpop.eup %9890 }
0x280b   : > { %v4776_v45 = vmul.f32 %v9891_v44, %v4773_v43 }
0x280d   : > { %v4781_v46 = vadd.f32 %v4780_v42, %v4776_v45 }
0x280f   : > { %9458 = vmatmul.mubr.msk.f32.vlgmr.msra.gmra.mxu0 %vm1073_vm0, %v4781_v46  ;;  %v8829_v46 = vld [vmem:[%s11407_s7] ss:$0 sm:$0xff]  ;;  %s11409_s7 = sld [smem:[#allocation31_spill]] }
0x2810   : > { %9473 = vmatprep.mubr.msk.f32.mxu0 %vm10046_vm1, %v10045_v8 }
0x2815   : > { %s11410_s4 = smov %s11409_s7 }
0x2842   : > { %v4936_v48 = vpop.f32.mrf.mxu1 }
0x2843   : > { %v10803_v49 = vadd.f32 %v8823_v47, %v4936_v48 }
0x2844   : > { %v9470_v50 = vpop.f32.mrf.mxu1 }
0x2845   : > { %5028 = vrot.lane.b32.xlu1 %v10803_v49, %s11383_s23  ;;  %9472 = vmatpush3.xpose.msk.msra.mxu0 %vm1180_vm2, %v10803_v49 }
0x2846   : > { %9481 = vmatprep.subr.mxu0 %v10045_v8 }
0x2849   : > { %5186 = vrot.lane.b32.xlu1 %v10803_v49, %s11385_s22 }
0x28b7   : > { %v5029_v51 = vpop.permute.xlu1 %5028 }
0x28b8   : > { %9477 = vmatpush3.msra.mxu1 %v5029_v51 }
0x28b9   : > { %9486 = vmatprep.subr.mxu1 %v10045_v8 }
0x28bb   : > { %v5187_v62 = vpop.permute.xlu1 %5186 }
0x28cf   : > { %v4857_v24 = vpop.f32.mrf.mxu0 }
0x28d0   : > { %v10814_v28 = vadd.f32 %v8821_v52, %v4857_v24 }
0x28d1   : > { %v9459_v53 = vpop.f32.mrf.mxu0 }
0x28d2   : > { %9474 = vmatmul.mubr.msk.f32.vlgmr.msra.gmra.mxu0 %vm1180_vm2, %v10814_v28 }
0x28d3   : > { %9483 = vmatprep.mubr.msk.f32.mxu0 %vm10046_vm1, %v10045_v8  ;;  %9482 = vmatpush3.msra.mxu0 %v4753_v5  ;;  %v4756_v5 = vld [vmem:[%s11406_s1 + $0x18] sm:$0xff] }
0x28d4   : > { %9491 = vmatprep.subr.mxu0 %v10045_v8 }
0x2992   : > { %v5012_v54 = vpop.f32.mrf.mxu0 }
0x2993   : > { %v5016_v55 = vsel %vm10339_vm4, %v5012_v54, -1e+09 }
0x2994   : > { %v9475_v56 = vpop.f32.mrf.mxu0  ;;  %v5017_v57 = vsel %vm1180_vm2, %v5016_v55, -inf }
0x2995   : > { %5018 = vmax.xlane.f32.xlu0 %v5017_v57 }
0x2a1e   : > { %v5019_v27 = vpop.xlane.xlu0 %5018 }
0x2a1f   : > { %v5020_v30 = vsub.f32 %v5016_v55, %v5019_v27  ;;  %v4755_v55 = vld [vmem:[%s11406_s1 + $0x10] sm:$0xff] }
0x2a21   : > { %v5021_v58 = vmul.f32 1.442695, %v5020_v30 }
0x2a23   : > { %9892 = vpow2.f32 %v5021_v58 }
0x2a30   : > { %v9893_v59 = vpop.eup %9892 }
0x2a31   : > { %v5023_v60 = vsel %vm1180_vm2, %v9893_v59, 0.0 }
0x2a32   : > { %5024 = vadd.xlane.f32.xlu1 %v5023_v60 }
0x2a43   : > { %5184 = vrot.lane.b32.xlu1 %v10814_v28, %s11385_s22 }
0x2abb   : > { %v5025_v63 = vpop.xlane.xlu1 %5024 }
0x2abc   : > { %9894 = vrcp.f32 %v5025_v63 }
0x2abf   : > { %v5185_v4 = vpop.permute.xlu1 %5184 }
0x2ac9   : > { %v9895_v1 = vpop.eup %9894 }
0x2aca   : > { %v5027_v2 = vmul.f32 %v9895_v1, %v9893_v59 }
0x2acc   : > { %9479 = vmatmul.mubr.msk.f32.vlgmr.msra.gmra.mxu1 %vm1180_vm2, %v5027_v2 }
0x2acd   : > { %9487 = vmatpush3.xpose.msk.msra.mxu1 %vm1180_vm2, %v5187_v62  ;;  %9488 = vmatprep.mubr.msk.f32.mxu1 %vm10046_vm1, %v10045_v8 }
0x2ace   : > { %9496 = vmatprep.subr.mxu1 %v10045_v8 }
0x2ad0   : > { %9489 = vmatmul.mubr.msk.f32.vlgmr.msra.gmra.mxu1 %vm1180_vm2, %v5185_v4 }
0x2ad1   : > { %9498 = vmatprep.mubr.msk.f32.mxu1 %vm10046_vm1, %v10045_v8  ;;  %9497 = vmatpush3.msra.mxu1 %v4754_v19 }
0x2ad2   : > { %9506 = vmatprep.subr.mxu1 %v10045_v8 }
0x2b8c   : > { %v5100_v0 = vpop.f32.mrf.mxu1 }
0x2b8d   : > { %9484 = vmatmul.mubr.msk.f32.vlgmr.msra.gmra.mxu0 %vm1180_vm2, %v5100_v0 }
0x2b8e   : > { %v9480_v6 = vpop.f32.mrf.mxu1  ;;  %9493 = vmatprep.mubr.msk.f32.mxu0 %vm10046_vm1, %v10045_v8 }
0x2b90   : > { %v5258_v7 = vpop.f32.mrf.mxu1 }
0x2b91   : > { %v5262_v9 = vsel %vm10339_vm4, %v5258_v7, -1e+09 }
0x2b92   : > { %v9490_v29 = vpop.f32.mrf.mxu1  ;;  %v5263_v10 = vsel %vm1180_vm2, %v5262_v9, -inf }
0x2b93   : > { %5264 = vmax.xlane.f32.xlu0 %v5263_v10 }
0x2ba9   : > { %5274 = vrot.lane.b32.xlu0 %v10803_v49, %s11384_s2 }
0x2bad   : > { %5426 = vrot.lane.b32.xlu0 %v10803_v49, %s11388_s13 }
0x2bb1   : > { %5424 = vrot.lane.b32.xlu0 %v10814_v28, %s11388_s13 }
0x2c1c   : > { %v5265_v11 = vpop.xlane.xlu0 %5264 }
0x2c1d   : > { %v5266_v12 = vsub.f32 %v5262_v9, %v5265_v11 }
0x2c1f   : > { %v5267_v13 = vmul.f32 1.442695, %v5266_v12 }
0x2c20   : > { %v5275_v14 = vpop.permute.xlu0 %5274 }
0x2c21   : > { %9896 = vpow2.f32 %v5267_v13  ;;  %9492 = vmatpush3.msra.mxu0 %v5275_v14 }
0x2c22   : > { %9501 = vmatprep.subr.mxu0 %v10045_v8 }
0x2c24   : > { %v5427_v23 = vpop.permute.xlu0 %5426 }
0x2c28   : > { %v5425_v26 = vpop.permute.xlu0 %5424 }
0x2c2e   : > { %v9897_v15 = vpop.eup %9896 }
0x2c2f   : > { %v5269_v16 = vsel %vm1180_vm2, %v9897_v15, 0.0 }
0x2c30   : > { %5270 = vadd.xlane.f32.xlu1 %v5269_v16 }
0x2c41   : > { %5514 = vrot.lane.b32.xlu1 %v10803_v49, %s11389_s21 }
0x2c45   : > { %5666 = vrot.lane.b32.xlu1 %v10803_v49, %s11391_s26 }
0x2c4d   : > { %v5173_v18 = vpop.f32.mrf.mxu0 }
0x2c4e   : > { %v5183_v47 = vadd.f32 %v8829_v46, %v5173_v18 }
0x2c4f   : > { %v9485_v21 = vpop.f32.mrf.mxu0 }
0x2cb9   : > { %v5271_v22 = vpop.xlane.xlu1 %5270 }
0x2cba   : > { %9898 = vrcp.f32 %v5271_v22 }
0x2cbd   : > { %v5515_v33 = vpop.permute.xlu1 %5514 }
0x2cc1   : > { %v5667_v52 = vpop.permute.xlu1 %5666 }
0x2cc7   : > { %v9899_v61 = vpop.eup %9898 }
0x2cc8   : > { %v5273_v25 = vmul.f32 %v9899_v61, %v9897_v15 }
0x2cca   : > { %9494 = vmatmul.mubr.msk.f32.vlgmr.msra.gmra.mxu0 %vm1180_vm2, %v5273_v25  ;;  %v5907_v25 = vld [vmem:[%s11410_s4 + $0x10] sm:$0xff] }
0x2ccb   : > { %9502 = vmatpush3.xpose.msk.msra.mxu0 %vm1180_vm2, %v5427_v23  ;;  %9503 = vmatprep.mubr.msk.f32.mxu0 %vm10046_vm1, %v10045_v8  ;;  %v5908_v23 = vld [vmem:[%s11409_s7 + $0x18] sm:$0xff] }
0x2ccc   : > { %9511 = vmatprep.subr.mxu0 %v10045_v8 }
0x2cce   : > { %9504 = vmatmul.mubr.msk.f32.vlgmr.msra.gmra.mxu0 %vm1180_vm2, %v5425_v26  ;;  %v5905_v26 = vld [vmem:[%s11410_s4] sm:$0xff] }
0x2ccf   : > { %9513 = vmatprep.mubr.msk.f32.mxu0 %vm10046_vm1, %v10045_v8  ;;  %9512 = vmatpush3.msra.mxu0 %v4755_v55 }
0x2cd0   : > { %9521 = vmatprep.subr.mxu0 %v10045_v8 }
0x2d8a   : > { %v5346_v31 = vpop.f32.mrf.mxu0 }
0x2d8b   : > { %9499 = vmatmul.mubr.msk.f32.vlgmr.msra.gmra.mxu1 %vm1180_vm2, %v5346_v31  ;;  %v5917_v31 = vld [vmem:[%s11411_s15 + $0x38] sm:$0xff]  ;;  %s11413_s15 = sld [smem:[#allocation32_spill]] }
0x2d8c   : > { %9507 = vmatpush3.msra.mxu1 %v5515_v33  ;;  %v9495_v35 = vpop.f32.mrf.mxu0  ;;  %9508 = vmatprep.mubr.msk.f32.mxu1 %vm10046_vm1, %v10045_v8  ;;  %v5916_v33 = vld [vmem:[%s11412_s0 + $0x30] sm:$0xff] }
0x2d8d   : > { %9516 = vmatprep.subr.mxu1 %v10045_v8  ;;  %v5915_v35 = vld [vmem:[%s11412_s0 + $0x28] sm:$0xff] }
0x2d8e   : > { %v5498_v39 = vpop.f32.mrf.mxu0 }
0x2d8f   : > { %v5502_v37 = vsel %vm10339_vm4, %v5498_v39, -1e+09  ;;  %v5914_v39 = vld [vmem:[%s11412_s0 + $0x20] sm:$0xff] }
0x2d90   : > { %v9505_v38 = vpop.f32.mrf.mxu0  ;;  %v5503_v40 = vsel %vm1180_vm2, %v5502_v37, -inf }
0x2d91   : > { %5504 = vmax.xlane.f32.xlu0 %v5503_v40  ;;  %s11414_s27 = smov %s11413_s15 }
0x2e1a   : > { %v5505_v41 = vpop.xlane.xlu0 %5504 }
0x2e1b   : > { %v5506_v42 = vsub.f32 %v5502_v37, %v5505_v41  ;;  %v5913_v37 = vld [vmem:[%s11412_s0 + $0x18] sm:$0xff] }
0x2e1d   : > { %v5507_v43 = vmul.f32 1.442695, %v5506_v42  ;;  %v5919_v42 = vld [vmem:[%s10223_s20] sm:$0x3] }
0x2e1f   : > { %9900 = vpow2.f32 %v5507_v43  ;;  %v5933_v43 = vrot.slane %v5919_v42, %v10312_v17 }
0x2e2c   : > { %v9901_v44 = vpop.eup %9900 }
0x2e2d   : > { %v5509_v45 = vsel %vm1180_vm2, %v9901_v44, 0.0 }
0x2e2e   : > { %5510 = vadd.xlane.f32.xlu1 %v5509_v45 }
0x2e3f   : > { %5664 = vrot.lane.b32.xlu1 %v10814_v28, %s11391_s26 }
0x2e4b   : > { %v5419_v48 = vpop.f32.mrf.mxu1 }
0x2e4c   : > { %v5423_v50 = vadd.f32 %v5419_v48, %v5183_v47 }
0x2e4d   : > { %v9500_v51 = vpop.f32.mrf.mxu1 }
0x2e4e   : > { %v5911_v51 = vld [vmem:[%s11412_s0 + $0x8] sm:$0xff] }
0x2eb7   : > { %v5511_v24 = vpop.xlane.xlu1 %5510 }
0x2eb8   : > { %9902 = vrcp.f32 %v5511_v24  ;;  %v8842_v24 = vld [vmem:[%s11413_s15] ss:$0 sm:$0xff]  ;;  %s10059_s15 = smov [#allocation2]  }
0x2ebb   : > { %v5665_v28 = vpop.permute.xlu1 %5664 }
0x2ec5   : > { %v9903_v53 = vpop.eup %9902 }
0x2ec6   : > { %v5513_v54 = vmul.f32 %v9903_v53, %v9901_v44  ;;  %v5941_v44 = vrot.slane %v5919_v42, %v10316_v20 }
0x2ec8   : > { %9509 = vmatmul.mubr.msk.f32.vlgmr.msra.gmra.mxu1 %vm1180_vm2, %v5513_v54 }
0x2ec9   : > { %9517 = vmatpush3.xpose.msk.msra.mxu1 %vm1180_vm2, %v5667_v52  ;;  %9518 = vmatprep.mubr.msk.f32.mxu1 %vm10046_vm1, %v10045_v8  ;;  %v5910_v52 = vld [vmem:[%s11412_s0] sm:$0xff] }
0x2eca   : > { %9526 = vmatprep.subr.mxu1 %v10045_v8 }
0x2ecc   : > { %9519 = vmatmul.mubr.msk.f32.vlgmr.msra.gmra.mxu1 %vm1180_vm2, %v5665_v28 }
0x2ecd   : > { %9528 = vmatprep.mubr.msk.f32.mxu1 %vm10046_vm1, %v10045_v8  ;;  %9527 = vmatpush3.msra.mxu1 %v4756_v5  ;;  %v8848_v5 = vld [vmem:[%s11395_s29 + $0x30] sm:$0xff] }
0x2ece   : > { %9542 = vmatprep.subr.mxu1 %v10045_v8 }
0x2f88   : > { %v5586_v56 = vpop.f32.mrf.mxu1 }
0x2f89   : > { %9514 = vmatmul.mubr.msk.f32.vlgmr.msra.gmra.mxu0 %vm1180_vm2, %v5586_v56  ;;  %v8845_v56 = vld [vmem:[%s10218_s12] ss:$0 sm:$0xff] }
0x2f8a   : > { %v9510_v57 = vpop.f32.mrf.mxu1  ;;  %9523 = vmatprep.mubr.msk.f32.mxu0 %vm10046_vm1, %v10045_v8 }
0x2f8c   : > { %v5738_v27 = vpop.f32.mrf.mxu1 }
0x2f8d   : > { %v5742_v30 = vsel %vm10339_vm4, %v5738_v27, -1e+09 }
0x2f8e   : > { %v9520_v58 = vpop.f32.mrf.mxu1  ;;  %v5743_v59 = vsel %vm1180_vm2, %v5742_v30, -inf }
0x2f8f   : > { %5744 = vmax.xlane.f32.xlu0 %v5743_v59 }
0x2fa5   : > { %5754 = vrot.lane.b32.xlu0 %v10803_v49, %s11392_s11 }
0x3018   : > { %v5745_v60 = vpop.xlane.xlu0 %5744 }
0x3019   : > { %v5746_v62 = vsub.f32 %v5742_v30, %v5745_v60 }
0x301b   : > { %v5747_v63 = vmul.f32 1.442695, %v5746_v62 }
0x301c   : > { %v5755_v1 = vpop.permute.xlu0 %5754 }
0x301d   : > { %9904 = vpow2.f32 %v5747_v63  ;;  %9522 = vmatpush3.msra.mxu0 %v5755_v1 }
0x301e   : > { %9531 = vmatprep.subr.mxu0 %v10045_v8 }
0x302a   : > { %v9905_v2 = vpop.eup %9904 }
0x302b   : > { %v5749_v4 = vsel %vm1180_vm2, %v9905_v2, 0.0 }
0x302c   : > { %5750 = vadd.xlane.f32.xlu1 %v5749_v4  ;;  %v8849_v4 = vld [vmem:[%s11395_s29 + $0x38] sm:$0xff] }
0x3049   : > { %v5659_v0 = vpop.f32.mrf.mxu0 }
0x304a   : > { %v5663_v6 = vadd.f32 %v5659_v0, %v5423_v50  ;;  %v5912_v50 = vld [vmem:[%s11412_s0 + $0x10] sm:$0xff]  ;;  %v8847_v0 = vld [vmem:[%s11395_s29 + $0x28] sm:$0xff] }
0x304b   : > { %v9515_v7 = vpop.f32.mrf.mxu0 }
0x30b5   : > { %v5751_v49 = vpop.xlane.xlu1 %5750 }
0x30b6   : > { %9906 = vrcp.f32 %v5751_v49 }
0x30c3   : > { %v9907_v9 = vpop.eup %9906 }
0x30c4   : > { %v5753_v29 = vmul.f32 %v9907_v9, %v9905_v2 }
0x30c6   : > { %9524 = vmatmul.mubr.msk.f32.vlgmr.msra.gmra.mxu0 %vm1180_vm2, %v5753_v29  ;;  %v8856_v29 = vld [vmem:[%s10163_s17 + $0x2] sm:$0x3] }
0x30c7   : > { %9539 = vmatprep.mubr.msk.f32.mxu0 %vm10046_vm1, %v10045_v8  ;;  %9532 = vmatpush3.msra.mxu0 %v5908_v23 }
0x30c8   : > { %9533 = vmatprep.subr.mxu0 %v10045_v8 }
0x30c9   : > { %9534 = vmatpush3.msra.mxu0 %v5907_v25 }
0x30ca   : > { %9535 = vmatprep.subr.mxu0 %v10045_v8 }
0x3186   : > { %v5826_v10 = vpop.f32.mrf.mxu0 }
0x3187   : > { %9529 = vmatmul.mubr.msk.f32.vlgmr.msra.gmra.mxu1 %vm1180_vm2, %v5826_v10  ;;  %v6133_v10 = vrot.slane %v8856_v29, %v10312_v17 }
0x3188   : > { %v9525_v11 = vpop.f32.mrf.mxu0  ;;  %9558 = vmatprep.mubr.msk.f32.mxu1 %vm10046_vm1, %v10045_v8  ;;  %9543 = vmatpush3.msra.mxu1 %v5917_v31 }
0x3189   : > { %9544 = vmatprep.subr.mxu1 %v10045_v8  ;;  %v6141_v11 = vrot.slane %v8856_v29, %v10316_v20 }
0x318a   : > { %9545 = vmatpush3.msra.mxu1 %v5916_v33 }
0x318b   : > { %9546 = vmatprep.subr.mxu1 %v10045_v8 }
0x318c   : > { %9547 = vmatpush3.msra.mxu1 %v5915_v35 }
0x318d   : > { %9548 = vmatprep.subr.mxu1 %v10045_v8 }
0x318e   : > { %9549 = vmatpush3.msra.mxu1 %v5914_v39 }
0x318f   : > { %9550 = vmatprep.subr.mxu1 %v10045_v8 }
0x3190   : > { %9551 = vmatpush3.msra.mxu1 %v5913_v37 }
0x3191   : > { %9552 = vmatprep.subr.mxu1 %v10045_v8 }
0x3192   : > { %9553 = vmatpush3.msra.mxu1 %v5912_v50 }
0x3193   : > { %9554 = vmatprep.subr.mxu1 %v10045_v8 }
0x3194   : > { %9555 = vmatpush3.msra.mxu1 %v5911_v51 }
0x3195   : > { %9556 = vmatprep.subr.mxu1 %v10045_v8 }
0x3196   : > { %9557 = vmatpush3.msra.mxu1 %v5910_v52 }
0x3197   : > { %9577 = vmatprep.subr.mxu1 %v10045_v8 }
0x3247   : > { %v5899_v12 = vpop.f32.mrf.mxu1 }
0x3248   : > { %v5903_v13 = vadd.f32 %v5899_v12, %v5663_v6  ;;  %v8846_v6 = vld [vmem:[%s11395_s29 + $0x20] sm:$0xff] }
0x3249   : > { %v9530_v14 = vpop.f32.mrf.mxu1 }
0x324a   : > { %v10904_v15 = vadd.f32 %v5903_v13, %v10764_v3  ;;  %v5906_v3 = vld [vmem:[%s11410_s4 + $0x8] sm:$0xff] }
0x324b   : > { %9536 = vmatpush3.msra.mxu0 %v5906_v3 }
0x324c   : > { %v5920_v16 = vsel %vm1073_vm0, %v10904_v15, 0.0  ;;  %9537 = vmatprep.subr.mxu0 %v10045_v8 }
0x324d   : > { %5921 = vadd.xlane.f32.xlu0 %v5920_v16  ;;  %9538 = vmatpush3.msra.mxu0 %v5905_v26  ;;  %v8857_v16 = vld [vmem:[%s11396_s6 + $0x1] ss:$0 sm:$0xff] }
0x324e   : > { %9561 = vmatprep.subr.mxu0 %v10045_v8 }
0x32d6   : > { %v5922_v18 = vpop.xlane.xlu0 %5921 }
0x32d7   : > { %v5923_v19 = vmul.f32 0.03125, %v5922_v18 }
0x32d9   : > { %v5924_v21 = vsub.f32 %v10904_v15, %v5923_v19 }
0x32db   : > { %v5925_v22 = vmul.f32 %v5924_v21, %v5924_v21  ;;  %v5934_v45 = vmul.f32 %v5933_v43, %v5924_v21 }
0x32dd   : > { %v5926_v61 = vsel %vm1073_vm0, %v5925_v22, 0.0 }
0x32de   : > { %5927 = vadd.xlane.f32.xlu1 %v5926_v61 }
0x3367   : > { %v5928_v38 = vpop.xlane.xlu1 %5927 }
0x3368   : > { %v5929_v40 = vmul.f32 0.03125, %v5928_v38 }
0x336a   : > { %v5935_v41 = vadd.f32 1e-06, %v5929_v40 }
0x336c   : > { %9908 = vrsqrt.f32 %v5935_v41 }
0x3379   : > { %v9909_v46 = vpop.eup %9908 }
0x337a   : > { %v5937_v47 = vmul.f32 %v9909_v46, %v5934_v45 }
0x337c   : > { %v5942_v48 = vadd.f32 %v5941_v44, %v5937_v47  ;;  %v8851_v44 = vld [vmem:[%s11398_s9 + $0x20] sm:$0xff] }
0x337e   : > { %9540 = vmatmul.mubr.msk.f32.vlgmr.msra.gmra.mxu0 %vm1073_vm0, %v5942_v48 }
0x337f   : > { %9569 = vmatprep.mubr.msk.f32.mxu0 %vm10046_vm1, %v10045_v8  ;;  %9562 = vmatpush3.msra.mxu0 %v8849_v4 }
0x3380   : > { %9563 = vmatprep.subr.mxu0 %v10045_v8 }
0x3381   : > { %9564 = vmatpush3.msra.mxu0 %v8848_v5 }
0x3382   : > { %9565 = vmatprep.subr.mxu0 %v10045_v8 }
0x3383   : > { %9566 = vmatpush3.msra.mxu0 %v8847_v0 }
0x3384   : > { %9567 = vmatprep.subr.mxu0 %v10045_v8 }
0x3385   : > { %9568 = vmatpush3.msra.mxu0 %v8846_v6 }
0x3386   : > { %9572 = vmatprep.subr.mxu0 %v10045_v8 }
0x343e   : > { %v6018_v53 = vpop.f32.mrf.mxu0 }
0x343f   : > { %v6019_v54 = vadd.f32 %v8842_v24, %v6018_v53 }
0x3440   : > { %v9541_v28 = vpop.f32.mrf.mxu0 }
0x3441   : > { %v6022_v55 = vmax.f32 %v6019_v54, 0.0 }
0x3443   : > { %9559 = vmatmul.mubr.msk.f32.vlgmr.msra.gmra.mxu1 %vm2269_vm5, %v6022_v55 }
0x3444   : > { %9579 = vmatprep.mubr.msk.f32.mxu1 %vm10046_vm1, %v10045_v8 }
0x3503   : > { %v6092_v57 = vpop.f32.mrf.mxu1 }
0x3504   : > { %v6096_v27 = vadd.f32 %v6092_v57, %v10904_v15 }
0x3505   : > { %v9560_v30 = vpop.f32.mrf.mxu1 }
0x3506   : > { %v10946_v58 = vadd.f32 %v8845_v56, %v6096_v27 }
0x3508   : > { %v6120_v59 = vsel %vm1073_vm0, %v10946_v58, 0.0 }
0x3509   : > { %6121 = vadd.xlane.f32.xlu1 %v6120_v59 }
0x3592   : > { %v6122_v60 = vpop.xlane.xlu1 %6121 }
0x3593   : > { %v6123_v62 = vmul.f32 0.03125, %v6122_v60 }
0x3595   : > { %v6124_v63 = vsub.f32 %v10946_v58, %v6123_v62 }
0x3597   : > { %v6125_v1 = vmul.f32 %v6124_v63, %v6124_v63  ;;  %v6134_v12 = vmul.f32 %v6133_v10, %v6124_v63  ;;  %v8852_v63 = vld [vmem:[%s11398_s9 + $0x28] sm:$0xff] }
0x3599   : > { %v6126_v2 = vsel %vm1073_vm0, %v6125_v1, 0.0 }
0x359a   : > { %6127 = vadd.xlane.f32.xlu1 %v6126_v2 }
0x3623   : > { %v6128_v7 = vpop.xlane.xlu1 %6127 }
0x3624   : > { %v6129_v49 = vmul.f32 0.03125, %v6128_v7 }
0x3626   : > { %v6135_v9 = vadd.f32 1e-06, %v6129_v49 }
0x3628   : > { %9910 = vrsqrt.f32 %v6135_v9 }
0x3635   : > { %v9911_v13 = vpop.eup %9910 }
0x3636   : > { %v6137_v14 = vmul.f32 %v9911_v13, %v6134_v12  ;;  %v8863_v12 = vld [vmem:[%s11399_s14 + $0x1] ss:$0 sm:$0xff] }
0x3638   : > { %v6142_v15 = vadd.f32 %v6141_v11, %v6137_v14 }
0x363a   : > { %9570 = vmatmul.mubr.msk.f32.vlgmr.msra.gmra.mxu0 %vm1073_vm0, %v6142_v15 }
0x363b   : > { %9574 = vmatprep.mubr.msk.f32.mxu0 %vm10046_vm1, %v10045_v8 }
0x36fa   : > { %v6218_v18 = vpop.f32.mrf.mxu0 }
0x36fb   : > { %v10967_v19 = vadd.f32 %v8857_v16, %v6218_v18 }
0x36fc   : > { %v9571_v21 = vpop.f32.mrf.mxu0 }
0x36fd   : > { %6223 = vrot.lane.b32.xlu1 %v10967_v19, %s11383_s23 }
0x3701   : > { %6469 = vrot.lane.b32.xlu1 %v10967_v19, %s11384_s2 }
0x3705   : > { %6467 = vrot.lane.b32.xlu1 %v10967_v19, %s11385_s22 }
0x376f   : > { %v6224_v22 = vpop.permute.xlu1 %6223 }
0x3770   : > { %9573 = vmatpush3.xpose.msk.msra.mxu0 %vm1180_vm2, %v6224_v22 }
0x3771   : > { %9582 = vmatprep.subr.mxu0 %v10045_v8 }
0x3773   : > { %9575 = vmatmul.mubr.msk.f32.vlgmr.msra.gmra.mxu0 %vm1180_vm2, %v10967_v19  ;;  %v6470_v41 = vpop.permute.xlu1 %6469 }
0x3774   : > { %9584 = vmatprep.mubr.msk.f32.mxu0 %vm10046_vm1, %v10045_v8  ;;  %9583 = vmatpush3.msra.mxu0 %v8851_v44 }
0x3775   : > { %9592 = vmatprep.subr.mxu0 %v10045_v8 }
0x3777   : > { %v6468_v43 = vpop.permute.xlu1 %6467 }
0x3833   : > { %v6295_v61 = vpop.f32.mrf.mxu0 }
0x3834   : > { %v6299_v23 = vsel %vm3853_vm6, %v6295_v61, -1e+09 }
0x3835   : > { %v9576_v25 = vpop.f32.mrf.mxu0  ;;  %v6300_v3 = vsel %vm1180_vm2, %v6299_v23, -inf }
0x3836   : > { %6301 = vmax.xlane.f32.xlu0 %v6300_v3  ;;  %v8853_v25 = vld [vmem:[%s11398_s9 + $0x30] sm:$0xff] }
0x38bf   : > { %v6302_v26 = vpop.xlane.xlu0 %6301 }
0x38c0   : > { %v6303_v31 = vsub.f32 %v6299_v23, %v6302_v26 }
0x38c2   : > { %v6304_v33 = vmul.f32 1.442695, %v6303_v31 }
0x38c4   : > { %9912 = vpow2.f32 %v6304_v33 }
0x38d1   : > { %v9913_v35 = vpop.eup %9912 }
0x38d2   : > { %v6306_v39 = vsel %vm1180_vm2, %v9913_v35, 0.0 }
0x38d3   : > { %6307 = vadd.xlane.f32.xlu0 %v6306_v39 }
0x38e9   : > { %6311 = vrot.lane.b32.xlu0 %v10967_v19, %s11386_s5  ;;  %s11415_s5 = sld [smem:[#allocation34_spill]] }
0x395c   : > { %v6308_v37 = vpop.xlane.xlu0 %6307 }
0x395d   : > { %9914 = vrcp.f32 %v6308_v37 }
0x3960   : > { %v6312_v38 = vpop.permute.xlu0 %6311 }
0x3961   : > { %9578 = vmatpush3.msra.mxu1 %v6312_v38 }
0x3962   : > { %9587 = vmatprep.subr.mxu1 %v10045_v8 }
0x396a   : > { %v9915_v40 = vpop.eup %9914 }
0x396b   : > { %v6310_v42 = vmul.f32 %v9915_v40, %v9913_v35 }
0x396d   : > { %9580 = vmatmul.mubr.msk.f32.vlgmr.msra.gmra.mxu1 %vm1180_vm2, %v6310_v42 }
0x396e   : > { %9588 = vmatpush3.xpose.msk.msra.mxu1 %vm1180_vm2, %v6470_v41  ;;  %9589 = vmatprep.mubr.msk.f32.mxu1 %vm10046_vm1, %v10045_v8 }
0x396f   : > { %9597 = vmatprep.subr.mxu1 %v10045_v8 }
0x3971   : > { %9590 = vmatmul.mubr.msk.f32.vlgmr.msra.gmra.mxu1 %vm1180_vm2, %v6468_v43  ;;  %v8854_v43 = vld [vmem:[%s11398_s9 + $0x38] sm:$0xff] }
0x3972   : > { %9599 = vmatprep.mubr.msk.f32.mxu1 %vm10046_vm1, %v10045_v8  ;;  %9598 = vmatpush3.msra.mxu1 %v8852_v63 }
0x3973   : > { %9607 = vmatprep.subr.mxu1 %v10045_v8 }
0x3a2d   : > { %v6383_v45 = vpop.f32.mrf.mxu1 }
0x3a2e   : > { %9585 = vmatmul.mubr.msk.f32.vlgmr.msra.gmra.mxu0 %vm1180_vm2, %v6383_v45 }
0x3a2f   : > { %v9581_v46 = vpop.f32.mrf.mxu1  ;;  %9594 = vmatprep.mubr.msk.f32.mxu0 %vm10046_vm1, %v10045_v8 }
0x3a31   : > { %v6541_v47 = vpop.f32.mrf.mxu1 }
0x3a32   : > { %v6545_v48 = vsel %vm3853_vm6, %v6541_v47, -1e+09 }
0x3a33   : > { %v6546_v50 = vsel %vm1180_vm2, %v6545_v48, -inf  ;;  %v9591_v51 = vpop.f32.mrf.mxu1 }
0x3a34   : > { %6547 = vmax.xlane.f32.xlu1 %v6546_v50  ;;  %v8884_v50 = vld [vmem:[%s11400_s16 + $0x38] sm:$0xff] }
0x3a45   : > { %6557 = vrot.lane.b32.xlu1 %v10967_v19, %s11387_s8 }
0x3a49   : > { %6707 = vrot.lane.b32.xlu1 %v10967_v19, %s11388_s13 }
0x3abd   : > { %v6548_v52 = vpop.xlane.xlu1 %6547 }
0x3abe   : > { %v6549_v24 = vsub.f32 %v6545_v48, %v6548_v52  ;;  %v8883_v52 = vld [vmem:[%s11400_s16 + $0x30] sm:$0xff] }
0x3ac0   : > { %v6550_v53 = vmul.f32 1.442695, %v6549_v24 }
0x3ac1   : > { %v6558_v54 = vpop.permute.xlu1 %6557 }
0x3ac2   : > { %9916 = vpow2.f32 %v6550_v53  ;;  %9593 = vmatpush3.msra.mxu0 %v6558_v54  ;;  %v8882_v53 = vld [vmem:[%s11400_s16 + $0x28] sm:$0xff]  ;;  %v8881_v54 = vld [vmem:[%s11400_s16 + $0x20] sm:$0xff] }
0x3ac3   : > { %9602 = vmatprep.subr.mxu0 %v10045_v8 }
0x3ac5   : > { %v6708_v62 = vpop.permute.xlu1 %6707 }
0x3acf   : > { %v9917_v28 = vpop.eup %9916 }
0x3ad0   : > { %v6552_v55 = vsel %vm1180_vm2, %v9917_v28, 0.0 }
0x3ad1   : > { %6553 = vadd.xlane.f32.xlu0 %v6552_v55 }
0x3ae7   : > { %6709 = vrot.lane.b32.xlu0 %v10967_v19, %s11389_s21 }
0x3aee   : > { %v6456_v56 = vpop.f32.mrf.mxu0 }
0x3aef   : > { %v6466_v13 = vadd.f32 %v8863_v12, %v6456_v56 }
0x3af0   : > { %v9586_v57 = vpop.f32.mrf.mxu0 }
0x3b5a   : > { %v6554_v27 = vpop.xlane.xlu0 %6553 }
0x3b5b   : > { %9918 = vrcp.f32 %v6554_v27 }
0x3b5e   : > { %v6710_v60 = vpop.permute.xlu0 %6709 }
0x3b68   : > { %v9919_v30 = vpop.eup %9918 }
0x3b69   : > { %v6556_v59 = vmul.f32 %v9919_v30, %v9917_v28  ;;  %v8894_v30 = vld [vmem:[%s11404_s19 + $0x1] ss:$0 sm:$0xff] }
0x3b6b   : > { %9595 = vmatmul.mubr.msk.f32.vlgmr.msra.gmra.mxu0 %vm1180_vm2, %v6556_v59 }
0x3b6c   : > { %9603 = vmatpush3.xpose.msk.msra.mxu0 %vm1180_vm2, %v6710_v60  ;;  %9604 = vmatprep.mubr.msk.f32.mxu0 %vm10046_vm1, %v10045_v8 }
0x3b6d   : > { %9612 = vmatprep.subr.mxu0 %v10045_v8 }
0x3b6f   : > { %9605 = vmatmul.mubr.msk.f32.vlgmr.msra.gmra.mxu0 %vm1180_vm2, %v6708_v62 }
0x3b70   : > { %9614 = vmatprep.mubr.msk.f32.mxu0 %vm10046_vm1, %v10045_v8  ;;  %9613 = vmatpush3.msra.mxu0 %v8853_v25 }
0x3b71   : > { %9622 = vmatprep.subr.mxu0 %v10045_v8 }
0x3c2b   : > { %v6629_v1 = vpop.f32.mrf.mxu0 }
0x3c2c   : > { %9600 = vmatmul.mubr.msk.f32.vlgmr.msra.gmra.mxu1 %vm1180_vm2, %v6629_v1 }
0x3c2d   : > { %v9596_v2 = vpop.f32.mrf.mxu0  ;;  %9609 = vmatprep.mubr.msk.f32.mxu1 %vm10046_vm1, %v10045_v8 }
0x3c2f   : > { %v6781_v4 = vpop.f32.mrf.mxu0 }
0x3c30   : > { %v6785_v5 = vsel %vm3853_vm6, %v6781_v4, -1e+09  ;;  %v8879_v4 = vld [vmem:[%s11402_s24 + $0x38] sm:$0xff] }
0x3c31   : > { %v6786_v0 = vsel %vm1180_vm2, %v6785_v5, -inf  ;;  %v9606_v6 = vpop.f32.mrf.mxu0 }
0x3c32   : > { %6787 = vmax.xlane.f32.xlu1 %v6786_v0  ;;  %v8877_v0 = vld [vmem:[%s11402_s24 + $0x28] sm:$0xff]  ;;  %v8876_v6 = vld [vmem:[%s11402_s24 + $0x20] sm:$0xff] }
0x3c43   : > { %6797 = vrot.lane.b32.xlu1 %v10967_v19, %s11390_s25  ;;  %s1040_s25 = sand.u32 1, %s10002_s10  }
0x3c47   : > { %6947 = vrot.lane.b32.xlu1 %v10967_v19, %s11391_s26 }
0x3cbb   : > { %v6788_v7 = vpop.xlane.xlu1 %6787 }
0x3cbc   : > { %v6789_v49 = vsub.f32 %v6785_v5, %v6788_v7  ;;  %v8878_v5 = vld [vmem:[%s11402_s24 + $0x30] sm:$0xff] }
0x3cbe   : > { %v6790_v9 = vmul.f32 1.442695, %v6789_v49 }
0x3cbf   : > { %v6798_v29 = vpop.permute.xlu1 %6797 }
0x3cc0   : > { %9920 = vpow2.f32 %v6790_v9  ;;  %9608 = vmatpush3.msra.mxu1 %v6798_v29  ;;  %v8891_v29 = vld [vmem:[%s11403_s30 + $0x2] sm:$0x3] }
0x3cc1   : > { %9617 = vmatprep.subr.mxu1 %v10045_v8 }
0x3cc3   : > { %v6948_v23 = vpop.permute.xlu1 %6947 }
0x3ccd   : > { %v9921_v10 = vpop.eup %9920 }
0x3cce   : > { %v6792_v11 = vsel %vm1180_vm2, %v9921_v10, 0.0 }
0x3ccf   : > { %6793 = vadd.xlane.f32.xlu0 %v6792_v11  ;;  %v7232_v11 = vrot.slane %v8891_v29, %v10316_v20 }
0x3ce5   : > { %6949 = vrot.lane.b32.xlu0 %v10967_v19, %s11392_s11 }
0x3cec   : > { %v6702_v14 = vpop.f32.mrf.mxu1 }
0x3ced   : > { %v6706_v15 = vadd.f32 %v6702_v14, %v6466_v13 }
0x3cee   : > { %v9601_v16 = vpop.f32.mrf.mxu1 }
0x3cef   : > { %v8892_v16 = vld [vmem:[%s11405_s18 + $0x1] ss:$0 sm:$0xff] }
0x3d58   : > { %v6794_v18 = vpop.xlane.xlu0 %6793 }
0x3d59   : > { %9922 = vrcp.f32 %v6794_v18 }
0x3d5c   : > { %v6950_v61 = vpop.permute.xlu0 %6949 }
0x3d66   : > { %v9923_v21 = vpop.eup %9922 }
0x3d67   : > { %v6796_v22 = vmul.f32 %v9923_v21, %v9921_v10  ;;  %v7224_v10 = vrot.slane %v8891_v29, %v10312_v17 }
0x3d69   : > { %9610 = vmatmul.mubr.msk.f32.vlgmr.msra.gmra.mxu1 %vm1180_vm2, %v6796_v22 }
0x3d6a   : > { %9618 = vmatpush3.xpose.msk.msra.mxu1 %vm1180_vm2, %v6950_v61  ;;  %9619 = vmatprep.mubr.msk.f32.mxu1 %vm10046_vm1, %v10045_v8 }
0x3d6b   : > { %9627 = vmatprep.subr.mxu1 %v10045_v8 }
0x3d6d   : > { %9620 = vmatmul.mubr.msk.f32.vlgmr.msra.gmra.mxu1 %vm1180_vm2, %v6948_v23 }
0x3d6e   : > { %9629 = vmatprep.mubr.msk.f32.mxu1 %vm10046_vm1, %v10045_v8  ;;  %9628 = vmatpush3.msra.mxu1 %v8854_v43  ;;  %v8886_v43 = vld [vmem:[%s11406_s1 + $0x20] sm:$0xff] }
0x3d6f   : > { %9643 = vmatprep.subr.mxu1 %v10045_v8 }
0x3e29   : > { %v6869_v3 = vpop.f32.mrf.mxu1 }
0x3e2a   : > { %9615 = vmatmul.mubr.msk.f32.vlgmr.msra.gmra.mxu0 %vm1180_vm2, %v6869_v3 }
0x3e2b   : > { %v9611_v26 = vpop.f32.mrf.mxu1  ;;  %9624 = vmatprep.mubr.msk.f32.mxu0 %vm10046_vm1, %v10045_v8 }
0x3e2d   : > { %v7021_v31 = vpop.f32.mrf.mxu1 }
0x3e2e   : > { %v7025_v33 = vsel %vm3853_vm6, %v7021_v31, -1e+09 }
0x3e2f   : > { %v7026_v35 = vsel %vm1180_vm2, %v7025_v33, -inf  ;;  %v9621_v39 = vpop.f32.mrf.mxu1 }
0x3e30   : > { %7027 = vmax.xlane.f32.xlu1 %v7026_v35 }
0x3e41   : > { %7037 = vrot.lane.b32.xlu1 %v10967_v19, %s11393_s3  ;;  %s8726_s3 = sshll.u32 %s1040_s25, 3 }
0x3eb9   : > { %v7028_v37 = vpop.xlane.xlu1 %7027 }
0x3eba   : > { %v7029_v38 = vsub.f32 %v7025_v33, %v7028_v37 }
0x3ebc   : > { %v7030_v40 = vmul.f32 1.442695, %v7029_v38 }
0x3ebd   : > { %v7038_v41 = vpop.permute.xlu1 %7037 }
0x3ebe   : > { %9924 = vpow2.f32 %v7030_v40  ;;  %9623 = vmatpush3.msra.mxu0 %v7038_v41 }
0x3ebf   : > { %9632 = vmatprep.subr.mxu0 %v10045_v8 }
0x3ecb   : > { %v9925_v42 = vpop.eup %9924 }
0x3ecc   : > { %v7032_v32 = vsel %vm1180_vm2, %v9925_v42, 0.0 }
0x3ecd   : > { %7033 = vadd.xlane.f32.xlu0 %v7032_v32 }
0x3eea   : > { %v6942_v44 = vpop.f32.mrf.mxu0 }
0x3eeb   : > { %v6946_v19 = vadd.f32 %v6942_v44, %v6706_v15 }
0x3eec   : > { %v9616_v45 = vpop.f32.mrf.mxu0 }
0x3f56   : > { %v7034_v46 = vpop.xlane.xlu0 %7033 }
0x3f57   : > { %9926 = vrcp.f32 %v7034_v46 }
0x3f64   : > { %v9927_v47 = vpop.eup %9926 }
0x3f65   : > { %v7036_v48 = vmul.f32 %v9927_v47, %v9925_v42 }
0x3f67   : > { %9625 = vmatmul.mubr.msk.f32.vlgmr.msra.gmra.mxu0 %vm1180_vm2, %v7036_v48 }
0x3f68   : > { %9640 = vmatprep.mubr.msk.f32.mxu0 %vm10046_vm1, %v10045_v8  ;;  %9633 = vmatpush3.msra.mxu0 %v8879_v4 }
0x3f69   : > { %9634 = vmatprep.subr.mxu0 %v10045_v8 }
0x3f6a   : > { %9635 = vmatpush3.msra.mxu0 %v8878_v5 }
0x3f6b   : > { %9636 = vmatprep.subr.mxu0 %v10045_v8 }
0x3f6c   : > { %9637 = vmatpush3.msra.mxu0 %v8877_v0 }
0x3f6d   : > { %9638 = vmatprep.subr.mxu0 %v10045_v8 }
0x3f6e   : > { %9639 = vmatpush3.msra.mxu0 %v8876_v6 }
0x3f6f   : > { %9654 = vmatprep.subr.mxu0 %v10045_v8 }
0x4027   : > { %v7109_v51 = vpop.f32.mrf.mxu0 }
0x4028   : > { %9630 = vmatmul.mubr.msk.f32.vlgmr.msra.gmra.mxu1 %vm1180_vm2, %v7109_v51 }
0x4029   : > { %9644 = vmatpush3.msra.mxu1 %v8884_v50  ;;  %v9626_v24 = vpop.f32.mrf.mxu0  ;;  %9651 = vmatprep.mubr.msk.f32.mxu1 %vm10046_vm1, %v10045_v8 }
0x402a   : > { %9645 = vmatprep.subr.mxu1 %v10045_v8 }
0x402b   : > { %9646 = vmatpush3.msra.mxu1 %v8883_v52 }
0x402c   : > { %9647 = vmatprep.subr.mxu1 %v10045_v8 }
0x402d   : > { %9648 = vmatpush3.msra.mxu1 %v8882_v53 }
0x402e   : > { %9649 = vmatprep.subr.mxu1 %v10045_v8 }
0x402f   : > { %9650 = vmatpush3.msra.mxu1 %v8881_v54 }
0x4030   : > { %9652 = vmatmul.mubr.msk.f32.vlgmr.msra.gmra.mxu1 %vm1073_vm0, %v10786_v34  ;;  %9659 = vmatprep.subr.mxu1 %v10045_v8 }
0x4031   : > { %9661 = vmatprep.mubr.msk.f32.mxu1 %vm10046_vm1, %v10045_v8 }
0x40e8   : > { %v7182_v28 = vpop.f32.mrf.mxu1 }
0x40e9   : > { %v7186_v55 = vadd.f32 %v7182_v28, %v6946_v19 }
0x40ea   : > { %v9631_v56 = vpop.f32.mrf.mxu1 }
0x40eb   : > { %v11078_v57 = vadd.f32 %v7186_v55, %v10946_v58 }
0x40ed   : > { %v7211_v27 = vsel %vm1073_vm0, %v11078_v57, 0.0 }
0x40ee   : > { %7212 = vadd.xlane.f32.xlu0 %v7211_v27 }
0x40f0   : > { %v7385_v34 = vpop.f32.mrf.mxu1 }
0x40f1   : > { %v11083_v59 = vadd.f32 %v8894_v30, %v7385_v34 }
0x40f2   : > { %v9653_v60 = vpop.f32.mrf.mxu1 }
0x40f3   : > { %7635 = vrot.lane.b32.xlu1 %v11083_v59, %s11385_s22 }
0x4165   : > { %v7636_v42 = vpop.permute.xlu1 %7635 }
0x4177   : > { %v7213_v62 = vpop.xlane.xlu0 %7212 }
0x4178   : > { %v7214_v63 = vmul.f32 0.03125, %v7213_v62  ;;  %v8887_v62 = vld [vmem:[%s11406_s1 + $0x28] sm:$0xff] }
0x417a   : > { %v7215_v1 = vsub.f32 %v11078_v57, %v7214_v63 }
0x417c   : > { %v7216_v58 = vmul.f32 %v7215_v1, %v7215_v1  ;;  %v7225_v12 = vmul.f32 %v7224_v10, %v7215_v1  ;;  %v8900_v10 = vld [vmem:[%s11408_s28 + $0x1] ss:$0 sm:$0xff] }
0x417e   : > { %v7217_v2 = vsel %vm1073_vm0, %v7216_v58, 0.0 }
0x417f   : > { %7218 = vadd.xlane.f32.xlu0 %v7217_v2 }
0x4208   : > { %v7219_v7 = vpop.xlane.xlu0 %7218 }
0x4209   : > { %v7220_v49 = vmul.f32 0.03125, %v7219_v7 }
0x420b   : > { %v7226_v9 = vadd.f32 1e-06, %v7220_v49 }
0x420d   : > { %9928 = vrsqrt.f32 %v7226_v9 }
0x421a   : > { %v9929_v13 = vpop.eup %9928 }
0x421b   : > { %v7228_v14 = vmul.f32 %v9929_v13, %v7225_v12 }
0x421d   : > { %v7233_v15 = vadd.f32 %v7232_v11, %v7228_v14 }
0x421f   : > { %9641 = vmatmul.mubr.msk.f32.vlgmr.msra.gmra.mxu0 %vm1073_vm0, %v7233_v15 }
0x4220   : > { %9655 = vmatpush3.xpose.msk.msra.mxu0 %vm1180_vm2, %v11083_v59  ;;  %9656 = vmatprep.mubr.msk.f32.mxu0 %vm10046_vm1, %v10045_v8 }
0x4221   : > { %9664 = vmatprep.subr.mxu0 %v10045_v8 }
0x42df   : > { %v7309_v18 = vpop.f32.mrf.mxu0 }
0x42e0   : > { %v11107_v21 = vadd.f32 %v8892_v16, %v7309_v18 }
0x42e1   : > { %v9642_v22 = vpop.f32.mrf.mxu0 }
0x42e2   : > { %7633 = vrot.lane.b32.xlu1 %v11107_v21, %s11385_s22  ;;  %9657 = vmatmul.mubr.msk.f32.vlgmr.msra.gmra.mxu0 %vm1180_vm2, %v11107_v21 }
0x42e3   : > { %9666 = vmatprep.mubr.msk.f32.mxu0 %vm10046_vm1, %v10045_v8  ;;  %9665 = vmatpush3.msra.mxu0 %v8886_v43 }
0x42e4   : > { %9674 = vmatprep.subr.mxu0 %v10045_v8 }
0x4354   : > { %v7634_v32 = vpop.permute.xlu1 %7633 }
0x43a2   : > { %v7461_v61 = vpop.f32.mrf.mxu0 }
0x43a3   : > { %v7465_v23 = vsel %vm10339_vm4, %v7461_v61, -1e+09  ;;  %v8888_v61 = vld [vmem:[%s11406_s1 + $0x30] sm:$0xff] }
0x43a4   : > { %v7466_v25 = vsel %vm1180_vm2, %v7465_v23, -inf  ;;  %v9658_v3 = vpop.f32.mrf.mxu0 }
0x43a5   : > { %7467 = vmax.xlane.f32.xlu0 %v7466_v25 }
0x442e   : > { %v7468_v26 = vpop.xlane.xlu0 %7467 }
0x442f   : > { %v7469_v31 = vsub.f32 %v7465_v23, %v7468_v26 }
0x4431   : > { %v7470_v33 = vmul.f32 1.442695, %v7469_v31 }
0x4433   : > { %9930 = vpow2.f32 %v7470_v33 }
0x4440   : > { %v9931_v35 = vpop.eup %9930 }
0x4441   : > { %v7472_v39 = vsel %vm1180_vm2, %v9931_v35, 0.0 }
0x4442   : > { %7473 = vadd.xlane.f32.xlu0 %v7472_v39 }
0x4458   : > { %7477 = vrot.lane.b32.xlu0 %v11083_v59, %s11383_s23  ;;  %s8584_s23 = scalar_lea.sflag [#allocation3], %s1040_s25 }
0x44cb   : > { %v7474_v37 = vpop.xlane.xlu0 %7473 }
0x44cc   : > { %9932 = vrcp.f32 %v7474_v37 }
0x44cf   : > { %v7478_v38 = vpop.permute.xlu0 %7477 }
0x44d0   : > { %9660 = vmatpush3.msra.mxu1 %v7478_v38 }
0x44d1   : > { %9669 = vmatprep.subr.mxu1 %v10045_v8 }
0x44d9   : > { %v9933_v40 = vpop.eup %9932 }
0x44da   : > { %v7476_v41 = vmul.f32 %v9933_v40, %v9931_v35 }
0x44dc   : > { %9662 = vmatmul.mubr.msk.f32.vlgmr.msra.gmra.mxu1 %vm1180_vm2, %v7476_v41  ;;  %v8889_v41 = vld [vmem:[%s11406_s1 + $0x38] sm:$0xff] }
0x44dd   : > { %9670 = vmatpush3.xpose.msk.msra.mxu1 %vm1180_vm2, %v7636_v42  ;;  %9671 = vmatprep.mubr.msk.f32.mxu1 %vm10046_vm1, %v10045_v8 }
0x44de   : > { %9679 = vmatprep.subr.mxu1 %v10045_v8 }
0x44e0   : > { %9672 = vmatmul.mubr.msk.f32.vlgmr.msra.gmra.mxu1 %vm1180_vm2, %v7634_v32 }
0x44e1   : > { %9681 = vmatprep.mubr.msk.f32.mxu1 %vm10046_vm1, %v10045_v8  ;;  %9680 = vmatpush3.msra.mxu1 %v8887_v62  ;;  %v8923_v62 = vld [vmem:[%s11412_s0 + $0x68] sm:$0xff] }
0x44e2   : > { %9689 = vmatprep.subr.mxu1 %v10045_v8 }
0x459c   : > { %v7549_v44 = vpop.f32.mrf.mxu1 }
0x459d   : > { %9667 = vmatmul.mubr.msk.f32.vlgmr.msra.gmra.mxu0 %vm1180_vm2, %v7549_v44 }
0x459e   : > { %v9663_v19 = vpop.f32.mrf.mxu1  ;;  %9676 = vmatprep.mubr.msk.f32.mxu0 %vm10046_vm1, %v10045_v8 }
0x45a0   : > { %v7707_v45 = vpop.f32.mrf.mxu1 }
0x45a1   : > { %v7711_v46 = vsel %vm10339_vm4, %v7707_v45, -1e+09 }
0x45a2   : > { %v7712_v47 = vsel %vm1180_vm2, %v7711_v46, -inf  ;;  %v9673_v48 = vpop.f32.mrf.mxu1 }
0x45a3   : > { %7713 = vmax.xlane.f32.xlu1 %v7712_v47 }
0x45b4   : > { %7723 = vrot.lane.b32.xlu1 %v11083_v59, %s11384_s2 }
0x45b8   : > { %7873 = vrot.lane.b32.xlu1 %v11107_v21, %s11388_s13 }
0x462c   : > { %v7714_v50 = vpop.xlane.xlu1 %7713 }
0x462d   : > { %v7715_v51 = vsub.f32 %v7711_v46, %v7714_v50 }
0x462f   : > { %v7716_v52 = vmul.f32 1.442695, %v7715_v51 }
0x4630   : > { %v7724_v24 = vpop.permute.xlu1 %7723 }
0x4631   : > { %9934 = vpow2.f32 %v7716_v52  ;;  %9675 = vmatpush3.msra.mxu0 %v7724_v24 }
0x4632   : > { %9684 = vmatprep.subr.mxu0 %v10045_v8 }
0x4634   : > { %v7874_v60 = vpop.permute.xlu1 %7873 }
0x463e   : > { %v9935_v53 = vpop.eup %9934 }
0x463f   : > { %v7718_v54 = vsel %vm1180_vm2, %v9935_v53, 0.0 }
0x4640   : > { %7719 = vadd.xlane.f32.xlu0 %v7718_v54 }
0x4656   : > { %7875 = vrot.lane.b32.xlu0 %v11083_v59, %s11388_s13  ;;  %s11416_s13 = sld [smem:[#allocation39_spill]] }
0x465d   : > { %v7622_v28 = vpop.f32.mrf.mxu0 }
0x465e   : > { %v7632_v11 = vadd.f32 %v8900_v10, %v7622_v28  ;;  %v8920_v10 = vld [vmem:[%s11412_s0 + $0x50] sm:$0xff] }
0x465f   : > { %v9668_v55 = vpop.f32.mrf.mxu0 }
0x46c9   : > { %v7720_v56 = vpop.xlane.xlu0 %7719 }
0x46ca   : > { %9936 = vrcp.f32 %v7720_v56  ;;  %v8916_v56 = vld [vmem:[%s11410_s4 + $0x38] sm:$0xff] }
0x46cd   : > { %v7876_v34 = vpop.permute.xlu0 %7875 }
0x46d7   : > { %v9937_v27 = vpop.eup %9936 }
0x46d8   : > { %v7722_v30 = vmul.f32 %v9937_v27, %v9935_v53  ;;  %v8915_v27 = vld [vmem:[%s11410_s4 + $0x30] sm:$0xff] }
0x46da   : > { %9677 = vmatmul.mubr.msk.f32.vlgmr.msra.gmra.mxu0 %vm1180_vm2, %v7722_v30  ;;  %v8913_v30 = vld [vmem:[%s11410_s4 + $0x20] sm:$0xff] }
0x46db   : > { %9685 = vmatpush3.xpose.msk.msra.mxu0 %vm1180_vm2, %v7876_v34  ;;  %9686 = vmatprep.mubr.msk.f32.mxu0 %vm10046_vm1, %v10045_v8  ;;  %v8925_v34 = vld [vmem:[%s11412_s0 + $0x78] sm:$0xff] }
0x46dc   : > { %9694 = vmatprep.subr.mxu0 %v10045_v8 }
0x46de   : > { %9687 = vmatmul.mubr.msk.f32.vlgmr.msra.gmra.mxu0 %vm1180_vm2, %v7874_v60  ;;  %v8924_v60 = vld [vmem:[%s11412_s0 + $0x70] sm:$0xff] }
0x46df   : > { %9696 = vmatprep.mubr.msk.f32.mxu0 %vm10046_vm1, %v10045_v8  ;;  %9695 = vmatpush3.msra.mxu0 %v8888_v61 }
0x46e0   : > { %9704 = vmatprep.subr.mxu0 %v10045_v8 }
0x479a   : > { %v7795_v63 = vpop.f32.mrf.mxu0 }
0x479b   : > { %9682 = vmatmul.mubr.msk.f32.vlgmr.msra.gmra.mxu1 %vm1180_vm2, %v7795_v63  ;;  %v8922_v63 = vld [vmem:[%s11412_s0 + $0x60] sm:$0xff] }
0x479c   : > { %v9678_v1 = vpop.f32.mrf.mxu0  ;;  %9691 = vmatprep.mubr.msk.f32.mxu1 %vm10046_vm1, %v10045_v8 }
0x479d   : > { %v8921_v1 = vld [vmem:[%s11412_s0 + $0x58] sm:$0xff] }
0x479e   : > { %v7947_v58 = vpop.f32.mrf.mxu0 }
0x479f   : > { %v7951_v2 = vsel %vm10339_vm4, %v7947_v58, -1e+09 }
0x47a0   : > { %v7952_v4 = vsel %vm1180_vm2, %v7951_v2, -inf  ;;  %v9688_v5 = vpop.f32.mrf.mxu0 }
0x47a1   : > { %7953 = vmax.xlane.f32.xlu1 %v7952_v4  ;;  %v8927_v5 = vld [vmem:[%s10223_s20 + $0x2] sm:$0x3] }
0x47b2   : > { %7963 = vrot.lane.b32.xlu1 %v11083_v59, %s11389_s21  ;;  %s11417_s21 = sld [smem:[#allocation35_spill]] }
0x47b6   : > { %8113 = vrot.lane.b32.xlu1 %v11107_v21, %s11391_s26 }
0x482a   : > { %v7954_v0 = vpop.xlane.xlu1 %7953 }
0x482b   : > { %v7955_v6 = vsub.f32 %v7951_v2, %v7954_v0  ;;  %v8387_v0 = vrot.slane %v8927_v5, %v10312_v17 }
0x482d   : > { %v7956_v7 = vmul.f32 1.442695, %v7955_v6  ;;  %v8395_v6 = vrot.slane %v8927_v5, %v10316_v20 }
0x482e   : > { %v7964_v49 = vpop.permute.xlu1 %7963 }
0x482f   : > { %9938 = vpow2.f32 %v7956_v7  ;;  %9690 = vmatpush3.msra.mxu1 %v7964_v49 }
0x4830   : > { %9699 = vmatprep.subr.mxu1 %v10045_v8 }
0x4832   : > { %v8114_v22 = vpop.permute.xlu1 %8113 }
0x483c   : > { %v9939_v9 = vpop.eup %9938 }
0x483d   : > { %v7958_v29 = vsel %vm1180_vm2, %v9939_v9, 0.0 }
0x483e   : > { %7959 = vadd.xlane.f32.xlu0 %v7958_v29 }
0x4854   : > { %8115 = vrot.lane.b32.xlu0 %v11083_v59, %s11391_s26  ;;  %s1042_s26 = scalar_lea.vmem [#allocation2], %s8726_s3 }
0x4855   : > { %s8597_s22 = sshll.u32 %s1042_s26, 4  ;;  %s8598_s22 = int_to_ptr.vmem [resolvable:$true] %s8597_s22 }
0x4856   : > { %s9950_s7 = scalar_lea.vmem %s8598_s22, 128 }
0x4857   : > { %p9951_p11 = scmp.ne.s32.totalorder %s8598_s22, %s9950_s7 }
0x4859   : > { %p9952_p12 = pnand %p9951_p11, %p10273_p5 }
0x485b   : > { %v7868_v12 = vpop.f32.mrf.mxu1  ;;  %p9953_p13 = pneg %p9952_p12 }
0x485c   : > { %v7872_v13 = vadd.f32 %v7868_v12, %v7632_v11  ;;  %v8919_v11 = vld [vmem:[%s11412_s0 + $0x48] sm:$0xff]  ;;  %v8918_v12 = vld [vmem:[%s11412_s0 + $0x40] sm:$0xff] }
0x485d   : > { %v9683_v14 = vpop.f32.mrf.mxu1 }
0x48c7   : > { %v7960_v15 = vpop.xlane.xlu0 %7959 }
0x48c8   : > { %9940 = vrcp.f32 %v7960_v15 }
0x48cb   : > { %v8116_v21 = vpop.permute.xlu0 %8115 }
0x48d5   : > { %v9941_v16 = vpop.eup %9940 }
0x48d6   : > { %v7962_v18 = vmul.f32 %v9941_v16, %v9939_v9 }
0x48d8   : > { %9692 = vmatmul.mubr.msk.f32.vlgmr.msra.gmra.mxu1 %vm1180_vm2, %v7962_v18 }
0x48d9   : > { %9700 = vmatpush3.xpose.msk.msra.mxu1 %vm1180_vm2, %v8116_v21  ;;  %9701 = vmatprep.mubr.msk.f32.mxu1 %vm10046_vm1, %v10045_v8  ;;  %v8931_v21 = vld [vmem:[%s10218_s12 + $0x1] ss:$0 sm:$0xff] }
0x48da   : > { %9709 = vmatprep.subr.mxu1 %v10045_v8 }
0x48dc   : > { %9702 = vmatmul.mubr.msk.f32.vlgmr.msra.gmra.mxu1 %vm1180_vm2, %v8114_v22 }
0x48dd   : > { %9711 = vmatprep.mubr.msk.f32.mxu1 %vm10046_vm1, %v10045_v8  ;;  %9710 = vmatpush3.msra.mxu1 %v8889_v41 }
0x48de   : > { %9725 = vmatprep.subr.mxu1 %v10045_v8 }
0x4998   : > { %v8035_v23 = vpop.f32.mrf.mxu1 }
0x4999   : > { %9697 = vmatmul.mubr.msk.f32.vlgmr.msra.gmra.mxu0 %vm1180_vm2, %v8035_v23 }
0x499a   : > { %v9693_v25 = vpop.f32.mrf.mxu1  ;;  %9706 = vmatprep.mubr.msk.f32.mxu0 %vm10046_vm1, %v10045_v8 }
0x499c   : > { %v8187_v3 = vpop.f32.mrf.mxu1 }
0x499d   : > { %v8191_v26 = vsel %vm10339_vm4, %v8187_v3, -1e+09 }
0x499e   : > { %v8192_v31 = vsel %vm1180_vm2, %v8191_v26, -inf  ;;  %v9703_v33 = vpop.f32.mrf.mxu1 }
0x499f   : > { %8193 = vmax.xlane.f32.xlu1 %v8192_v31 }
0x49b0   : > { %8203 = vrot.lane.b32.xlu1 %v11083_v59, %s11392_s11  ;;  %s8933_s11 = sshll.u32 %s11416_s13, 7 }
0x49b1   : > { %s8595_s2 = scalar_lea.hbm %s11417_s21, %s8933_s11 }
0x4a28   : > { %v8194_v35 = vpop.xlane.xlu1 %8193 }
0x4a29   : > { %v8195_v39 = vsub.f32 %v8191_v26, %v8194_v35 }
0x4a2b   : > { %v8196_v37 = vmul.f32 1.442695, %v8195_v39 }
0x4a2c   : > { %v8204_v38 = vpop.permute.xlu1 %8203 }
0x4a2d   : > { %9942 = vpow2.f32 %v8196_v37  ;;  %9705 = vmatpush3.msra.mxu0 %v8204_v38 }
0x4a2e   : > { %9714 = vmatprep.subr.mxu0 %v10045_v8 }
0x4a3a   : > { %v9943_v40 = vpop.eup %9942 }
0x4a3b   : > { %v8198_v36 = vsel %vm1180_vm2, %v9943_v40, 0.0 }
0x4a3c   : > { %8199 = vadd.xlane.f32.xlu0 %v8198_v36 }
0x4a59   : > { %v8108_v42 = vpop.f32.mrf.mxu0 }
0x4a5a   : > { %v8112_v32 = vadd.f32 %v8108_v42, %v7872_v13  ;;  %v8928_v13 = vld [vmem:[%s11414_s27 + $0x1] ss:$0 sm:$0xff] }
0x4a5b   : > { %v9698_v43 = vpop.f32.mrf.mxu0 }
0x4ac5   : > { %v8200_v59 = vpop.xlane.xlu0 %8199 }
0x4ac6   : > { %9944 = vrcp.f32 %v8200_v59 }
0x4ad3   : > { %v9945_v44 = vpop.eup %9944 }
0x4ad4   : > { %v8202_v19 = vmul.f32 %v9945_v44, %v9943_v40  ;;  %v8558_v40 = vld [vmem:[%s11415_s5] sm:$0x3]  ;;  %s9954_s5 = sshll.u32 %s10059_s15, 4  ;;  %s9955_s5 = int_to_ptr.vmem [resolvable:$false] %s9954_s5 }
0x4ad5   : > { %v8572_v36 = vrot.slane %v8558_v40, %v10312_v17  ;;  %v8580_v41 = vrot.slane %v8558_v40, %v10316_v20  ;;  %s9956_s0 = scalar_lea.vmem %s9955_s5, 256  ;;  %p9957_p0 = scmp.lt.s32.totalorder %s8598_s22, %s9955_s5 }
0x4ad6   : > { %9707 = vmatmul.mubr.msk.f32.vlgmr.msra.gmra.mxu0 %vm1180_vm2, %v8202_v19  ;;  %p9958_p1 = scmp.lt.s32.totalorder %s9956_s0, %s9950_s7 }
0x4ad7   : > { %9722 = vmatprep.mubr.msk.f32.mxu0 %vm10046_vm1, %v10045_v8  ;;  %9715 = vmatpush3.msra.mxu0 %v8916_v56 }
0x4ad8   : > { %9716 = vmatprep.subr.mxu0 %v10045_v8  ;;  %p9959_p2 = por %p9958_p1, %p9957_p0 }
0x4ad9   : > { %9717 = vmatpush3.msra.mxu0 %v8915_v27 }
0x4ada   : > { %9718 = vmatprep.subr.mxu0 %v10045_v8  ;;  %p9960_p3 = pnand %p9959_p2, %p9953_p13 }
0x4b96   : > { %v8275_v45 = vpop.f32.mrf.mxu0 }
0x4b97   : > { %9712 = vmatmul.mubr.msk.f32.vlgmr.msra.gmra.mxu1 %vm1180_vm2, %v8275_v45 }
0x4b98   : > { %v9708_v46 = vpop.f32.mrf.mxu0  ;;  %9741 = vmatprep.mubr.msk.f32.mxu1 %vm10046_vm1, %v10045_v8  ;;  %9726 = vmatpush3.msra.mxu1 %v8925_v34 }
0x4b99   : > { %9727 = vmatprep.subr.mxu1 %v10045_v8 }
0x4b9a   : > { %9728 = vmatpush3.msra.mxu1 %v8924_v60 }
0x4b9b   : > { %9729 = vmatprep.subr.mxu1 %v10045_v8 }
0x4b9c   : > { %9730 = vmatpush3.msra.mxu1 %v8923_v62 }
0x4b9d   : > { %9731 = vmatprep.subr.mxu1 %v10045_v8 }
0x4b9e   : > { %9732 = vmatpush3.msra.mxu1 %v8922_v63 }
0x4b9f   : > { %9733 = vmatprep.subr.mxu1 %v10045_v8 }
0x4ba0   : > { %9734 = vmatpush3.msra.mxu1 %v8921_v1 }
0x4ba1   : > { %9735 = vmatprep.subr.mxu1 %v10045_v8 }
0x4ba2   : > { %9736 = vmatpush3.msra.mxu1 %v8920_v10 }
0x4ba3   : > { %9737 = vmatprep.subr.mxu1 %v10045_v8 }
0x4ba4   : > { %9738 = vmatpush3.msra.mxu1 %v8919_v11 }
0x4ba5   : > { %9739 = vmatprep.subr.mxu1 %v10045_v8 }
0x4ba6   : > { %9740 = vmatpush3.msra.mxu1 %v8918_v12 }
0x4c57   : > { %v8348_v47 = vpop.f32.mrf.mxu1 }
0x4c58   : > { %v8352_v48 = vadd.f32 %v8348_v47, %v8112_v32 }
0x4c59   : > { %v9713_v50 = vpop.f32.mrf.mxu1 }
0x4c5a   : > { %v11200_v51 = vadd.f32 %v8352_v48, %v11078_v57  ;;  %v8914_v57 = vld [vmem:[%s11410_s4 + $0x28] sm:$0xff] }
0x4c5b   : > { %9719 = vmatpush3.msra.mxu0 %v8914_v57 }
0x4c5c   : > { %v8374_v52 = vsel %vm1073_vm0, %v11200_v51, 0.0  ;;  %9720 = vmatprep.subr.mxu0 %v10045_v8 }
0x4c5d   : > { %8375 = vadd.xlane.f32.xlu0 %v8374_v52  ;;  %9721 = vmatpush3.msra.mxu0 %v8913_v30 }
0x4ce6   : > { %v8376_v24 = vpop.xlane.xlu0 %8375 }
0x4ce7   : > { %v8377_v53 = vmul.f32 0.03125, %v8376_v24 }
0x4ce9   : > { %v8378_v54 = vsub.f32 %v11200_v51, %v8377_v53 }
0x4ceb   : > { %v8379_v28 = vmul.f32 %v8378_v54, %v8378_v54  ;;  %v8388_v7 = vmul.f32 %v8387_v0, %v8378_v54 }
0x4ced   : > { %v8380_v55 = vsel %vm1073_vm0, %v8379_v28, 0.0 }
0x4cee   : > { %8381 = vadd.xlane.f32.xlu0 %v8380_v55 }
0x4d77   : > { %v8382_v58 = vpop.xlane.xlu0 %8381 }
0x4d78   : > { %v8383_v2 = vmul.f32 0.03125, %v8382_v58 }
0x4d7a   : > { %v8389_v4 = vadd.f32 1e-06, %v8383_v2 }
0x4d7c   : > { %9946 = vrsqrt.f32 %v8389_v4 }
0x4d89   : > { %v9947_v49 = vpop.eup %9946 }
0x4d8a   : > { %v8391_v9 = vmul.f32 %v9947_v49, %v8388_v7 }
0x4d8c   : > { %v8396_v29 = vadd.f32 %v8395_v6, %v8391_v9 }
0x4d8e   : > { %9723 = vmatmul.mubr.msk.f32.vlgmr.msra.gmra.mxu0 %vm1073_vm0, %v8396_v29 }
0x4e4e   : > { %v8472_v14 = vpop.f32.mrf.mxu0 }
0x4e4f   : > { %v8473_v15 = vadd.f32 %v8928_v13, %v8472_v14 }
0x4e50   : > { %v9724_v16 = vpop.f32.mrf.mxu0 }
0x4e51   : > { %v8476_v18 = vmax.f32 %v8473_v15, 0.0 }
0x4e53   : > { %9742 = vmatmul.mubr.msk.f32.vlgmr.msra.gmra.mxu1 %vm2269_vm5, %v8476_v18 }
0x4f13   : > { %v8546_v22 = vpop.f32.mrf.mxu1 }
0x4f14   : > { %v8550_v61 = vadd.f32 %v8546_v22, %v11200_v51 }
0x4f15   : > { %v9743_v23 = vpop.f32.mrf.mxu1 }
0x4f16   : > { %v8557_v25 = vadd.f32 %v8931_v21, %v8550_v61 }
0x4f18   : > { %v8559_v3 = vsel %vm1073_vm0, %v8557_v25, 0.0 }
0x4f19   : > { %8560 = vadd.xlane.f32.xlu0 %v8559_v3 }
0x4fa2   : > { %v8561_v8 = vpop.xlane.xlu0 %8560 }
0x4fa3   : > { %v8562_v26 = vmul.f32 0.03125, %v8561_v8 }
0x4fa5   : > { %v8563_v31 = vsub.f32 %v8557_v25, %v8562_v26 }
0x4fa7   : > { %v8564_v33 = vmul.f32 %v8563_v31, %v8563_v31  ;;  %v8573_v42 = vmul.f32 %v8572_v36, %v8563_v31 }
0x4fa9   : > { %v8565_v35 = vsel %vm1073_vm0, %v8564_v33, 0.0 }
0x4faa   : > { %8566 = vadd.xlane.f32.xlu0 %v8565_v35 }
0x5033   : > { %v8567_v39 = vpop.xlane.xlu0 %8566 }
0x5034   : > { %v8568_v37 = vmul.f32 0.03125, %v8567_v39 }
0x5036   : > { %v8574_v38 = vadd.f32 1e-06, %v8568_v37 }
0x5038   : > { %9948 = vrsqrt.f32 %v8574_v38 }
0x5045   : > { %v9949_v32 = vpop.eup %9948 }
0x5046   : > { %v8576_v43 = vmul.f32 %v9949_v32, %v8573_v42 }
0x5048   : > { %v8581_v59 = vadd.f32 %v8580_v41, %v8576_v43 }
0x504a   : > { %8582 = vst.msk [vmem:[%s1042_s26] sm:$0xff] %vm1073_vm0, %v8581_v59 }
0x504b   : > { %9963 = shalt.err (!%p9960_p3)
}
0x504c   : > { %s9964_s13 = scalar_lea.hbm %s8595_s2, 128  ;;  %s9968_s25 = scalar_lea.hbm %s11417_s21, 256 }
0x504d   : > { %p9965_p4 = scmp.ne.s32.totalorder %s8595_s2, %s9964_s13  ;;  %p9969_p9 = scmp.lt.s32.totalorder %s8595_s2, %s11417_s21 }
0x504e   : > { %p9970_p10 = scmp.lt.s32.totalorder %s9968_s25, %s9964_s13 }
0x504f   : > { %p9966_p7 = pnand %p9965_p4, %p10273_p5 }
0x5050   : > { %p9971_p11 = por %p9970_p10, %p9969_p9 }
0x5051   : > { %p9967_p8 = pneg %p9966_p7 }
0x5053   : > { %p9972_p12 = pnand %p9971_p11, %p9967_p8 }
0x5055   : > { %9975 = shalt.err (!%p9972_p12)
}
0x5056   : > { %9744 = dma.vmem_to_hbm [thread:$0]  (%p10273_p5), %s8598_s22, 128, %s8595_s2, %s8584_s23  }
0x5057 PF: > { %s11419_s0 = sld [smem:[#allocation38_spill]] }
0x5058   : > { %s11420_s3 = sld [smem:[#allocation36_spill]] }
0x505d   : > { %p9750_p13 = scmp.ge.s32.totalorder %s11419_s0, 2 }
0x505e   : > { %s8609_s26 = sand.u32 1, %s11420_s3  }
0x505f   : > { %p9747_p0 = pnand %p9750_p13, %p10277_p6  ;;  %s8610_s7 = scalar_lea.sflag [#allocation3], %s8609_s26 }
0x5061   : > { %p9748_p1 = pneg %p9747_p0 }
0x5063   : > { %9993 = dma.done.wait (%p9748_p1), %s8610_s7, 128  }
0x5064   : > { %9995 = vsyncadd (%p9748_p1), %s8610_s7, 4294967168  ;;  %s11422_s15 = sld [smem:[#allocation40_spill]]  ;;  %s11425_s7 = smov %s10002_s10 }
0x5065   : > { %s11423_s5 = sld [smem:[#allocation37_spill]] }
0x5066   : > { %s11424_s11 = sld [smem:[#allocation41_spill]] }
0x506a   : > { %p77_p2 = scmp.ge.s32.totalorder %s11422_s15, 4  }
0x506b   : > { %s11426_s10 = smov %s11423_s5 }
0x506c   :  { %79 = sbr.rel (!%p77_p2) target bundleno = 76 (0x4c), region = 256 }
0x5071   :  { %8615 = vsyncpa [#allocation3], 1 }
0x5072   :  { %8617 = vsyncpa [#allocation3 + $0x1], 1 }

</bundles_post_ra>
